<compile_context>
chip_gen: v7x
topology: tpu7x:2x2x1
jax: 0.10.0
libtpu: 0.0.40
codegen_flags: <defaults>
</compile_context>

<pallas_src>
import functools

import jax
import jax.numpy as jnp
from jax import lax
from jax.experimental import pallas as pl
from jax.experimental.pallas import tpu as pltpu


def _attention_kernel(x_ref, g_ref, be_ref, wqkv_ref, wo_ref, bo_ref,
                      o_ref, qkv_ref, *, heads, dim_head, seq_len,
                      batch_per_block):
    """One grid step == `batch_per_block` batch elements (m = b_blk*n rows)."""
    n = seq_len
    d = wo_ref.shape[1]
    inner = heads * dim_head

    x = x_ref[...].astype(jnp.float32)                        # (m, d)

    # --- pre-norm (f32), single reduction pass: var = E[x^2] - E[x]^2 -------
    mean = jnp.mean(x, axis=-1, keepdims=True)
    var = jnp.mean(x * x, axis=-1, keepdims=True) - mean * mean
    xn = (x - mean) * lax.rsqrt(var + 1e-5)                   # torch eps = 1e-5
    xn = xn * g_ref[...] + be_ref[...]

    # --- fused qkv projection (bias-free): bf16 MXU operands, f32 acc -------
    # result staged in a bf16 VMEM scratch; q-scale already folded into wqkv.
    qkv_ref[...] = jnp.dot(xn.astype(jnp.bfloat16), wqkv_ref[...],
                           preferred_element_type=jnp.float32
                           ).astype(jnp.bfloat16)

    bias = bo_ref[...].astype(jnp.float32)                     # (1, d)

    # --- per-(batch, head) softmax attention + fused output projection ------
    for bi in range(batch_per_block):
        r0 = bi * n
        out_acc = jnp.zeros((n, d), jnp.float32)               # lane-dense acc
        for h in range(heads):
            c0 = h * dim_head
            qh = qkv_ref[r0:r0 + n, c0:c0 + dim_head]                      # bf16
            kh = qkv_ref[r0:r0 + n, inner + c0:inner + c0 + dim_head]      # bf16
            vh = qkv_ref[r0:r0 + n, 2 * inner + c0:2 * inner + c0 + dim_head]
            dots = lax.dot_general(qh, kh, (((1,), (1,)), ((), ())),
                                   preferred_element_type=jnp.float32)     # (n, n)
            m = jnp.max(dots, axis=-1, keepdims=True)
            p = jnp.exp(dots - m)                               # f32 softmax
            denom = jnp.sum(p, axis=-1, keepdims=True)
            attn = p * pl.reciprocal(denom, approx=True)
            oh = jnp.dot(attn.astype(jnp.bfloat16), vh,
                         preferred_element_type=jnp.float32)    # (n, dh) f32
            # fold output projection into the head loop -> stay lane-dense
            out_acc = out_acc + jnp.dot(oh.astype(jnp.bfloat16),
                                        wo_ref[c0:c0 + dim_head, :],
                                        preferred_element_type=jnp.float32)
        o_ref[r0:r0 + n, :] = (out_acc + bias).astype(o_ref.dtype)


def attention(x, ln_g, ln_b, w_qkv, w_out, b_out, *, heads, dim_head):
    """x: (b, n, dim).  Returns (b, n, dim).  Matches Attention.forward."""
    b, n, d = x.shape
    inner = heads * dim_head
    assert w_qkv.shape == (d, 3 * inner) and w_out.shape == (inner, d)

    # Fold batch into row-blocks: aim for >=128 rows per grid step (MXU fill)
    # while keeping >=2 grid steps so v7x's two TensorCores both get work.
    b_blk = max(1, min(b, 128 // n)) if n < 128 else 1
    while b % b_blk:
        b_blk -= 1
    if b >= 2 and b // b_blk < 2:
        b_blk = b // 2 if b % 2 == 0 else 1
    grid_steps = b // b_blk
    m_blk = b_blk * n

    # q scale folded into the q-columns of the (bias-free) qkv weight; ship
    # matmul weights as bf16 (halves weight DMA + VMEM); biases / LN stay f32.
    scale = dim_head ** (-0.5)
    col_scale = jnp.concatenate(
        [jnp.full((inner,), scale, w_qkv.dtype),
         jnp.ones((2 * inner,), w_qkv.dtype)])
    w_qkv_bf = (w_qkv * col_scale[None, :]).astype(jnp.bfloat16)
    w_out_bf = w_out.astype(jnp.bfloat16)

    x2 = x.reshape(b * n, d)        # contiguous -> metadata-only reshape

    flops = b * (2 * n * d * 3 * inner
                 + heads * (4 * n * n * dim_head + 2 * n * dim_head * d))
    transcendentals = b * (heads * n * n + heads * n + n)
    bytes_accessed = (4 * 2 * b * n * d
                      + 2 * (d * 3 * inner + inner * d) + 4 * 3 * d)

    kernel = functools.partial(_attention_kernel, heads=heads,
                               dim_head=dim_head, seq_len=n,
                               batch_per_block=b_blk)

    out = pl.pallas_call(
        kernel,
        out_shape=jax.ShapeDtypeStruct((b * n, d), x.dtype),
        grid=(grid_steps,),
        in_specs=[
            pl.BlockSpec((m_blk, d), lambda i: (i, 0)),        # x rows
            pl.BlockSpec((1, d), lambda i: (0, 0)),            # LN gamma
            pl.BlockSpec((1, d), lambda i: (0, 0)),            # LN beta
            pl.BlockSpec((d, 3 * inner), lambda i: (0, 0)),    # w_qkv (bf16)
            pl.BlockSpec((inner, d), lambda i: (0, 0)),        # w_out (bf16)
            pl.BlockSpec((1, d), lambda i: (0, 0)),            # b_out
        ],
        out_specs=pl.BlockSpec((m_blk, d), lambda i: (i, 0)),
        scratch_shapes=[pltpu.VMEM((m_blk, 3 * inner), jnp.bfloat16)],
        compiler_params=pltpu.CompilerParams(
            dimension_semantics=("parallel",)),                # megacore
        cost_estimate=pl.CostEstimate(flops=flops,
                                      transcendentals=transcendentals,
                                      bytes_accessed=bytes_accessed),
    )(x2, ln_g.reshape(1, d), ln_b.reshape(1, d), w_qkv_bf, w_out_bf,
      b_out.reshape(1, d))
    return out.reshape(b, n, d)


# ----------------------------------------------------------------------------
if __name__ == "__main__":
    # small ViT-tiny-like shapes; B=4 exercises batch folding (2 steps x 2 batch)
    B, N, DIM, HEADS, DIM_HEAD = 4, 64, 128, 4, 32
    INNER = HEADS * DIM_HEAD

    key = jax.random.PRNGKey(0)
    kx, kq, ko, kb = jax.random.split(key, 4)
    x = jax.random.normal(kx, (B, N, DIM), jnp.float32)
    ln_g = jnp.ones((DIM,), jnp.float32)
    ln_b = jnp.zeros((DIM,), jnp.float32)
    w_qkv = 0.02 * jax.random.normal(kq, (DIM, 3 * INNER), jnp.float32)
    w_out = 0.02 * jax.random.normal(ko, (INNER, DIM), jnp.float32)
    b_out = 0.01 * jax.random.normal(kb, (DIM,), jnp.float32)

    out = attention(x, ln_g, ln_b, w_qkv, w_out, b_out,
                    heads=HEADS, dim_head=DIM_HEAD)
    out = jax.block_until_ready(out)

    # pure-JAX reference of Attention.forward (dropout = 0 -> identity)
    def ref_forward(xx):
        mu = xx.mean(-1, keepdims=True)
        var = ((xx - mu) ** 2).mean(-1, keepdims=True)
        xn = (xx - mu) / jnp.sqrt(var + 1e-5) * ln_g + ln_b
        qkv = xn @ w_qkv
        q, k, v = jnp.split(qkv, 3, axis=-1)
        split = lambda t: t.reshape(B, N, HEADS, DIM_HEAD).transpose(0, 2, 1, 3)
        q, k, v = map(split, (q, k, v))
        dots = jnp.einsum('bhnd,bhmd->bhnm', q, k) * DIM_HEAD ** (-0.5)
        attn = jax.nn.softmax(dots, axis=-1)
        o = jnp.einsum('bhnm,bhmd->bhnd', attn, v)
        o = o.transpose(0, 2, 1, 3).reshape(B, N, INNER)
        return o @ w_out + b_out

    expected = ref_forward(x)
    assert out.shape == (B, N, DIM), out.shape
    assert bool(jnp.all(jnp.isfinite(out)))
    max_err = float(jnp.max(jnp.abs(out - expected)))
    assert max_err < 1e-2, f"max abs error {max_err}"
    print("KERNEL_OK")
</pallas_src>

<mosaic_0001>
module attributes {stable_mosaic.version = 11 : i64} {
  func.func @_attention_kernel(%arg0: i32, %arg1: memref<128x128xf32, #tpu.memory_space<vmem>>, %arg2: memref<1x128xf32, #tpu.memory_space<vmem>>, %arg3: memref<1x128xf32, #tpu.memory_space<vmem>>, %arg4: memref<128x384xbf16, #tpu.memory_space<vmem>>, %arg5: memref<128x128xbf16, #tpu.memory_space<vmem>>, %arg6: memref<1x128xf32, #tpu.memory_space<vmem>>, %arg7: memref<128x128xf32, #tpu.memory_space<vmem>>, %arg8: memref<128x384xbf16, #tpu.memory_space<vmem>>) attributes {dimension_semantics = [#tpu.dimension_semantics<parallel>], iteration_bounds = array<i64: 2>, scalar_prefetch = 0 : i64, scratch_operands = 1 : i64, tpu.core_type = #tpu.core_type<tc>, window_params = [{transform_indices = @transform_0, window_bounds = array<i64: 128, 128>}, {pipeline_mode = #tpu.pipeline_mode<synchronous>, transform_indices = @transform_1, window_bounds = array<i64: 1, 128>}, {pipeline_mode = #tpu.pipeline_mode<synchronous>, transform_indices = @transform_2, window_bounds = array<i64: 1, 128>}, {pipeline_mode = #tpu.pipeline_mode<synchronous>, transform_indices = @transform_3, window_bounds = array<i64: 128, 384>}, {pipeline_mode = #tpu.pipeline_mode<synchronous>, transform_indices = @transform_4, window_bounds = array<i64: 128, 128>}, {pipeline_mode = #tpu.pipeline_mode<synchronous>, transform_indices = @transform_5, window_bounds = array<i64: 1, 128>}, {transform_indices = @transform_6, window_bounds = array<i64: 128, 128>}]} {
    %c0 = arith.constant 0 : index
    %c0_0 = arith.constant 0 : index
    %0 = vector.load %arg1[%c0, %c0_0] : memref<128x128xf32, #tpu.memory_space<vmem>>, vector<128x128xf32>
    %cst = arith.constant dense<0.000000e+00> : vector<128xf32>
    %1 = vector.multi_reduction <add>, %0, %cst [1] : vector<128x128xf32> to vector<128xf32>
    %2 = vector.shape_cast %1 : vector<128xf32> to vector<128x1xf32>
    %cst_1 = arith.constant 1.280000e+02 : f32
    %3 = vector.broadcast %cst_1 : f32 to vector<128x1xf32>
    %4 = arith.divf %2, %3 : vector<128x1xf32>
    %5 = arith.mulf %0, %0 : vector<128x128xf32>
    %cst_2 = arith.constant dense<0.000000e+00> : vector<128xf32>
    %6 = vector.multi_reduction <add>, %5, %cst_2 [1] : vector<128x128xf32> to vector<128xf32>
    %7 = vector.shape_cast %6 : vector<128xf32> to vector<128x1xf32>
    %cst_3 = arith.constant 1.280000e+02 : f32
    %8 = vector.broadcast %cst_3 : f32 to vector<128x1xf32>
    %9 = arith.divf %7, %8 : vector<128x1xf32>
    %10 = arith.mulf %4, %4 : vector<128x1xf32>
    %11 = arith.subf %9, %10 : vector<128x1xf32>
    %12 = vector.broadcast %4 : vector<128x1xf32> to vector<128x128xf32>
    %13 = arith.subf %0, %12 : vector<128x128xf32>
    %cst_4 = arith.constant 9.99999974E-6 : f32
    %14 = vector.broadcast %cst_4 : f32 to vector<128x1xf32>
    %15 = arith.addf %11, %14 : vector<128x1xf32>
    %16 = math.rsqrt %15 : vector<128x1xf32>
    %17 = vector.broadcast %16 : vector<128x1xf32> to vector<128x128xf32>
    %18 = arith.mulf %13, %17 : vector<128x128xf32>
    %c0_5 = arith.constant 0 : index
    %c0_6 = arith.constant 0 : index
    %19 = vector.load %arg2[%c0_5, %c0_6] : memref<1x128xf32, #tpu.memory_space<vmem>>, vector<1x128xf32>
    %20 = vector.broadcast %19 : vector<1x128xf32> to vector<128x128xf32>
    %21 = arith.mulf %18, %20 : vector<128x128xf32>
    %c0_7 = arith.constant 0 : index
    %c0_8 = arith.constant 0 : index
    %22 = vector.load %arg3[%c0_7, %c0_8] : memref<1x128xf32, #tpu.memory_space<vmem>>, vector<1x128xf32>
    %23 = vector.broadcast %22 : vector<1x128xf32> to vector<128x128xf32>
    %24 = arith.addf %21, %23 : vector<128x128xf32>
    %25 = arith.truncf %24 : vector<128x128xf32> to vector<128x128xbf16>
    %c0_9 = arith.constant 0 : index
    %c0_10 = arith.constant 0 : index
    %26 = vector.load %arg4[%c0_9, %c0_10] : memref<128x384xbf16, #tpu.memory_space<vmem>>, vector<128x384xbf16>
    %cst_11 = arith.constant dense<0.000000e+00> : vector<128x384xf32>
    %27 = tpu.matmul %25, %26, %cst_11 {dimension_numbers = #tpu.dot_dimension_numbers<[1], [0], [0], [1], [0, 0, 1, 1], [], []>} : vector<128x128xbf16>, vector<128x384xbf16>, vector<128x384xf32> -> vector<128x384xf32>
    %28 = arith.truncf %27 : vector<128x384xf32> to vector<128x384xbf16>
    %c0_12 = arith.constant 0 : index
    %c0_13 = arith.constant 0 : index
    %29 = vector.load %arg8[%c0_12, %c0_13] : memref<128x384xbf16, #tpu.memory_space<vmem>>, vector<128x384xbf16>
    tpu.vector_store %arg8[%c0_12, %c0_13], %28 {strides = array<i32>} : memref<128x384xbf16, #tpu.memory_space<vmem>>, vector<128x384xbf16>,
    %c0_14 = arith.constant 0 : index
    %c0_15 = arith.constant 0 : index
    %30 = vector.load %arg6[%c0_14, %c0_15] : memref<1x128xf32, #tpu.memory_space<vmem>>, vector<1x128xf32>
    %cst_16 = arith.constant 0.000000e+00 : f32
    %31 = vector.broadcast %cst_16 : f32 to vector<64x128xf32>
    %c0_17 = arith.constant 0 : index
    %c0_18 = arith.constant 0 : index
    %32 = vector.load %arg8[%c0_17, %c0_18] : memref<128x384xbf16, #tpu.memory_space<vmem>>, vector<64x32xbf16>
    %c0_19 = arith.constant 0 : index
    %c128 = arith.constant 128 : index
    %33 = vector.load %arg8[%c0_19, %c128] : memref<128x384xbf16, #tpu.memory_space<vmem>>, vector<64x32xbf16>
    %c0_20 = arith.constant 0 : index
    %c256 = arith.constant 256 : index
    %34 = vector.load %arg8[%c0_20, %c256] : memref<128x384xbf16, #tpu.memory_space<vmem>>, vector<64x32xbf16>
    %cst_21 = arith.constant dense<0.000000e+00> : vector<64x64xf32>
    %35 = tpu.matmul %32, %33, %cst_21 {dimension_numbers = #tpu.dot_dimension_numbers<[1], [1], [0], [0], [0, 0, 1, 0], [], []>} : vector<64x32xbf16>, vector<64x32xbf16>, vector<64x64xf32> -> vector<64x64xf32>
    %cst_22 = arith.constant dense<0xFF800000> : vector<64xf32>
    %36 = vector.multi_reduction <maximumf>, %35, %cst_22 [1] : vector<64x64xf32> to vector<64xf32>
    %37 = vector.shape_cast %36 : vector<64xf32> to vector<64x1xf32>
    %38 = vector.broadcast %37 : vector<64x1xf32> to vector<64x64xf32>
    %39 = arith.subf %35, %38 : vector<64x64xf32>
    %40 = math.exp %39 : vector<64x64xf32>
    %cst_23 = arith.constant dense<0.000000e+00> : vector<64xf32>
    %41 = vector.multi_reduction <add>, %40, %cst_23 [1] : vector<64x64xf32> to vector<64xf32>
    %42 = vector.shape_cast %41 : vector<64xf32> to vector<64x1xf32>
    %43 = tpu.reciprocal %42 {approx = true} : vector<64x1xf32> -> vector<64x1xf32>
    %44 = vector.broadcast %43 : vector<64x1xf32> to vector<64x64xf32>
    %45 = arith.mulf %40, %44 : vector<64x64xf32>
    %46 = arith.truncf %45 : vector<64x64xf32> to vector<64x64xbf16>
    %cst_24 = arith.constant dense<0.000000e+00> : vector<64x32xf32>
    %47 = tpu.matmul %46, %34, %cst_24 {dimension_numbers = #tpu.dot_dimension_numbers<[1], [0], [0], [1], [0, 0, 1, 1], [], []>} : vector<64x64xbf16>, vector<64x32xbf16>, vector<64x32xf32> -> vector<64x32xf32>
    %48 = arith.truncf %47 : vector<64x32xf32> to vector<64x32xbf16>
    %c0_25 = arith.constant 0 : index
    %c0_26 = arith.constant 0 : index
    %49 = vector.load %arg5[%c0_25, %c0_26] : memref<128x128xbf16, #tpu.memory_space<vmem>>, vector<32x128xbf16>
    %cst_27 = arith.constant dense<0.000000e+00> : vector<64x128xf32>
    %50 = tpu.matmul %48, %49, %cst_27 {dimension_numbers = #tpu.dot_dimension_numbers<[1], [0], [0], [1], [0, 0, 1, 1], [], []>} : vector<64x32xbf16>, vector<32x128xbf16>, vector<64x128xf32> -> vector<64x128xf32>
    %51 = arith.addf %31, %50 : vector<64x128xf32>
    %c0_28 = arith.constant 0 : index
    %c32 = arith.constant 32 : index
    %52 = vector.load %arg8[%c0_28, %c32] : memref<128x384xbf16, #tpu.memory_space<vmem>>, vector<64x32xbf16>
    %c0_29 = arith.constant 0 : index
    %c160 = arith.constant 160 : index
    %53 = vector.load %arg8[%c0_29, %c160] : memref<128x384xbf16, #tpu.memory_space<vmem>>, vector<64x32xbf16>
    %c0_30 = arith.constant 0 : index
    %c288 = arith.constant 288 : index
    %54 = vector.load %arg8[%c0_30, %c288] : memref<128x384xbf16, #tpu.memory_space<vmem>>, vector<64x32xbf16>
    %cst_31 = arith.constant dense<0.000000e+00> : vector<64x64xf32>
    %55 = tpu.matmul %52, %53, %cst_31 {dimension_numbers = #tpu.dot_dimension_numbers<[1], [1], [0], [0], [0, 0, 1, 0], [], []>} : vector<64x32xbf16>, vector<64x32xbf16>, vector<64x64xf32> -> vector<64x64xf32>
    %cst_32 = arith.constant dense<0xFF800000> : vector<64xf32>
    %56 = vector.multi_reduction <maximumf>, %55, %cst_32 [1] : vector<64x64xf32> to vector<64xf32>
    %57 = vector.shape_cast %56 : vector<64xf32> to vector<64x1xf32>
    %58 = vector.broadcast %57 : vector<64x1xf32> to vector<64x64xf32>
    %59 = arith.subf %55, %58 : vector<64x64xf32>
    %60 = math.exp %59 : vector<64x64xf32>
    %cst_33 = arith.constant dense<0.000000e+00> : vector<64xf32>
    %61 = vector.multi_reduction <add>, %60, %cst_33 [1] : vector<64x64xf32> to vector<64xf32>
    %62 = vector.shape_cast %61 : vector<64xf32> to vector<64x1xf32>
    %63 = tpu.reciprocal %62 {approx = true} : vector<64x1xf32> -> vector<64x1xf32>
    %64 = vector.broadcast %63 : vector<64x1xf32> to vector<64x64xf32>
    %65 = arith.mulf %60, %64 : vector<64x64xf32>
    %66 = arith.truncf %65 : vector<64x64xf32> to vector<64x64xbf16>
    %cst_34 = arith.constant dense<0.000000e+00> : vector<64x32xf32>
    %67 = tpu.matmul %66, %54, %cst_34 {dimension_numbers = #tpu.dot_dimension_numbers<[1], [0], [0], [1], [0, 0, 1, 1], [], []>} : vector<64x64xbf16>, vector<64x32xbf16>, vector<64x32xf32> -> vector<64x32xf32>
    %68 = arith.truncf %67 : vector<64x32xf32> to vector<64x32xbf16>
    %c32_35 = arith.constant 32 : index
    %c0_36 = arith.constant 0 : index
    %69 = vector.load %arg5[%c32_35, %c0_36] : memref<128x128xbf16, #tpu.memory_space<vmem>>, vector<32x128xbf16>
    %cst_37 = arith.constant dense<0.000000e+00> : vector<64x128xf32>
    %70 = tpu.matmul %68, %69, %cst_37 {dimension_numbers = #tpu.dot_dimension_numbers<[1], [0], [0], [1], [0, 0, 1, 1], [], []>} : vector<64x32xbf16>, vector<32x128xbf16>, vector<64x128xf32> -> vector<64x128xf32>
    %71 = arith.addf %51, %70 : vector<64x128xf32>
    %c0_38 = arith.constant 0 : index
    %c64 = arith.constant 64 : index
    %72 = vector.load %arg8[%c0_38, %c64] : memref<128x384xbf16, #tpu.memory_space<vmem>>, vector<64x32xbf16>
    %c0_39 = arith.constant 0 : index
    %c192 = arith.constant 192 : index
    %73 = vector.load %arg8[%c0_39, %c192] : memref<128x384xbf16, #tpu.memory_space<vmem>>, vector<64x32xbf16>
    %c0_40 = arith.constant 0 : index
    %c320 = arith.constant 320 : index
    %74 = vector.load %arg8[%c0_40, %c320] : memref<128x384xbf16, #tpu.memory_space<vmem>>, vector<64x32xbf16>
    %cst_41 = arith.constant dense<0.000000e+00> : vector<64x64xf32>
    %75 = tpu.matmul %72, %73, %cst_41 {dimension_numbers = #tpu.dot_dimension_numbers<[1], [1], [0], [0], [0, 0, 1, 0], [], []>} : vector<64x32xbf16>, vector<64x32xbf16>, vector<64x64xf32> -> vector<64x64xf32>
    %cst_42 = arith.constant dense<0xFF800000> : vector<64xf32>
    %76 = vector.multi_reduction <maximumf>, %75, %cst_42 [1] : vector<64x64xf32> to vector<64xf32>
    %77 = vector.shape_cast %76 : vector<64xf32> to vector<64x1xf32>
    %78 = vector.broadcast %77 : vector<64x1xf32> to vector<64x64xf32>
    %79 = arith.subf %75, %78 : vector<64x64xf32>
    %80 = math.exp %79 : vector<64x64xf32>
    %cst_43 = arith.constant dense<0.000000e+00> : vector<64xf32>
    %81 = vector.multi_reduction <add>, %80, %cst_43 [1] : vector<64x64xf32> to vector<64xf32>
    %82 = vector.shape_cast %81 : vector<64xf32> to vector<64x1xf32>
    %83 = tpu.reciprocal %82 {approx = true} : vector<64x1xf32> -> vector<64x1xf32>
    %84 = vector.broadcast %83 : vector<64x1xf32> to vector<64x64xf32>
    %85 = arith.mulf %80, %84 : vector<64x64xf32>
    %86 = arith.truncf %85 : vector<64x64xf32> to vector<64x64xbf16>
    %cst_44 = arith.constant dense<0.000000e+00> : vector<64x32xf32>
    %87 = tpu.matmul %86, %74, %cst_44 {dimension_numbers = #tpu.dot_dimension_numbers<[1], [0], [0], [1], [0, 0, 1, 1], [], []>} : vector<64x64xbf16>, vector<64x32xbf16>, vector<64x32xf32> -> vector<64x32xf32>
    %88 = arith.truncf %87 : vector<64x32xf32> to vector<64x32xbf16>
    %c64_45 = arith.constant 64 : index
    %c0_46 = arith.constant 0 : index
    %89 = vector.load %arg5[%c64_45, %c0_46] : memref<128x128xbf16, #tpu.memory_space<vmem>>, vector<32x128xbf16>
    %cst_47 = arith.constant dense<0.000000e+00> : vector<64x128xf32>
    %90 = tpu.matmul %88, %89, %cst_47 {dimension_numbers = #tpu.dot_dimension_numbers<[1], [0], [0], [1], [0, 0, 1, 1], [], []>} : vector<64x32xbf16>, vector<32x128xbf16>, vector<64x128xf32> -> vector<64x128xf32>
    %91 = arith.addf %71, %90 : vector<64x128xf32>
    %c0_48 = arith.constant 0 : index
    %c96 = arith.constant 96 : index
    %92 = vector.load %arg8[%c0_48, %c96] : memref<128x384xbf16, #tpu.memory_space<vmem>>, vector<64x32xbf16>
    %c0_49 = arith.constant 0 : index
    %c224 = arith.constant 224 : index
    %93 = vector.load %arg8[%c0_49, %c224] : memref<128x384xbf16, #tpu.memory_space<vmem>>, vector<64x32xbf16>
    %c0_50 = arith.constant 0 : index
    %c352 = arith.constant 352 : index
    %94 = vector.load %arg8[%c0_50, %c352] : memref<128x384xbf16, #tpu.memory_space<vmem>>, vector<64x32xbf16>
    %cst_51 = arith.constant dense<0.000000e+00> : vector<64x64xf32>
    %95 = tpu.matmul %92, %93, %cst_51 {dimension_numbers = #tpu.dot_dimension_numbers<[1], [1], [0], [0], [0, 0, 1, 0], [], []>} : vector<64x32xbf16>, vector<64x32xbf16>, vector<64x64xf32> -> vector<64x64xf32>
    %cst_52 = arith.constant dense<0xFF800000> : vector<64xf32>
    %96 = vector.multi_reduction <maximumf>, %95, %cst_52 [1] : vector<64x64xf32> to vector<64xf32>
    %97 = vector.shape_cast %96 : vector<64xf32> to vector<64x1xf32>
    %98 = vector.broadcast %97 : vector<64x1xf32> to vector<64x64xf32>
    %99 = arith.subf %95, %98 : vector<64x64xf32>
    %100 = math.exp %99 : vector<64x64xf32>
    %cst_53 = arith.constant dense<0.000000e+00> : vector<64xf32>
    %101 = vector.multi_reduction <add>, %100, %cst_53 [1] : vector<64x64xf32> to vector<64xf32>
    %102 = vector.shape_cast %101 : vector<64xf32> to vector<64x1xf32>
    %103 = tpu.reciprocal %102 {approx = true} : vector<64x1xf32> -> vector<64x1xf32>
    %104 = vector.broadcast %103 : vector<64x1xf32> to vector<64x64xf32>
    %105 = arith.mulf %100, %104 : vector<64x64xf32>
    %106 = arith.truncf %105 : vector<64x64xf32> to vector<64x64xbf16>
    %cst_54 = arith.constant dense<0.000000e+00> : vector<64x32xf32>
    %107 = tpu.matmul %106, %94, %cst_54 {dimension_numbers = #tpu.dot_dimension_numbers<[1], [0], [0], [1], [0, 0, 1, 1], [], []>} : vector<64x64xbf16>, vector<64x32xbf16>, vector<64x32xf32> -> vector<64x32xf32>
    %108 = arith.truncf %107 : vector<64x32xf32> to vector<64x32xbf16>
    %c96_55 = arith.constant 96 : index
    %c0_56 = arith.constant 0 : index
    %109 = vector.load %arg5[%c96_55, %c0_56] : memref<128x128xbf16, #tpu.memory_space<vmem>>, vector<32x128xbf16>
    %cst_57 = arith.constant dense<0.000000e+00> : vector<64x128xf32>
    %110 = tpu.matmul %108, %109, %cst_57 {dimension_numbers = #tpu.dot_dimension_numbers<[1], [0], [0], [1], [0, 0, 1, 1], [], []>} : vector<64x32xbf16>, vector<32x128xbf16>, vector<64x128xf32> -> vector<64x128xf32>
    %111 = arith.addf %91, %110 : vector<64x128xf32>
    %112 = vector.broadcast %30 : vector<1x128xf32> to vector<64x128xf32>
    %113 = arith.addf %111, %112 : vector<64x128xf32>
    %c0_58 = arith.constant 0 : index
    %c0_59 = arith.constant 0 : index
    %114 = vector.load %arg7[%c0_58, %c0_59] : memref<128x128xf32, #tpu.memory_space<vmem>>, vector<64x128xf32>
    tpu.vector_store %arg7[%c0_58, %c0_59], %113 {strides = array<i32>} : memref<128x128xf32, #tpu.memory_space<vmem>>, vector<64x128xf32>,
    %cst_60 = arith.constant 0.000000e+00 : f32
    %115 = vector.broadcast %cst_60 : f32 to vector<64x128xf32>
    %c64_61 = arith.constant 64 : index
    %c0_62 = arith.constant 0 : index
    %116 = vector.load %arg8[%c64_61, %c0_62] : memref<128x384xbf16, #tpu.memory_space<vmem>>, vector<64x32xbf16>
    %c64_63 = arith.constant 64 : index
    %c128_64 = arith.constant 128 : index
    %117 = vector.load %arg8[%c64_63, %c128_64] : memref<128x384xbf16, #tpu.memory_space<vmem>>, vector<64x32xbf16>
    %c64_65 = arith.constant 64 : index
    %c256_66 = arith.constant 256 : index
    %118 = vector.load %arg8[%c64_65, %c256_66] : memref<128x384xbf16, #tpu.memory_space<vmem>>, vector<64x32xbf16>
    %cst_67 = arith.constant dense<0.000000e+00> : vector<64x64xf32>
    %119 = tpu.matmul %116, %117, %cst_67 {dimension_numbers = #tpu.dot_dimension_numbers<[1], [1], [0], [0], [0, 0, 1, 0], [], []>} : vector<64x32xbf16>, vector<64x32xbf16>, vector<64x64xf32> -> vector<64x64xf32>
    %cst_68 = arith.constant dense<0xFF800000> : vector<64xf32>
    %120 = vector.multi_reduction <maximumf>, %119, %cst_68 [1] : vector<64x64xf32> to vector<64xf32>
    %121 = vector.shape_cast %120 : vector<64xf32> to vector<64x1xf32>
    %122 = vector.broadcast %121 : vector<64x1xf32> to vector<64x64xf32>
    %123 = arith.subf %119, %122 : vector<64x64xf32>
    %124 = math.exp %123 : vector<64x64xf32>
    %cst_69 = arith.constant dense<0.000000e+00> : vector<64xf32>
    %125 = vector.multi_reduction <add>, %124, %cst_69 [1] : vector<64x64xf32> to vector<64xf32>
    %126 = vector.shape_cast %125 : vector<64xf32> to vector<64x1xf32>
    %127 = tpu.reciprocal %126 {approx = true} : vector<64x1xf32> -> vector<64x1xf32>
    %128 = vector.broadcast %127 : vector<64x1xf32> to vector<64x64xf32>
    %129 = arith.mulf %124, %128 : vector<64x64xf32>
    %130 = arith.truncf %129 : vector<64x64xf32> to vector<64x64xbf16>
    %cst_70 = arith.constant dense<0.000000e+00> : vector<64x32xf32>
    %131 = tpu.matmul %130, %118, %cst_70 {dimension_numbers = #tpu.dot_dimension_numbers<[1], [0], [0], [1], [0, 0, 1, 1], [], []>} : vector<64x64xbf16>, vector<64x32xbf16>, vector<64x32xf32> -> vector<64x32xf32>
    %132 = arith.truncf %131 : vector<64x32xf32> to vector<64x32xbf16>
    %c0_71 = arith.constant 0 : index
    %c0_72 = arith.constant 0 : index
    %133 = vector.load %arg5[%c0_71, %c0_72] : memref<128x128xbf16, #tpu.memory_space<vmem>>, vector<32x128xbf16>
    %cst_73 = arith.constant dense<0.000000e+00> : vector<64x128xf32>
    %134 = tpu.matmul %132, %133, %cst_73 {dimension_numbers = #tpu.dot_dimension_numbers<[1], [0], [0], [1], [0, 0, 1, 1], [], []>} : vector<64x32xbf16>, vector<32x128xbf16>, vector<64x128xf32> -> vector<64x128xf32>
    %135 = arith.addf %115, %134 : vector<64x128xf32>
    %c64_74 = arith.constant 64 : index
    %c32_75 = arith.constant 32 : index
    %136 = vector.load %arg8[%c64_74, %c32_75] : memref<128x384xbf16, #tpu.memory_space<vmem>>, vector<64x32xbf16>
    %c64_76 = arith.constant 64 : index
    %c160_77 = arith.constant 160 : index
    %137 = vector.load %arg8[%c64_76, %c160_77] : memref<128x384xbf16, #tpu.memory_space<vmem>>, vector<64x32xbf16>
    %c64_78 = arith.constant 64 : index
    %c288_79 = arith.constant 288 : index
    %138 = vector.load %arg8[%c64_78, %c288_79] : memref<128x384xbf16, #tpu.memory_space<vmem>>, vector<64x32xbf16>
    %cst_80 = arith.constant dense<0.000000e+00> : vector<64x64xf32>
    %139 = tpu.matmul %136, %137, %cst_80 {dimension_numbers = #tpu.dot_dimension_numbers<[1], [1], [0], [0], [0, 0, 1, 0], [], []>} : vector<64x32xbf16>, vector<64x32xbf16>, vector<64x64xf32> -> vector<64x64xf32>
    %cst_81 = arith.constant dense<0xFF800000> : vector<64xf32>
    %140 = vector.multi_reduction <maximumf>, %139, %cst_81 [1] : vector<64x64xf32> to vector<64xf32>
    %141 = vector.shape_cast %140 : vector<64xf32> to vector<64x1xf32>
    %142 = vector.broadcast %141 : vector<64x1xf32> to vector<64x64xf32>
    %143 = arith.subf %139, %142 : vector<64x64xf32>
    %144 = math.exp %143 : vector<64x64xf32>
    %cst_82 = arith.constant dense<0.000000e+00> : vector<64xf32>
    %145 = vector.multi_reduction <add>, %144, %cst_82 [1] : vector<64x64xf32> to vector<64xf32>
    %146 = vector.shape_cast %145 : vector<64xf32> to vector<64x1xf32>
    %147 = tpu.reciprocal %146 {approx = true} : vector<64x1xf32> -> vector<64x1xf32>
    %148 = vector.broadcast %147 : vector<64x1xf32> to vector<64x64xf32>
    %149 = arith.mulf %144, %148 : vector<64x64xf32>
    %150 = arith.truncf %149 : vector<64x64xf32> to vector<64x64xbf16>
    %cst_83 = arith.constant dense<0.000000e+00> : vector<64x32xf32>
    %151 = tpu.matmul %150, %138, %cst_83 {dimension_numbers = #tpu.dot_dimension_numbers<[1], [0], [0], [1], [0, 0, 1, 1], [], []>} : vector<64x64xbf16>, vector<64x32xbf16>, vector<64x32xf32> -> vector<64x32xf32>
    %152 = arith.truncf %151 : vector<64x32xf32> to vector<64x32xbf16>
    %c32_84 = arith.constant 32 : index
    %c0_85 = arith.constant 0 : index
    %153 = vector.load %arg5[%c32_84, %c0_85] : memref<128x128xbf16, #tpu.memory_space<vmem>>, vector<32x128xbf16>
    %cst_86 = arith.constant dense<0.000000e+00> : vector<64x128xf32>
    %154 = tpu.matmul %152, %153, %cst_86 {dimension_numbers = #tpu.dot_dimension_numbers<[1], [0], [0], [1], [0, 0, 1, 1], [], []>} : vector<64x32xbf16>, vector<32x128xbf16>, vector<64x128xf32> -> vector<64x128xf32>
    %155 = arith.addf %135, %154 : vector<64x128xf32>
    %c64_87 = arith.constant 64 : index
    %c64_88 = arith.constant 64 : index
    %156 = vector.load %arg8[%c64_87, %c64_88] : memref<128x384xbf16, #tpu.memory_space<vmem>>, vector<64x32xbf16>
    %c64_89 = arith.constant 64 : index
    %c192_90 = arith.constant 192 : index
    %157 = vector.load %arg8[%c64_89, %c192_90] : memref<128x384xbf16, #tpu.memory_space<vmem>>, vector<64x32xbf16>
    %c64_91 = arith.constant 64 : index
    %c320_92 = arith.constant 320 : index
    %158 = vector.load %arg8[%c64_91, %c320_92] : memref<128x384xbf16, #tpu.memory_space<vmem>>, vector<64x32xbf16>
    %cst_93 = arith.constant dense<0.000000e+00> : vector<64x64xf32>
    %159 = tpu.matmul %156, %157, %cst_93 {dimension_numbers = #tpu.dot_dimension_numbers<[1], [1], [0], [0], [0, 0, 1, 0], [], []>} : vector<64x32xbf16>, vector<64x32xbf16>, vector<64x64xf32> -> vector<64x64xf32>
    %cst_94 = arith.constant dense<0xFF800000> : vector<64xf32>
    %160 = vector.multi_reduction <maximumf>, %159, %cst_94 [1] : vector<64x64xf32> to vector<64xf32>
    %161 = vector.shape_cast %160 : vector<64xf32> to vector<64x1xf32>
    %162 = vector.broadcast %161 : vector<64x1xf32> to vector<64x64xf32>
    %163 = arith.subf %159, %162 : vector<64x64xf32>
    %164 = math.exp %163 : vector<64x64xf32>
    %cst_95 = arith.constant dense<0.000000e+00> : vector<64xf32>
    %165 = vector.multi_reduction <add>, %164, %cst_95 [1] : vector<64x64xf32> to vector<64xf32>
    %166 = vector.shape_cast %165 : vector<64xf32> to vector<64x1xf32>
    %167 = tpu.reciprocal %166 {approx = true} : vector<64x1xf32> -> vector<64x1xf32>
    %168 = vector.broadcast %167 : vector<64x1xf32> to vector<64x64xf32>
    %169 = arith.mulf %164, %168 : vector<64x64xf32>
    %170 = arith.truncf %169 : vector<64x64xf32> to vector<64x64xbf16>
    %cst_96 = arith.constant dense<0.000000e+00> : vector<64x32xf32>
    %171 = tpu.matmul %170, %158, %cst_96 {dimension_numbers = #tpu.dot_dimension_numbers<[1], [0], [0], [1], [0, 0, 1, 1], [], []>} : vector<64x64xbf16>, vector<64x32xbf16>, vector<64x32xf32> -> vector<64x32xf32>
    %172 = arith.truncf %171 : vector<64x32xf32> to vector<64x32xbf16>
    %c64_97 = arith.constant 64 : index
    %c0_98 = arith.constant 0 : index
    %173 = vector.load %arg5[%c64_97, %c0_98] : memref<128x128xbf16, #tpu.memory_space<vmem>>, vector<32x128xbf16>
    %cst_99 = arith.constant dense<0.000000e+00> : vector<64x128xf32>
    %174 = tpu.matmul %172, %173, %cst_99 {dimension_numbers = #tpu.dot_dimension_numbers<[1], [0], [0], [1], [0, 0, 1, 1], [], []>} : vector<64x32xbf16>, vector<32x128xbf16>, vector<64x128xf32> -> vector<64x128xf32>
    %175 = arith.addf %155, %174 : vector<64x128xf32>
    %c64_100 = arith.constant 64 : index
    %c96_101 = arith.constant 96 : index
    %176 = vector.load %arg8[%c64_100, %c96_101] : memref<128x384xbf16, #tpu.memory_space<vmem>>, vector<64x32xbf16>
    %c64_102 = arith.constant 64 : index
    %c224_103 = arith.constant 224 : index
    %177 = vector.load %arg8[%c64_102, %c224_103] : memref<128x384xbf16, #tpu.memory_space<vmem>>, vector<64x32xbf16>
    %c64_104 = arith.constant 64 : index
    %c352_105 = arith.constant 352 : index
    %178 = vector.load %arg8[%c64_104, %c352_105] : memref<128x384xbf16, #tpu.memory_space<vmem>>, vector<64x32xbf16>
    %cst_106 = arith.constant dense<0.000000e+00> : vector<64x64xf32>
    %179 = tpu.matmul %176, %177, %cst_106 {dimension_numbers = #tpu.dot_dimension_numbers<[1], [1], [0], [0], [0, 0, 1, 0], [], []>} : vector<64x32xbf16>, vector<64x32xbf16>, vector<64x64xf32> -> vector<64x64xf32>
    %cst_107 = arith.constant dense<0xFF800000> : vector<64xf32>
    %180 = vector.multi_reduction <maximumf>, %179, %cst_107 [1] : vector<64x64xf32> to vector<64xf32>
    %181 = vector.shape_cast %180 : vector<64xf32> to vector<64x1xf32>
    %182 = vector.broadcast %181 : vector<64x1xf32> to vector<64x64xf32>
    %183 = arith.subf %179, %182 : vector<64x64xf32>
    %184 = math.exp %183 : vector<64x64xf32>
    %cst_108 = arith.constant dense<0.000000e+00> : vector<64xf32>
    %185 = vector.multi_reduction <add>, %184, %cst_108 [1] : vector<64x64xf32> to vector<64xf32>
    %186 = vector.shape_cast %185 : vector<64xf32> to vector<64x1xf32>
    %187 = tpu.reciprocal %186 {approx = true} : vector<64x1xf32> -> vector<64x1xf32>
    %188 = vector.broadcast %187 : vector<64x1xf32> to vector<64x64xf32>
    %189 = arith.mulf %184, %188 : vector<64x64xf32>
    %190 = arith.truncf %189 : vector<64x64xf32> to vector<64x64xbf16>
    %cst_109 = arith.constant dense<0.000000e+00> : vector<64x32xf32>
    %191 = tpu.matmul %190, %178, %cst_109 {dimension_numbers = #tpu.dot_dimension_numbers<[1], [0], [0], [1], [0, 0, 1, 1], [], []>} : vector<64x64xbf16>, vector<64x32xbf16>, vector<64x32xf32> -> vector<64x32xf32>
    %192 = arith.truncf %191 : vector<64x32xf32> to vector<64x32xbf16>
    %c96_110 = arith.constant 96 : index
    %c0_111 = arith.constant 0 : index
    %193 = vector.load %arg5[%c96_110, %c0_111] : memref<128x128xbf16, #tpu.memory_space<vmem>>, vector<32x128xbf16>
    %cst_112 = arith.constant dense<0.000000e+00> : vector<64x128xf32>
    %194 = tpu.matmul %192, %193, %cst_112 {dimension_numbers = #tpu.dot_dimension_numbers<[1], [0], [0], [1], [0, 0, 1, 1], [], []>} : vector<64x32xbf16>, vector<32x128xbf16>, vector<64x128xf32> -> vector<64x128xf32>
    %195 = arith.addf %175, %194 : vector<64x128xf32>
    %196 = vector.broadcast %30 : vector<1x128xf32> to vector<64x128xf32>
    %197 = arith.addf %195, %196 : vector<64x128xf32>
    %c64_113 = arith.constant 64 : index
    %c0_114 = arith.constant 0 : index
    %198 = vector.load %arg7[%c64_113, %c0_114] : memref<128x128xf32, #tpu.memory_space<vmem>>, vector<64x128xf32>
    tpu.vector_store %arg7[%c64_113, %c0_114], %197 {strides = array<i32>} : memref<128x128xf32, #tpu.memory_space<vmem>>, vector<64x128xf32>,
    return
  }
  func.func @transform_0(%arg0: i32) -> (i32, i32) {
    %c0_i32 = arith.constant 0 : i32
    %c0_i32_0 = arith.constant 0 : i32
    return %arg0, %c0_i32 : i32, i32
  }
  func.func @transform_1(%arg0: i32) -> (i32, i32) {
    %c0_i32 = arith.constant 0 : i32
    %c0_i32_0 = arith.constant 0 : i32
    %c0_i32_1 = arith.constant 0 : i32
    return %c0_i32, %c0_i32_0 : i32, i32
  }
  func.func @transform_2(%arg0: i32) -> (i32, i32) {
    %c0_i32 = arith.constant 0 : i32
    %c0_i32_0 = arith.constant 0 : i32
    %c0_i32_1 = arith.constant 0 : i32
    return %c0_i32, %c0_i32_0 : i32, i32
  }
  func.func @transform_3(%arg0: i32) -> (i32, i32) {
    %c0_i32 = arith.constant 0 : i32
    %c0_i32_0 = arith.constant 0 : i32
    %c0_i32_1 = arith.constant 0 : i32
    return %c0_i32, %c0_i32_0 : i32, i32
  }
  func.func @transform_4(%arg0: i32) -> (i32, i32) {
    %c0_i32 = arith.constant 0 : i32
    %c0_i32_0 = arith.constant 0 : i32
    %c0_i32_1 = arith.constant 0 : i32
    return %c0_i32, %c0_i32_0 : i32, i32
  }
  func.func @transform_5(%arg0: i32) -> (i32, i32) {
    %c0_i32 = arith.constant 0 : i32
    %c0_i32_0 = arith.constant 0 : i32
    %c0_i32_1 = arith.constant 0 : i32
    return %c0_i32, %c0_i32_0 : i32, i32
  }
  func.func @transform_6(%arg0: i32) -> (i32, i32) {
    %c0_i32 = arith.constant 0 : i32
    %c0_i32_0 = arith.constant 0 : i32
    return %arg0, %c0_i32 : i32, i32
  }
}

</mosaic_0001>

<bundles_post_ra>
// kernel: tpu_custom_call.1
= control target key start
LH: loop header
LB: loop body
LE: loop exit
PB: predicated region body
PF: predicated region fallthrough
CT: control target
= control target key end

     0   :  { %11 = vsyncpa [#allocation4], 0  ;;  %s7173_s0 = inlined_call_operand.hbm [shape: f32[256,128], index: 0, kind: input, shape index: {}]   ;;  %s7174_s1 = inlined_call_operand.vmem [shape: f32[1,128], index: 1, kind: input, shape index: {}]   ;;  %s7175_s2 = inlined_call_operand.vmem [shape: f32[1,128], index: 2, kind: input, shape index: {}]   ;;  %s7176_s3 = inlined_call_operand.hbm [shape: bf16[128,384], index: 3, kind: input, shape index: {}]   ;;  %s7177_s4 = inlined_call_operand.hbm [shape: bf16[128,128], index: 4, kind: input, shape index: {}]   ;;  %s7178_s5 = inlined_call_operand.vmem [shape: f32[1,128], index: 5, kind: input, shape index: {}]   ;;  %s7179_s6 = inlined_call_operand.hbm [shape: f32[256,128], index: 6, kind: output, shape index: {}]  }
   0x1   :  { %13 = vsyncpa [#allocation4 + $0x1], 0 }
   0x2   :  { %14 = vsyncpa [#allocation7], 0 }
   0x3   :  { %15 = vsyncpa [#allocation5], 0 }
   0x4   :  { %17 = vsyncpa [#allocation5 + $0x1], 0  ;;  %s5673_s21 = smov 0   ;;  %s5675_s22 = smov 0  }
   0x5   :  { %s5677_s23 = smov 0   ;;  %s5679_s24 = smov 0  }
   0x6 LB: > { %s5694_s25 = sadd.s32 4294967295, %s5620_s24   ;;  %s4234_s26 = sadd.s32 4294967294, %s5620_s24   ;;  %s5620_s24 = sphi %s5679_s24, %s7201_s24   ;;  %s5616_s23 = sphi %s5677_s23, %s7200_s23   ;;  %s5612_s22 = sphi %s5675_s22, %s7199_s22   ;;  %s5608_s21 = sphi %s5673_s21, %s7198_s21  }
   0x7   : > { %p43_p0 = scmp.ne.s32.totalorder %s5612_s22, %s5608_s21  ;;  %p7180_p1 = scmp.eq.s32.totalorder %s5694_s25, 0 }
   0x8   : > { %p178_p3 = scmp.eq.s32.totalorder %s4234_s26, 1  ;;  %p4235_p5 = scmp.ge.s32.totalorder %s5620_s24, 1 }
   0x9   : > { %p5703_p4 = por %p7180_p1, %p43_p0  ;;  %p185_p7 = scmp.lt.s32.totalorder %s5620_s24, 3 }
   0xa   : > { %p5708_p6 = por %p178_p3, %p43_p0  ;;  %s5622_s30 = smov [#allocation6]  }
   0xb   : > { %s7183_s27 = scalar_select %p5703_p4, 1, 0 }
   0xc   : > { %s7184_s28 = scalar_select %p5708_p6, 1, 0 }
   0xd   : > { %p5713_p8 = pnand %p4235_p5, %p185_p7  ;;  %s203_s7 = sshll.u32 %s5622_s30, 4  ;;  %s5717_s7 = int_to_ptr.vmem [resolvable:$true] %s203_s7 }
   0xe   : > { %s5623_s9 = smov [#allocation8]   ;;  %s5464_s13 = scalar_lea.hbm %s7176_s3, 3072 }
   0xf   : > { %p5061_p9 = pneg %p5713_p8  ;;  %s216_s10 = sshll.u32 %s5623_s9, 4  ;;  %s5728_s10 = int_to_ptr.vmem [resolvable:$true] %s216_s10 }
  0x10   : > { %p5465_p12 = scmp.ne.s32.totalorder %s7176_s3, %s5464_s13  ;;  %p5471_p5 = scmp.lt.u32.totalorder %s5464_s13, %s7176_s3 }
  0x11   : > { %p5724_p11 = pnand %p5061_p9, %p7180_p1 }
  0x13   : > { %p5466_p13 = pneg %p5724_p11 }
  0x15   : > { %p5467_p0 = pnand %p5466_p13, %p5465_p12 }
  0x17   : > { %p5468_p3 = pneg %p5467_p0 }
  0x19   : > { %p5473_p7 = pnand %p5471_p5, %p5468_p3 }
  0x1b   : > { %5476 = shalt.err (!%p5473_p7)
}
  0x1c   : > { %s5477_s18 = scalar_lea.vmem %s5717_s7, 3072  ;;  %p5485_p2 = scmp.lt.s32.totalorder %s5717_s7, %s5717_s7 }
  0x1d   : > { %p5478_p9 = scmp.ne.s32.totalorder %s5717_s7, %s5477_s18  ;;  %p5486_p12 = scmp.lt.s32.totalorder %s5477_s18, %s5477_s18 }
  0x1f   : > { %p5480_p10 = pnand %p5478_p9, %p5466_p13  ;;  %p5487_p0 = por %p5486_p12, %p5485_p2 }
  0x21   : > { %p5481_p1 = pneg %p5480_p10 }
  0x23   : > { %p5488_p6 = pnand %p5487_p0, %p5481_p1 }
  0x25   : > { %5491 = shalt.err (!%p5488_p6)
}
  0x26   : > { %s5624_s19 = smov 192   ;;  %s5625_s20 = smov 12  }
  0x27   : > { %5064 = dma.hbm_to_vmem [thread:$0]  (!%p5724_p11), %s7176_s3, 3072, %s5717_s7, [#allocation7], %s5624_s19, %s5624_s19, %s5625_s20  }
  0x28   : > { %s5492_s12 = scalar_lea.hbm %s7177_s4, 1024 }
  0x29   : > { %p5493_p2 = scmp.ne.s32.totalorder %s7177_s4, %s5492_s12  ;;  %p5499_p10 = scmp.lt.u32.totalorder %s5492_s12, %s7177_s4 }
  0x2b   : > { %p5495_p1 = pnand %p5493_p2, %p5466_p13 }
  0x2d   : > { %p5496_p6 = pneg %p5495_p1 }
  0x2f   : > { %p5501_p3 = pnand %p5499_p10, %p5496_p6 }
  0x31   : > { %5504 = shalt.err (!%p5501_p3)
}
  0x32   : > { %s5505_s7 = scalar_lea.vmem %s5728_s10, 1024  ;;  %p5513_p12 = scmp.lt.s32.totalorder %s5728_s10, %s5728_s10 }
  0x33   : > { %p5506_p5 = scmp.ne.s32.totalorder %s5728_s10, %s5505_s7  ;;  %p5514_p0 = scmp.lt.s32.totalorder %s5505_s7, %s5505_s7 }
  0x35   : > { %p5508_p7 = pnand %p5506_p5, %p5466_p13  ;;  %p5515_p2 = por %p5514_p0, %p5513_p12 }
  0x37   : > { %p5509_p9 = pneg %p5508_p7 }
  0x39   : > { %p5516_p1 = pnand %p5515_p2, %p5509_p9 }
  0x3b   : > { %5519 = shalt.err (!%p5516_p1)
}
  0x3c   : > { %s5626_s17 = smov 64   ;;  %s5627_s18 = smov 4  }
  0x3d   : > { %5067 = dma.hbm_to_vmem [thread:$0]  (!%p5724_p11), %s7177_s4, 1024, %s5728_s10, [#allocation7], %s5626_s17, %s5626_s17, %s5627_s18  }
  0x3e   : > { %s5783_s26 = sadd.s32 1, %s5620_s24   ;;  %s30_s9 = sadd.s32 1, %s5616_s23 }
  0x3f   : > { %s27_s30 = ssub.s32 %s5620_s24, %s5783_s26  ;;  %p37_p6 = scmp.ne.s32.totalorder %s5616_s23, %s5612_s22 }
  0x40   : > { %p28_p13 = scmp.eq.s32.totalorder %s27_s30, 0  ;;  %p38_p10 = scmp.eq.s32.totalorder %s5620_s24, 0 }
  0x41   : > { %p7187_p5 = scmp.eq.s32.totalorder %s5694_s25, 1  ;;  %p5078_p9 = scmp.lt.s32.totalorder %s5620_s24, 2 }
  0x42   : > { %s5792_s11 = scalar_select %p28_p13, %s5616_s23, %s30_s9  }
  0x43   : > { %p39_p3 = por %p38_p10, %p37_p6  ;;  %p5796_p7 = por %p7187_p5, %p37_p6 }
  0x44   : > { %s233_s8 = sand.u32 1, %s5616_s23   ;;  %s4391_s10 = sshll.u32 %s5620_s24, 11 }
  0x45   : > { %s7188_s12 = scalar_select %p5796_p7, 1, 0 }
  0x46   : > { %s4239_s13 = sshll.u32 %s233_s8, 7  ;;  %s5806_s16 = scalar_lea.hbm %s7173_s0, %s4391_s10 }
  0x47   : > { %s237_s7 = scalar_lea.vmem [#allocation3], %s4239_s13  ;;  %p5810_p11 = pnand %p5078_p9, %p39_p3 }
  0x48   : > { %s244_s17 = sshll.u32 %s237_s7, 4  ;;  %s5814_s19 = scalar_lea.sflag [#allocation4], %s233_s8  ;;  %s5808_s17 = int_to_ptr.vmem [resolvable:$true] %s244_s17 }
  0x49   : > { %s5520_s20 = scalar_lea.hbm %s5806_s16, 2048  ;;  %p5522_p0 = pneg %p5810_p11 }
  0x4a   : > { %p5521_p12 = scmp.ne.s32.totalorder %s5806_s16, %s5520_s20  ;;  %s5525_s13 = scalar_lea.hbm %s7173_s0, 4096 }
  0x4b   : > { %p5526_p13 = scmp.lt.u32.totalorder %s5806_s16, %s7173_s0  ;;  %p5527_p6 = scmp.lt.u32.totalorder %s5525_s13, %s5520_s20 }
  0x4c   : > { %p5523_p2 = pnand %p5522_p0, %p5521_p12  ;;  %p5529_p3 = scmp.lt.u32.totalorder %s5520_s20, %s5806_s16 }
  0x4d   : > { %p5528_p10 = por %p5527_p6, %p5526_p13 }
  0x4e   : > { %p5524_p1 = pneg %p5523_p2 }
  0x4f   : > { %p5530_p5 = por %p5529_p3, %p5528_p10 }
  0x51   : > { %p5531_p9 = pnand %p5530_p5, %p5524_p1 }
  0x53   : > { %5534 = shalt.err (!%p5531_p9)
}
  0x54   : > { %s5535_s8 = scalar_lea.vmem %s5808_s17, 2048  ;;  %s5628_s15 = smov [#allocation3]  }
  0x55   : > { %p5536_p12 = scmp.ne.s32.totalorder %s5808_s17, %s5535_s8  ;;  %s5540_s7 = sshll.u32 %s5628_s15, 4  ;;  %s5541_s7 = int_to_ptr.vmem [resolvable:$false] %s5540_s7 }
  0x56   : > { %s5542_s30 = scalar_lea.vmem %s5541_s7, 4096  ;;  %p5543_p4 = scmp.lt.s32.totalorder %s5808_s17, %s5541_s7 }
  0x57   : > { %p5538_p2 = pnand %p5536_p12, %p5522_p0  ;;  %p5544_p13 = scmp.lt.s32.totalorder %s5542_s30, %s5535_s8 }
  0x59   : > { %p5539_p7 = pneg %p5538_p2  ;;  %p5545_p6 = por %p5544_p13, %p5543_p4 }
  0x5b   : > { %p5546_p10 = pnand %p5545_p6, %p5539_p7 }
  0x5d   : > { %5549 = shalt.err (!%p5546_p10)
}
  0x5e   : > { %s5629_s20 = smov 128   ;;  %s5630_s9 = smov 8  }
  0x5f   : > { %5071 = dma.hbm_to_vmem [thread:$0]  (!%p5810_p11), %s5806_s16, 2048, %s5808_s17, %s5814_s19, %s5629_s20, %s5629_s20, %s5630_s9  }
  0x60   : > { %256 = sbr.rel (%p5713_p8) target bundleno = 3680 (0xe60), region = 44 }
  0x67   : > { %s5845_s13 = sand.u32 1, %s5612_s22   ;;  %p7190_p4 = scmp.ne.s32.totalorder %s7183_s27, 0 }
  0x68   : > { %s4243_s10 = sshll.u32 %s5845_s13, 7  ;;  %s259_s14 = scalar_lea.sflag [#allocation4], %s5845_s13 }
  0x69   : > { %s5851_s8 = scalar_lea.vmem [#allocation3], %s4243_s10 }
  0x6a   : > { %5595 = dma.done.wait (%p7190_p4), %s259_s14, 2048  }
  0x6b   : > { %5597 = vsyncadd (%p7190_p4), %s259_s14, 4294965248  ;;  %p7191_p7 = scmp.eq.s32.totalorder %s5694_s25, 0 }
  0x6d   : > { %5599 = dma.done.wait (%p7191_p7), [#allocation7], 4096   ;;  %p7192_p8 = pmov %p7191_p7 }
  0x6e   : > { %v5862_v0 = vld [vmem:[%s5851_s8] sm:$0xff]  ;;  %v5865_v1 = vld [vmem:[%s5851_s8 + $0x8] sm:$0xff]  ;;  %v5873_v5 = vld [vmem:[%s5851_s8 + $0x10] sm:$0xff]  ;;  %v5631_v39 = vmov 0   ;;  %vm1012_vm0 = vcmask 261120   ;;  %s5632_s18 = smov 96  }
  0x6f   : > { %5601 = vsyncadd (%p7192_p8), [#allocation7], 4294963200  ;;  %318 = vadd.xlane.f32.xlu0 %v5862_v0  ;;  %v367_v2 = vmul.f32 %v5862_v0, %v5862_v0  ;;  %v368_v3 = vmul.f32 %v5865_v1, %v5865_v1  ;;  %v5128_v4 = vld [vmem:[#allocation6 + $0x4] ss:$12 sps:$4 sm:$0xff]   ;;  %v5877_v6 = vld [vmem:[%s5851_s8 + $0x18] sm:$0xff]  ;;  %v369_v7 = vmul.f32 %v5873_v5, %v5873_v5  ;;  %773 = vmatprep.mubr.bf16.mxu0 %v5631_v39  ;;  %vm1102_vm1 = vcmask 523264  }
  0x70   : > { %741 = vmatprep.subr.bf16.mxu0 %v5128_v4  ;;  %v370_v8 = vmul.f32 %v5877_v6, %v5877_v6  ;;  %v5886_v9 = vld [vmem:[%s5851_s8 + $0x20] sm:$0xff]  ;;  %v5889_v11 = vld [vmem:[%s5851_s8 + $0x28] sm:$0xff]  ;;  %v5898_v16 = vld [vmem:[%s5851_s8 + $0x30] sm:$0xff]  ;;  %s5633_s19 = smov 64   ;;  %s5634_s15 = smov 32  }
  0x71   : > { %383 = vadd.xlane.f32.xlu1 %v367_v2  ;;  %v5130_v10 = vld [vmem:[#allocation6] ss:$12 sps:$4 sm:$0xff]   ;;  %v5131_v12 = vld [vmem:[#allocation6 + $0x1c] ss:$12 sps:$4 sm:$0xff]   ;;  %v371_v13 = vmul.f32 %v5886_v9, %v5886_v9  ;;  %v5133_v14 = vld [vmem:[#allocation6 + $0x18] ss:$12 sps:$4 sm:$0xff]   ;;  %v372_v15 = vmul.f32 %v5889_v11, %v5889_v11  ;;  %v373_v23 = vmul.f32 %v5898_v16, %v5898_v16 }
  0x72   : > { %742 = vmatpush1.bf16.msra.mxu0 %v5130_v10  ;;  %v5134_v17 = vld [vmem:[#allocation6 + $0x34] ss:$12 sps:$4 sm:$0xff]   ;;  %v5137_v19 = vld [vmem:[#allocation6 + $0x30] ss:$12 sps:$4 sm:$0xff]   ;;  %v5138_v21 = vld [vmem:[#allocation6 + $0x4c] ss:$12 sps:$4 sm:$0xff]  }
  0x73   : > { %320 = vadd.xlane.f32.xlu0 %v5865_v1  ;;  %743 = vmatprep.subr.bf16.mxu0 %v5131_v12  ;;  %v5136_v18 = vld [vmem:[#allocation6 + $0x8] ss:$12 sps:$4 sm:$0xff]   ;;  %v5901_v20 = vld [vmem:[%s5851_s8 + $0x38] sm:$0xff]  ;;  %v5140_v22 = vld [vmem:[#allocation6 + $0x20] ss:$12 sps:$4 sm:$0xff]   ;;  %s6967_s20 = scalar_lea.vmem [#allocation9], %s4243_s10 }
  0x74   : > { %4585 = vmatprep.subr.bf16.mxu1 %v5136_v18  ;;  %v5141_v24 = vld [vmem:[#allocation6 + $0x48] ss:$12 sps:$4 sm:$0xff]   ;;  %v374_v25 = vmul.f32 %v5901_v20, %v5901_v20  ;;  %v5142_v26 = vld [vmem:[#allocation6 + $0x64] ss:$12 sps:$4 sm:$0xff]   ;;  %v5145_v28 = vld [vmem:[#allocation6 + $0x60] ss:$12 sps:$4 sm:$0xff]  }
  0x75   : > { %385 = vadd.xlane.f32.xlu1 %v368_v3  ;;  %4586 = vmatpush3.bf16.msra.mxu1 %v5136_v18  ;;  %v5144_v27 = vld [vmem:[#allocation6 + $0x38] ss:$12 sps:$4 sm:$0xff]   ;;  %v5146_v29 = vld [vmem:[#allocation6 + $0x7c] ss:$12 sps:$4 sm:$0xff]   ;;  %v5150_v32 = vld [vmem:[#allocation6 + $0x94] ss:$12 sps:$4 sm:$0xff]  }
  0x76   : > { %744 = vmatpush1.bf16.msra.mxu0 %v5133_v14  ;;  %4587 = vmatprep.subr.bf16.mxu1 %v5140_v22  ;;  %v5148_v30 = vld [vmem:[#allocation6 + $0x50] ss:$12 sps:$4 sm:$0xff]   ;;  %v5149_v31 = vld [vmem:[#allocation6 + $0x78] ss:$12 sps:$4 sm:$0xff]   ;;  %v5152_v33 = vld [vmem:[#allocation6 + $0x68] ss:$12 sps:$4 sm:$0xff]  }
  0x77   : > { %322 = vadd.xlane.f32.xlu0 %v5873_v5  ;;  %745 = vmatprep.subr.bf16.mxu0 %v5134_v17  ;;  %v5153_v34 = vld [vmem:[#allocation6 + $0x90] ss:$12 sps:$4 sm:$0xff]   ;;  %v5154_v35 = vld [vmem:[#allocation6 + $0xac] ss:$12 sps:$4 sm:$0xff]   ;;  %v5157_v37 = vld [vmem:[#allocation6 + $0xa8] ss:$12 sps:$4 sm:$0xff]  }
  0x78   : > { %v5156_v36 = vld [vmem:[#allocation6 + $0x80] ss:$12 sps:$4 sm:$0xff]   ;;  %v5158_v38 = vld [vmem:[#allocation6 + $0x98] ss:$12 sps:$4 sm:$0xff]   ;;  %v5159_v40 = vld [vmem:[#allocation6 + $0xb0] ss:$12 sps:$4 sm:$0xff]  }
  0x79   : > { %324 = vadd.xlane.f32.xlu1 %v5877_v6  ;;  %4588 = vmatpush3.bf16.msra.mxu1 %v5140_v22  ;;  %v5911_v41 = vld [vmem:[%s5851_s8 + $0x40] sm:$0xff]  ;;  %v5914_v42 = vld [vmem:[%s5851_s8 + $0x48] sm:$0xff]  ;;  %v5919_v43 = vld [vmem:[%s5851_s8 + $0x50] sm:$0xff]  ;;  %s4392_s9 = sshll.u32 %s5694_s25, 11  ;;  %s4142_s10 = sshll.u32 %s6967_s20, 4  ;;  %s7125_s10 = int_to_ptr.vmem [resolvable:$true] %s4142_s10 }
  0x7a   : > { %746 = vmatpush1.bf16.msra.mxu0 %v5137_v19  ;;  %4589 = vmatprep.subr.bf16.mxu1 %v5144_v27  ;;  %v5922_v44 = vld [vmem:[%s5851_s8 + $0x58] sm:$0xff]  ;;  %v375_v45 = vmul.f32 %v5911_v41, %v5911_v41  ;;  %v376_v46 = vmul.f32 %v5914_v42, %v5914_v42  ;;  %v377_v47 = vmul.f32 %v5919_v43, %v5919_v43  ;;  %v5935_v49 = vld [vmem:[%s5851_s8 + $0x60] sm:$0xff]  ;;  %v5938_v50 = vld [vmem:[%s5851_s8 + $0x68] sm:$0xff]  ;;  %s7123_s27 = scalar_lea.hbm %s7179_s6, %s4392_s9  ;;  %s4129_s25 = scalar_lea.sflag [#allocation5], %s5845_s13 }
  0x7b   : > { %387 = vadd.xlane.f32.xlu0 %v369_v7  ;;  %747 = vmatprep.subr.bf16.mxu0 %v5138_v21  ;;  %v378_v48 = vmul.f32 %v5922_v44, %v5922_v44  ;;  %v5943_v51 = vld [vmem:[%s5851_s8 + $0x70] sm:$0xff]  ;;  %v5946_v52 = vld [vmem:[%s5851_s8 + $0x78] sm:$0xff]  ;;  %v379_v53 = vmul.f32 %v5935_v49, %v5935_v49  ;;  %v380_v54 = vmul.f32 %v5938_v50, %v5938_v50  ;;  %s5550_s29 = scalar_lea.vmem %s7125_s10, 2048  ;;  %p7195_p0 = scmp.ne.s32.totalorder %s7188_s12, 0 }
  0x7c   : > { %v381_v55 = vmul.f32 %v5943_v51, %v5943_v51  ;;  %v382_v56 = vmul.f32 %v5946_v52, %v5946_v52  ;;  %p5551_p11 = scmp.ne.s32.totalorder %s7125_s10, %s5550_s29  ;;  %s5635_s16 = smov [#allocation9]  }
  0x7d   : > { %389 = vadd.xlane.f32.xlu1 %v370_v8  ;;  %4590 = vmatpush3.bf16.msra.mxu1 %v5144_v27  ;;  %s5554_s17 = sshll.u32 %s5635_s16, 4  ;;  %s5555_s17 = int_to_ptr.vmem [resolvable:$false] %s5554_s17 }
  0x7e   : > { %748 = vmatpush1.bf16.msra.mxu0 %v5141_v24  ;;  %4591 = vmatprep.subr.bf16.mxu1 %v5148_v30  ;;  %p5552_p1 = pnand %p5551_p11, %p7195_p0  ;;  %p5557_p5 = scmp.lt.s32.totalorder %s7125_s10, %s5555_s17 }
  0x7f   : > { %326 = vadd.xlane.f32.xlu0 %v5886_v9  ;;  %749 = vmatprep.subr.bf16.mxu0 %v5142_v26 }
  0x80   : > { %p5553_p3 = pneg %p5552_p1 }
  0x81   : > { %328 = vadd.xlane.f32.xlu1 %v5889_v11  ;;  %4592 = vmatpush3.bf16.msra.mxu1 %v5148_v30 }
  0x82   : > { %750 = vmatpush1.bf16.msra.mxu0 %v5145_v28  ;;  %4593 = vmatprep.subr.bf16.mxu1 %v5152_v33 }
  0x83   : > { %391 = vadd.xlane.f32.xlu0 %v371_v13  ;;  %751 = vmatprep.subr.bf16.mxu0 %v5146_v29 }
  0x85   : > { %393 = vadd.xlane.f32.xlu1 %v372_v15  ;;  %4594 = vmatpush3.bf16.msra.mxu1 %v5152_v33 }
  0x86   : > { %752 = vmatpush1.bf16.msra.mxu0 %v5149_v31  ;;  %4595 = vmatprep.subr.bf16.mxu1 %v5156_v36 }
  0x87   : > { %330 = vadd.xlane.f32.xlu0 %v5898_v16  ;;  %753 = vmatprep.subr.bf16.mxu0 %v5150_v32 }
  0x89   : > { %332 = vadd.xlane.f32.xlu1 %v5901_v20  ;;  %4596 = vmatpush3.bf16.msra.mxu1 %v5156_v36 }
  0x8a   : > { %754 = vmatpush1.bf16.msra.mxu0 %v5153_v34  ;;  %4597 = vmatprep.subr.bf16.mxu1 %v5158_v38 }
  0x8b   : > { %395 = vadd.xlane.f32.xlu0 %v373_v23  ;;  %755 = vmatprep.subr.bf16.mxu0 %v5154_v35 }
  0x8d   : > { %397 = vadd.xlane.f32.xlu1 %v374_v25  ;;  %4598 = vmatpush3.bf16.msra.mxu1 %v5158_v38 }
  0x8e   : > { %756 = vmatpush1.bf16.msra.mxu0 %v5157_v37  ;;  %4599 = vmatprep.subr.bf16.mxu1 %v5159_v40 }
  0x8f   : > { %334 = vadd.xlane.f32.xlu0 %v5911_v41 }
  0x91   : > { %4600 = vmatpush3.bf16.msra.mxu1 %v5159_v40  ;;  %336 = vadd.xlane.f32.xlu1 %v5914_v42  ;;  %v5966_v40 = vld [vmem:[%s7174_s1] ss:$0 sm:$0xff] }
  0x93   : > { %338 = vadd.xlane.f32.xlu0 %v5919_v43 }
  0x95   : > { %340 = vadd.xlane.f32.xlu1 %v5922_v44 }
  0x97   : > { %399 = vadd.xlane.f32.xlu0 %v375_v45 }
  0x99   : > { %401 = vadd.xlane.f32.xlu1 %v376_v46 }
  0x9b   : > { %403 = vadd.xlane.f32.xlu0 %v377_v47 }
  0x9d   : > { %405 = vadd.xlane.f32.xlu1 %v378_v48 }
  0x9f   : > { %342 = vadd.xlane.f32.xlu0 %v5935_v49 }
  0xa1   : > { %344 = vadd.xlane.f32.xlu1 %v5938_v50 }
  0xa3   : > { %346 = vadd.xlane.f32.xlu0 %v5943_v51 }
  0xa5   : > { %348 = vadd.xlane.f32.xlu1 %v5946_v52 }
  0xa7   : > { %407 = vadd.xlane.f32.xlu0 %v379_v53 }
  0xa9   : > { %409 = vadd.xlane.f32.xlu1 %v380_v54 }
  0xab   : > { %411 = vadd.xlane.f32.xlu0 %v381_v55 }
  0xad   : > { %413 = vadd.xlane.f32.xlu1 %v382_v56 }
  0xfc   : > { %v319_v57 = vpop.xlane.xlu0 %318 }
  0xfd   : > { %v351_v58 = vmul.f32 0.0078125, %v319_v57 }
  0xfe   : > { %v384_v59 = vpop.xlane.xlu1 %383 }
  0xff   : > { %v431_v60 = vmul.f32 %v351_v58, %v351_v58  ;;  %v415_v61 = vmul.f32 0.0078125, %v384_v59  ;;  %v463_v30 = vsub.f32 %v5862_v0, %v351_v58 }
 0x100   : > { %v321_v62 = vpop.xlane.xlu0 %320 }
 0x101   : > { %v447_v63 = vsub.f32 %v415_v61, %v431_v60  ;;  %v352_v2 = vmul.f32 0.0078125, %v321_v62  ;;  %v5973_v60 = vld [vmem:[%s7175_s2] ss:$0 sm:$0xff] }
 0x102   : > { %v386_v3 = vpop.xlane.xlu1 %385 }
 0x103   : > { %v479_v4 = vadd.f32 1e-05, %v447_v63  ;;  %v432_v7 = vmul.f32 %v352_v2, %v352_v2  ;;  %v416_v8 = vmul.f32 0.0078125, %v386_v3  ;;  %v464_v45 = vsub.f32 %v5865_v1, %v352_v2 }
 0x104   : > { %v323_v10 = vpop.xlane.xlu0 %322 }
 0x105   : > { %5176 = vrsqrt.f32 %v479_v4  ;;  %v448_v12 = vsub.f32 %v416_v8, %v432_v7  ;;  %v353_v13 = vmul.f32 0.0078125, %v323_v10 }
 0x106   : > { %v325_v14 = vpop.xlane.xlu1 %324 }
 0x107   : > { %v480_v15 = vadd.f32 1e-05, %v448_v12  ;;  %v433_v17 = vmul.f32 %v353_v13, %v353_v13  ;;  %v354_v18 = vmul.f32 0.0078125, %v325_v14  ;;  %v465_v2 = vsub.f32 %v5873_v5, %v353_v13 }
 0x108   : > { %v388_v19 = vpop.xlane.xlu0 %387 }
 0x109   : > { %5178 = vrsqrt.f32 %v480_v15  ;;  %v417_v21 = vmul.f32 0.0078125, %v388_v19  ;;  %v434_v23 = vmul.f32 %v354_v18, %v354_v18  ;;  %v466_v14 = vsub.f32 %v5877_v6, %v354_v18 }
 0x10a   : > { %v390_v22 = vpop.xlane.xlu1 %389 }
 0x10b   : > { %v449_v24 = vsub.f32 %v417_v21, %v433_v17  ;;  %v418_v25 = vmul.f32 0.0078125, %v390_v22 }
 0x10c   : > { %v327_v26 = vpop.xlane.xlu0 %326 }
 0x10d   : > { %v481_v27 = vadd.f32 1e-05, %v449_v24  ;;  %v450_v28 = vsub.f32 %v418_v25, %v434_v23  ;;  %v5958_v29 = vmul.f32 0.0078125, %v327_v26 }
 0x10e   : > { %v329_v31 = vpop.xlane.xlu1 %328 }
 0x10f   : > { %v5177_v32 = vpop.eup %5176  ;;  %5180 = vrsqrt.f32 %v481_v27  ;;  %v482_v33 = vadd.f32 1e-05, %v450_v28  ;;  %v435_v34 = vmul.f32 %v5958_v29, %v5958_v29  ;;  %v356_v35 = vmul.f32 0.0078125, %v329_v31 }
 0x110   : > { %v392_v36 = vpop.xlane.xlu0 %391  ;;  %v511_v37 = vmul.f32 %v5177_v32, %v463_v30  ;;  %v467_v18 = vsub.f32 %v5886_v9, %v5958_v29 }
 0x111   : > { %5182 = vrsqrt.f32 %v482_v33  ;;  %v419_v38 = vmul.f32 0.0078125, %v392_v36  ;;  %v436_v47 = vmul.f32 %v356_v35, %v356_v35  ;;  %v468_v32 = vsub.f32 %v5889_v11, %v356_v35 }
 0x112   : > { %v394_v0 = vpop.xlane.xlu1 %393  ;;  %v534_v56 = vmul.f32 %v5966_v40, %v511_v37 }
 0x113   : > { %v5179_v46 = vpop.eup %5178  ;;  %v451_v48 = vsub.f32 %v419_v38, %v435_v34  ;;  %v420_v53 = vmul.f32 0.0078125, %v394_v0 }
 0x114   : > { %v331_v54 = vpop.xlane.xlu0 %330  ;;  %v512_v55 = vmul.f32 %v5179_v46, %v464_v45  ;;  %v557_v7 = vadd.f32 %v5973_v60, %v534_v56 }
 0x115   : > { %v483_v57 = vadd.f32 1e-05, %v451_v48  ;;  %v452_v58 = vsub.f32 %v420_v53, %v436_v47  ;;  %v357_v59 = vmul.f32 0.0078125, %v331_v54 }
 0x116   : > { %v333_v61 = vpop.xlane.xlu1 %332  ;;  %v535_v1 = vmul.f32 %v5966_v40, %v512_v55 }
 0x117   : > { %5184 = vrsqrt.f32 %v483_v57  ;;  %v484_v62 = vadd.f32 1e-05, %v452_v58  ;;  %v437_v63 = vmul.f32 %v357_v59, %v357_v59  ;;  %v358_v3 = vmul.f32 0.0078125, %v333_v61 }
 0x118   : > { %v396_v4 = vpop.xlane.xlu0 %395  ;;  %v558_v8 = vadd.f32 %v5973_v60, %v535_v1  ;;  %v469_v29 = vsub.f32 %v5898_v16, %v357_v59 }
 0x119   : > { %v5181_v10 = vpop.eup %5180  ;;  %5186 = vrsqrt.f32 %v484_v62  ;;  %v421_v12 = vmul.f32 0.0078125, %v396_v4  ;;  %v438_v22 = vmul.f32 %v358_v3, %v358_v3  ;;  %v470_v11 = vsub.f32 %v5901_v20, %v358_v3 }
 0x11a   : > { %v398_v15 = vpop.xlane.xlu1 %397  ;;  %v573_v17 = vpack.c.bf16 %v558_v8, %v557_v7  ;;  %v513_v19 = vmul.f32 %v5181_v10, %v465_v2 }
 0x11b   : > { %v5183_v21 = vpop.eup %5182  ;;  %v453_v23 = vsub.f32 %v421_v12, %v437_v63  ;;  %v422_v24 = vmul.f32 0.0078125, %v398_v15 }
 0x11c   : > { %774 = vmatmul.mubr.bf16.vlgmr.msra.gmra.mrb[0].mxu0 %v573_v17  ;;  %4601 = vmatprep.mubr.bf16.mxu1 %v573_v17  ;;  %v514_v5 = vmul.f32 %v5183_v21, %v466_v14  ;;  %v536_v13 = vmul.f32 %v5966_v40, %v513_v19  ;;  %v335_v20 = vpop.xlane.xlu0 %334 }
 0x11d   : > { %v485_v25 = vadd.f32 1e-05, %v453_v23  ;;  %v454_v26 = vsub.f32 %v422_v24, %v438_v22  ;;  %783 = vmatprep.mubr.bf16.mxu0 %v5631_v39  ;;  %v359_v59 = vmul.f32 0.0078125, %v335_v20 }
 0x11e   : > { %v537_v27 = vmul.f32 %v5966_v40, %v514_v5  ;;  %v559_v28 = vadd.f32 %v5973_v60, %v536_v13  ;;  %v337_v58 = vpop.xlane.xlu1 %336 }
 0x11f   : > { %5188 = vrsqrt.f32 %v485_v25  ;;  %v486_v6 = vadd.f32 1e-05, %v454_v26  ;;  %v360_v61 = vmul.f32 0.0078125, %v337_v58  ;;  %v439_v63 = vmul.f32 %v359_v59, %v359_v59 }
 0x120   : > { %v560_v30 = vadd.f32 %v5973_v60, %v537_v27  ;;  %v339_v1 = vpop.xlane.xlu0 %338 }
 0x121   : > { %v5185_v31 = vpop.eup %5184  ;;  %5190 = vrsqrt.f32 %v486_v6  ;;  %v440_v2 = vmul.f32 %v360_v61, %v360_v61  ;;  %v361_v3 = vmul.f32 0.0078125, %v339_v1 }
 0x122   : > { %v574_v33 = vpack.c.bf16 %v560_v30, %v559_v28  ;;  %v515_v34 = vmul.f32 %v5185_v31, %v467_v18  ;;  %v341_v62 = vpop.xlane.xlu1 %340 }
 0x123   : > { %v5187_v36 = vpop.eup %5186  ;;  %v6001_v4 = vmul.f32 0.0078125, %v341_v62  ;;  %v441_v14 = vmul.f32 %v361_v3, %v361_v3 }
 0x124   : > { %784 = vmatmul.mubr.bf16.gmra.mrb[4].mxu0 %v574_v33  ;;  %4602 = vmatmul.mubr.bf16.vlgmr.msra.gmra.mrb[0].mxu1 %v574_v33  ;;  %v516_v37 = vmul.f32 %v5187_v36, %v468_v32  ;;  %v538_v38 = vmul.f32 %v5966_v40, %v515_v34  ;;  %v400_v7 = vpop.xlane.xlu0 %399  ;;  %v471_v34 = vsub.f32 %v5911_v41, %v359_v59 }
 0x125   : > { %793 = vmatprep.mubr.bf16.mxu0 %v5631_v39  ;;  %v423_v10 = vmul.f32 0.0078125, %v400_v7  ;;  %v442_v15 = vmul.f32 %v6001_v4, %v6001_v4  ;;  %v474_v41 = vsub.f32 %v5922_v44, %v6001_v4 }
 0x126   : > { %v539_v9 = vmul.f32 %v5966_v40, %v516_v37  ;;  %v561_v45 = vadd.f32 %v5973_v60, %v538_v38  ;;  %v402_v8 = vpop.xlane.xlu1 %401  ;;  %v472_v37 = vsub.f32 %v5914_v42, %v360_v61 }
 0x127   : > { %v424_v12 = vmul.f32 0.0078125, %v402_v8  ;;  %v455_v17 = vsub.f32 %v423_v10, %v439_v63 }
 0x128   : > { %v562_v0 = vadd.f32 %v5973_v60, %v539_v9  ;;  %v404_v21 = vpop.xlane.xlu0 %403 }
 0x129   : > { %v5189_v46 = vpop.eup %5188  ;;  %v456_v19 = vsub.f32 %v424_v12, %v440_v2  ;;  %v487_v23 = vadd.f32 1e-05, %v455_v17  ;;  %v425_v5 = vmul.f32 0.0078125, %v404_v21 }
 0x12a   : > { %v575_v35 = vpack.c.bf16 %v562_v0, %v561_v45  ;;  %v517_v47 = vmul.f32 %v5189_v46, %v469_v29  ;;  %v406_v22 = vpop.xlane.xlu1 %405 }
 0x12b   : > { %v5191_v48 = vpop.eup %5190  ;;  %v488_v24 = vadd.f32 1e-05, %v456_v19  ;;  %v426_v13 = vmul.f32 0.0078125, %v406_v22  ;;  %5192 = vrsqrt.f32 %v487_v23  ;;  %v457_v25 = vsub.f32 %v425_v5, %v441_v14 }
 0x12c   : > { %794 = vmatmul.mubr.bf16.gmra.mrb[8].mxu0 %v575_v35  ;;  %4605 = vmatprep.mubr.bf16.mxu1 %v575_v35  ;;  %v518_v53 = vmul.f32 %v5191_v48, %v470_v11  ;;  %v540_v54 = vmul.f32 %v5966_v40, %v517_v47  ;;  %v343_v27 = vpop.xlane.xlu0 %342  ;;  %v473_v48 = vsub.f32 %v5919_v43, %v361_v3 }
 0x12d   : > { %803 = vmatprep.mubr.bf16.mxu0 %v5631_v39  ;;  %v458_v26 = vsub.f32 %v426_v13, %v442_v15  ;;  %5194 = vrsqrt.f32 %v488_v24  ;;  %v489_v18 = vadd.f32 1e-05, %v457_v25  ;;  %v6005_v30 = vmul.f32 0.0078125, %v343_v27 }
 0x12e   : > { %v541_v55 = vmul.f32 %v5966_v40, %v518_v53  ;;  %v563_v16 = vadd.f32 %v5973_v60, %v540_v54  ;;  %v345_v6 = vpop.xlane.xlu1 %344 }
 0x12f   : > { %v490_v28 = vadd.f32 1e-05, %v458_v26  ;;  %5196 = vrsqrt.f32 %v489_v18  ;;  %v6007_v31 = vmul.f32 0.0078125, %v345_v6  ;;  %v443_v38 = vmul.f32 %v6005_v30, %v6005_v30 }
 0x130   : > { %v564_v56 = vadd.f32 %v5973_v60, %v541_v55  ;;  %v347_v32 = vpop.xlane.xlu0 %346  ;;  %v475_v13 = vsub.f32 %v5935_v49, %v6005_v30 }
 0x131   : > { %5198 = vrsqrt.f32 %v490_v28  ;;  %v6010_v36 = vmul.f32 0.0078125, %v347_v32  ;;  %v444_v9 = vmul.f32 %v6007_v31, %v6007_v31  ;;  %v476_v25 = vsub.f32 %v5938_v50, %v6007_v31 }
 0x132   : > { %v576_v57 = vpack.c.bf16 %v564_v56, %v563_v16  ;;  %v349_v33 = vpop.xlane.xlu1 %348 }
 0x133   : > { %v366_v29 = vmul.f32 0.0078125, %v349_v33  ;;  %v445_v42 = vmul.f32 %v6010_v36, %v6010_v36  ;;  %v477_v27 = vsub.f32 %v5943_v51, %v6010_v36 }
 0x134   : > { %804 = vmatmul.mubr.bf16.gmra.mrb[12].mxu0 %v576_v57  ;;  %4606 = vmatmul.mubr.bf16.gmra.mrb[4].mxu1 %v576_v57  ;;  %v408_v45 = vpop.xlane.xlu0 %407 }
 0x135   : > { %813 = vmatprep.mubr.bf16.mxu0 %v5631_v39  ;;  %v5193_v46 = vpop.eup %5192  ;;  %v427_v11 = vmul.f32 0.0078125, %v408_v45  ;;  %v446_v54 = vmul.f32 %v366_v29, %v366_v29  ;;  %v478_v6 = vsub.f32 %v5946_v52, %v366_v29 }
 0x136   : > { %v410_v0 = vpop.xlane.xlu1 %409  ;;  %v519_v53 = vmul.f32 %v5193_v46, %v471_v34 }
 0x137   : > { %v428_v35 = vmul.f32 0.0078125, %v410_v0  ;;  %v5195_v47 = vpop.eup %5194  ;;  %v459_v55 = vsub.f32 %v427_v11, %v443_v38 }
 0x138   : > { %v520_v56 = vmul.f32 %v5195_v47, %v472_v37  ;;  %v412_v57 = vpop.xlane.xlu0 %411  ;;  %v542_v58 = vmul.f32 %v5966_v40, %v519_v53 }
 0x139   : > { %v460_v16 = vsub.f32 %v428_v35, %v444_v9  ;;  %v5197_v59 = vpop.eup %5196  ;;  %v491_v61 = vadd.f32 1e-05, %v459_v55  ;;  %v429_v1 = vmul.f32 0.0078125, %v412_v57 }
 0x13a   : > { %v414_v20 = vpop.xlane.xlu1 %413  ;;  %v543_v44 = vmul.f32 %v5966_v40, %v520_v56  ;;  %v565_v2 = vadd.f32 %v5973_v60, %v542_v58  ;;  %v521_v3 = vmul.f32 %v5197_v59, %v473_v48 }
 0x13b   : > { %v430_v62 = vmul.f32 0.0078125, %v414_v20  ;;  %v5199_v43 = vpop.eup %5198  ;;  %v492_v63 = vadd.f32 1e-05, %v460_v16  ;;  %v461_v4 = vsub.f32 %v429_v1, %v445_v42  ;;  %5200 = vrsqrt.f32 %v491_v61 }
 0x13c   : > { %v522_v8 = vmul.f32 %v5199_v43, %v474_v41  ;;  %v566_v10 = vadd.f32 %v5973_v60, %v543_v44  ;;  %v544_v12 = vmul.f32 %v5966_v40, %v521_v3 }
 0x13d   : > { %v462_v7 = vsub.f32 %v430_v62, %v446_v54  ;;  %v493_v14 = vadd.f32 1e-05, %v461_v4  ;;  %5202 = vrsqrt.f32 %v492_v63 }
 0x13e   : > { %v545_v17 = vmul.f32 %v5966_v40, %v522_v8  ;;  %v577_v19 = vpack.c.bf16 %v566_v10, %v565_v2  ;;  %v567_v21 = vadd.f32 %v5973_v60, %v544_v12 }
 0x13f   : > { %v494_v15 = vadd.f32 1e-05, %v462_v7  ;;  %5204 = vrsqrt.f32 %v493_v14 }
 0x140   : > { %v568_v22 = vadd.f32 %v5973_v60, %v545_v17  ;;  %4609 = vmatprep.mubr.bf16.mxu1 %v577_v19  ;;  %814 = vmatmul.mubr.bf16.gmra.mrb[16].mxu0 %v577_v19 }
 0x141   : > { %5206 = vrsqrt.f32 %v494_v15  ;;  %823 = vmatprep.mubr.bf16.mxu0 %v5631_v39 }
 0x142   : > { %v578_v23 = vpack.c.bf16 %v568_v22, %v567_v21 }
 0x144   : > { %4610 = vmatmul.mubr.bf16.gmra.mrb[8].mxu1 %v578_v23 }
 0x145   : > { %v5201_v24 = vpop.eup %5200 }
 0x146   : > { %v523_v28 = vmul.f32 %v5201_v24, %v475_v13 }
 0x147   : > { %v5203_v5 = vpop.eup %5202 }
 0x148   : > { %824 = vmatmul.mubr.bf16.gmra.mrb[20].mxu0 %v578_v23  ;;  %v524_v32 = vmul.f32 %v5203_v5, %v476_v25  ;;  %v546_v37 = vmul.f32 %v5966_v40, %v523_v28 }
 0x149   : > { %v5205_v26 = vpop.eup %5204  ;;  %833 = vmatprep.mubr.bf16.mxu0 %v5631_v39 }
 0x14a   : > { %v525_v33 = vmul.f32 %v5205_v26, %v477_v27  ;;  %v547_v49 = vmul.f32 %v5966_v40, %v524_v32  ;;  %v569_v31 = vadd.f32 %v5973_v60, %v546_v37 }
 0x14b   : > { %v5207_v18 = vpop.eup %5206 }
 0x14c   : > { %v526_v34 = vmul.f32 %v5207_v18, %v478_v6  ;;  %v548_v50 = vmul.f32 %v5966_v40, %v525_v33  ;;  %v570_v51 = vadd.f32 %v5973_v60, %v547_v49 }
 0x14e   : > { %v549_v30 = vmul.f32 %v5966_v40, %v526_v34  ;;  %v571_v52 = vadd.f32 %v5973_v60, %v548_v50  ;;  %v579_v38 = vpack.c.bf16 %v570_v51, %v569_v31 }
 0x150   : > { %v572_v36 = vadd.f32 %v5973_v60, %v549_v30  ;;  %4613 = vmatprep.mubr.bf16.mxu1 %v579_v38  ;;  %834 = vmatmul.mubr.bf16.gmra.mrb[24].mxu0 %v579_v38 }
 0x151   : > { %843 = vmatprep.mubr.bf16.mxu0 %v5631_v39 }
 0x152   : > { %v580_v9 = vpack.c.bf16 %v572_v36, %v571_v52 }
 0x154   : > { %4614 = vmatmul.mubr.bf16.gmra.mrb[12].mxu1 %v580_v9 }
 0x158   : > { %844 = vmatmul.mubr.bf16.gmra.mrb[28].mxu0 %v580_v9 }
 0x1ef   : > { %v775_v29 = vpop.f32.mrb[0].mxu0 }
 0x1f0   : > { %v777_v45 = vpop.f32.mrb[1].mxu0 }
 0x1f1   : > { %v779_v0 = vpop.f32.mrb[2].mxu0 }
 0x1f2   : > { %v6048_v40 = vpack.c.bf16 %v779_v0, %v775_v29  ;;  %v781_v46 = vpop.f32.mrb[3].mxu0 }
 0x1f3   : > { %v6050_v11 = vpack.c.bf16 %v781_v46, %v777_v45 }
 0x1f4   : > { %4625 = vmatprep.mubr.msk.bf16.mxu1 %vm1012_vm0, %v6048_v40 }
 0x1f5   : > { %1296 = vrot.lane.b32.xlu0 %v6050_v11, %s5632_s18  ;;  %5017 = vmatprep.subr.msk.bf16.mxu1 %vm1012_vm0, %v6050_v11  ;;  %v1026_v39 = vsel %vm1012_vm0, %v6050_v11, 0 }
 0x1f6   : > { %4618 = vmatpush3.bf16.xpose.msra.mxu1 %v1026_v39 }
 0x1f7   : > { %v785_v60 = vpop.f32.mrb[4].mxu0  ;;  %v4603_v35 = vpop.f32.mrb[0].mxu1 }
 0x1f8   : > { %v787_v47 = vpop.f32.mrb[5].mxu0  ;;  %v888_v48 = vpop.f32.mrb[1].mxu1 }
 0x1f9   : > { %1284 = vrot.lane.b32.xlu0 %v6048_v40, %s5632_s18  ;;  %v789_v41 = vpop.f32.mrb[6].mxu0  ;;  %v4604_v42 = vpop.f32.mrb[2].mxu1 }
 0x1fa   : > { %v6062_v53 = vpack.c.bf16 %v789_v41, %v785_v60  ;;  %v6064_v54 = vpack.c.bf16 %v4604_v42, %v4603_v35  ;;  %v791_v55 = vpop.f32.mrb[7].mxu0  ;;  %v891_v16 = vpop.f32.mrb[3].mxu1 }
 0x1fb   : > { %v6066_v56 = vpack.c.bf16 %v791_v55, %v787_v47  ;;  %v6068_v57 = vpack.c.bf16 %v891_v16, %v888_v48 }
 0x1fd   : > { %1298 = vrot.lane.b32.xlu1 %v6066_v56, %s5632_s18  ;;  %5018 = vmatprep.subr.msk.bf16.mxu1 %vm1012_vm0, %v6066_v56  ;;  %v1029_v20 = vsel %vm1012_vm0, %v6066_v56, 0 }
 0x1fe   : > { %4620 = vmatpush3.bf16.xpose.msra.mxu1 %v1029_v20 }
 0x1ff   : > { %v795_v58 = vpop.f32.mrb[8].mxu0 }
 0x200   : > { %v797_v59 = vpop.f32.mrb[9].mxu0 }
 0x201   : > { %v799_v61 = vpop.f32.mrb[10].mxu0 }
 0x202   : > { %v6076_v1 = vpack.c.bf16 %v799_v61, %v795_v58  ;;  %v801_v62 = vpop.f32.mrb[11].mxu0 }
 0x203   : > { %v6078_v43 = vpack.c.bf16 %v801_v62, %v797_v59 }
 0x204   : > { %1288 = vrot.lane.b32.xlu0 %v6076_v1, %s5632_s18 }
 0x205   : > { %1300 = vrot.lane.b32.xlu1 %v6078_v43, %s5632_s18  ;;  %5019 = vmatprep.subr.msk.bf16.mxu1 %vm1012_vm0, %v6078_v43  ;;  %v1032_v63 = vsel %vm1012_vm0, %v6078_v43, 0 }
 0x206   : > { %4622 = vmatpush3.bf16.xpose.msra.mxu1 %v1032_v63 }
 0x207   : > { %v805_v44 = vpop.f32.mrb[12].mxu0  ;;  %v4607_v2 = vpop.f32.mrb[4].mxu1 }
 0x208   : > { %v807_v3 = vpop.f32.mrb[13].mxu0  ;;  %v904_v4 = vpop.f32.mrb[5].mxu1 }
 0x209   : > { %v809_v7 = vpop.f32.mrb[14].mxu0  ;;  %v4608_v8 = vpop.f32.mrb[6].mxu1 }
 0x20a   : > { %v6088_v10 = vpack.c.bf16 %v809_v7, %v805_v44  ;;  %v811_v12 = vpop.f32.mrb[15].mxu0  ;;  %v6090_v14 = vpack.c.bf16 %v4608_v8, %v4607_v2  ;;  %v907_v15 = vpop.f32.mrb[7].mxu1 }
 0x20b   : > { %v6092_v17 = vpack.c.bf16 %v811_v12, %v807_v3  ;;  %v6094_v19 = vpack.c.bf16 %v907_v15, %v904_v4 }
 0x20d   : > { %1302 = vrot.lane.b32.xlu1 %v6092_v17, %s5632_s18  ;;  %5020 = vmatprep.subr.msk.bf16.mxu1 %vm1012_vm0, %v6092_v17  ;;  %v1035_v21 = vsel %vm1012_vm0, %v6092_v17, 0 }
 0x20e   : > { %4624 = vmatpush3.bf16.xpose.msra.mxu1 %v1035_v21 }
 0x20f   : > { %4633 = vmatprep.subr.bf16.mxu1 %v6068_v57 }
 0x211   : > { %1286 = vrot.lane.b32.xlu1 %v6062_v53, %s5632_s18 }
 0x213   : > { %v815_v51 = vpop.f32.mrb[16].mxu0 }
 0x214   : > { %v817_v52 = vpop.f32.mrb[17].mxu0 }
 0x215   : > { %1290 = vrot.lane.b32.xlu1 %v6088_v10, %s5632_s18  ;;  %4626 = vmatmul.mubr.msk.bf16.vlgmr.msra.gmra.mrb[16].mxu1 %vm1012_vm0, %v6062_v53  ;;  %v819_v36 = vpop.f32.mrb[18].mxu0 }
 0x216   : > { %4629 = vmatprep.mubr.msk.bf16.mxu1 %vm1012_vm0, %v6076_v1  ;;  %4634 = vmatpush3.bf16.msra.mxu1 %v6068_v57  ;;  %v6135_v38 = vpack.c.bf16 %v819_v36, %v815_v51  ;;  %v821_v9 = vpop.f32.mrb[19].mxu0 }
 0x217   : > { %4635 = vmatprep.subr.bf16.mxu1 %v6064_v54  ;;  %v4611_v22 = vpop.f32.mrb[8].mxu1  ;;  %v6137_v29 = vpack.c.bf16 %v821_v9, %v817_v52 }
 0x218   : > { %v920_v23 = vpop.f32.mrb[9].mxu1 }
 0x219   : > { %v4612_v24 = vpop.f32.mrb[10].mxu1 }
 0x21a   : > { %4636 = vmatpush3.bf16.msra.mxu1 %v6064_v54  ;;  %v6120_v5 = vpack.c.bf16 %v4612_v24, %v4611_v22  ;;  %v923_v13 = vpop.f32.mrb[11].mxu1 }
 0x21b   : > { %4637 = vmatprep.subr.bf16.mxu1 %v6094_v19  ;;  %v6122_v25 = vpack.c.bf16 %v923_v13, %v920_v23  ;;  %v825_v45 = vpop.f32.mrb[20].mxu0 }
 0x21c   : > { %v827_v46 = vpop.f32.mrb[21].mxu0 }
 0x21d   : > { %4630 = vmatmul.mubr.msk.bf16.gmra.mrb[20].mxu1 %vm1012_vm0, %v6088_v10  ;;  %v829_v60 = vpop.f32.mrb[22].mxu0 }
 0x21e   : > { %4638 = vmatpush3.bf16.msra.mxu1 %v6094_v19  ;;  %v6141_v35 = vpack.c.bf16 %v829_v60, %v825_v45  ;;  %v831_v47 = vpop.f32.mrb[23].mxu0 }
 0x21f   : > { %4639 = vmatprep.subr.bf16.mxu1 %v6090_v14  ;;  %v6143_v48 = vpack.c.bf16 %v831_v47, %v827_v46 }
 0x222   : > { %4640 = vmatpush3.bf16.msra.mxu1 %v6090_v14 }
 0x223   : > { %v835_v41 = vpop.f32.mrb[24].mxu0 }
 0x224   : > { %v837_v42 = vpop.f32.mrb[25].mxu0 }
 0x225   : > { %v839_v55 = vpop.f32.mrb[26].mxu0 }
 0x226   : > { %v6145_v16 = vpack.c.bf16 %v839_v55, %v835_v41  ;;  %v841_v20 = vpop.f32.mrb[27].mxu0 }
 0x227   : > { %v4615_v26 = vpop.f32.mrb[12].mxu1  ;;  %v6147_v58 = vpack.c.bf16 %v841_v20, %v837_v42 }
 0x228   : > { %v936_v27 = vpop.f32.mrb[13].mxu1 }
 0x229   : > { %v4616_v6 = vpop.f32.mrb[14].mxu1 }
 0x22a   : > { %v6124_v18 = vpack.c.bf16 %v4616_v6, %v4615_v26  ;;  %v939_v28 = vpop.f32.mrb[15].mxu1 }
 0x22b   : > { %v6126_v32 = vpack.c.bf16 %v939_v28, %v936_v27  ;;  %v845_v59 = vpop.f32.mrb[28].mxu0 }
 0x22c   : > { %v847_v62 = vpop.f32.mrb[29].mxu0 }
 0x22d   : > { %v849_v44 = vpop.f32.mrb[30].mxu0 }
 0x22e   : > { %v6151_v2 = vpack.c.bf16 %v849_v44, %v845_v59  ;;  %v851_v3 = vpop.f32.mrb[31].mxu0 }
 0x22f   : > { %v6153_v4 = vpack.c.bf16 %v851_v3, %v847_v62 }
 0x267   : > { %v1297_v33 = vpop.permute.xlu0 %1296 }
 0x268   : > { %5021 = vmatprep.subr.msk.bf16.mxu0 %vm1012_vm0, %v1297_v33  ;;  %v1317_v34 = vsel %vm1012_vm0, %v1297_v33, 0 }
 0x269   : > { %4650 = vmatpush3.bf16.xpose.msra.mxu0 %v1317_v34 }
 0x26b   : > { %v1285_v37 = vpop.permute.xlu0 %1284 }
 0x26c   : > { %4657 = vmatprep.mubr.msk.bf16.mxu0 %vm1012_vm0, %v1285_v37 }
 0x26f   : > { %v1299_v49 = vpop.permute.xlu1 %1298 }
 0x270   : > { %5022 = vmatprep.subr.msk.bf16.mxu0 %vm1012_vm0, %v1299_v49  ;;  %v1320_v50 = vsel %vm1012_vm0, %v1299_v49, 0 }
 0x271   : > { %4652 = vmatpush3.bf16.xpose.msra.mxu0 %v1320_v50 }
 0x276   : > { %v1289_v63 = vpop.permute.xlu0 %1288 }
 0x277   : > { %v1301_v30 = vpop.permute.xlu1 %1300 }
 0x278   : > { %5023 = vmatprep.subr.msk.bf16.mxu0 %vm1012_vm0, %v1301_v30  ;;  %v1323_v31 = vsel %vm1012_vm0, %v1301_v30, 0 }
 0x279   : > { %4654 = vmatpush3.bf16.xpose.msra.mxu0 %v1323_v31 }
 0x27f   : > { %v1303_v0 = vpop.permute.xlu1 %1302 }
 0x280   : > { %5024 = vmatprep.subr.msk.bf16.mxu0 %vm1012_vm0, %v1303_v0  ;;  %v1326_v39 = vsel %vm1012_vm0, %v1303_v0, 0 }
 0x281   : > { %4656 = vmatpush3.bf16.xpose.msra.mxu0 %v1326_v39 }
 0x283   : > { %v1287_v61 = vpop.permute.xlu1 %1286 }
 0x287   : > { %v1291_v7 = vpop.permute.xlu1 %1290 }
 0x288   : > { %4658 = vmatmul.mubr.msk.bf16.vlgmr.msra.gmra.mrb[32].mxu0 %vm1012_vm0, %v1287_v61 }
 0x289   : > { %4661 = vmatprep.mubr.msk.bf16.mxu0 %vm1012_vm0, %v1289_v63 }
 0x290   : > { %4662 = vmatmul.mubr.msk.bf16.gmra.mrb[36].mxu0 %vm1012_vm0, %v1291_v7 }
 0x2e8   : > { %v4627_v8 = vpop.f32.mrb[16].mxu1 }
 0x2e9   : > { %v1071_v12 = vpop.f32.mrb[17].mxu1  ;;  %v1109_v15 = vsel %vm1102_vm1, %v4627_v8, -inf }
 0x2ea   : > { %1110 = vmax.xlane.f32.xlu0 %v1109_v15  ;;  %v4628_v21 = vpop.f32.mrb[18].mxu1  ;;  %v1103_v24 = vsel %vm1102_vm1, %v1071_v12, -inf }
 0x2eb   : > { %v1074_v22 = vpop.f32.mrb[19].mxu1  ;;  %v1112_v27 = vsel %vm1102_vm1, %v4628_v21, -inf }
 0x2ec   : > { %v1106_v23 = vsel %vm1102_vm1, %v1074_v22, -inf }
 0x2ed   : > { %1107 = vmax.xlane.f32.xlu1 %v1106_v23 }
 0x2ee   : > { %1104 = vmax.xlane.f32.xlu0 %v1103_v24 }
 0x2f0   : > { %v6159_v13 = vpop.f32.mrb[20].mxu1 }
 0x2f1   : > { %v6161_v26 = vpop.f32.mrb[21].mxu1  ;;  %v1121_v49 = vsel %vm1102_vm1, %v6159_v13, -inf }
 0x2f2   : > { %1113 = vmax.xlane.f32.xlu0 %v1112_v27  ;;  %v4632_v6 = vpop.f32.mrb[22].mxu1  ;;  %v1115_v34 = vsel %vm1102_vm1, %v6161_v26, -inf }
 0x2f3   : > { %v6164_v28 = vpop.f32.mrb[23].mxu1  ;;  %v1124_v33 = vsel %vm1102_vm1, %v4632_v6, -inf }
 0x2f4   : > { %1125 = vmax.xlane.f32.xlu1 %v1124_v33  ;;  %v1118_v37 = vsel %vm1102_vm1, %v6164_v28, -inf }
 0x2f6   : > { %1116 = vmax.xlane.f32.xlu0 %v1115_v34 }
 0x2f8   : > { %1119 = vmax.xlane.f32.xlu1 %v1118_v37 }
 0x2fa   : > { %1122 = vmax.xlane.f32.xlu0 %v1121_v49 }
 0x35b   : > { %v6173_v50 = vpop.f32.mrb[32].mxu0 }
 0x35c   : > { %v6175_v30 = vpop.f32.mrb[33].mxu0  ;;  %v1399_v9 = vsel %vm1102_vm1, %v6173_v50, -inf }
 0x35d   : > { %v6177_v31 = vpop.f32.mrb[34].mxu0  ;;  %v1393_v51 = vsel %vm1102_vm1, %v6175_v30, -inf }
 0x35e   : > { %1394 = vmax.xlane.f32.xlu0 %v1393_v51  ;;  %v6181_v52 = vpop.f32.mrb[35].mxu0  ;;  %v1402_v36 = vsel %vm1102_vm1, %v6177_v31, -inf }
 0x35f   : > { %1403 = vmax.xlane.f32.xlu1 %v1402_v36  ;;  %v1396_v45 = vsel %vm1102_vm1, %v6181_v52, -inf }
 0x362   : > { %1400 = vmax.xlane.f32.xlu0 %v1399_v9 }
 0x363   : > { %1397 = vmax.xlane.f32.xlu1 %v1396_v45  ;;  %v6189_v0 = vpop.f32.mrb[36].mxu0 }
 0x364   : > { %v6191_v46 = vpop.f32.mrb[37].mxu0  ;;  %v1411_v42 = vsel %vm1102_vm1, %v6189_v0, -inf }
 0x365   : > { %v6193_v39 = vpop.f32.mrb[38].mxu0  ;;  %v1405_v60 = vsel %vm1102_vm1, %v6191_v46, -inf }
 0x366   : > { %1406 = vmax.xlane.f32.xlu0 %v1405_v60  ;;  %v6197_v47 = vpop.f32.mrb[39].mxu0  ;;  %v1414_v41 = vsel %vm1102_vm1, %v6193_v39, -inf }
 0x367   : > { %1415 = vmax.xlane.f32.xlu1 %v1414_v41  ;;  %v1408_v55 = vsel %vm1102_vm1, %v6197_v47, -inf }
 0x36a   : > { %1412 = vmax.xlane.f32.xlu0 %v1411_v42 }
 0x36b   : > { %1409 = vmax.xlane.f32.xlu1 %v1408_v55 }
 0x377   : > { %v1111_v20 = vpop.xlane.xlu0 %1110 }
 0x378   : > { %v1129_v59 = vsub.f32 %v4627_v8, %v1111_v20 }
 0x37a   : > { %v1139_v61 = vmul.f32 1.442695, %v1129_v59  ;;  %v1108_v62 = vpop.xlane.xlu1 %1107 }
 0x37b   : > { %v1105_v63 = vpop.xlane.xlu0 %1104  ;;  %v1128_v3 = vsub.f32 %v1074_v22, %v1108_v62 }
 0x37c   : > { %5208 = vpow2.f32 %v1139_v61  ;;  %v1127_v44 = vsub.f32 %v1071_v12, %v1105_v63 }
 0x37d   : > { %v1137_v27 = vmul.f32 1.442695, %v1128_v3 }
 0x37e   : > { %v1135_v7 = vmul.f32 1.442695, %v1127_v44 }
 0x37f   : > { %v1114_v15 = vpop.xlane.xlu0 %1113 }
 0x380   : > { %5210 = vpow2.f32 %v1135_v7  ;;  %v1130_v23 = vsub.f32 %v4628_v21, %v1114_v15 }
 0x381   : > { %v1126_v24 = vpop.xlane.xlu1 %1125 }
 0x382   : > { %v1141_v33 = vmul.f32 1.442695, %v1130_v23  ;;  %v1134_v34 = vsub.f32 %v4632_v6, %v1126_v24 }
 0x383   : > { %v1117_v37 = vpop.xlane.xlu0 %1116 }
 0x384   : > { %5212 = vpow2.f32 %v1141_v33  ;;  %v1131_v49 = vsub.f32 %v6161_v26, %v1117_v37  ;;  %v1149_v36 = vmul.f32 1.442695, %v1134_v34 }
 0x385   : > { %v1120_v51 = vpop.xlane.xlu1 %1119  ;;  %5214 = vpow2.f32 %v1137_v27 }
 0x386   : > { %v6206_v8 = vpop.eup %5208  ;;  %v1132_v12 = vsub.f32 %v6164_v28, %v1120_v51  ;;  %v1143_v45 = vmul.f32 1.442695, %v1131_v49  ;;  %5216 = vpow2.f32 %v1149_v36 }
 0x387   : > { %v1123_v22 = vpop.xlane.xlu0 %1122  ;;  %v1157_v9 = vsel %vm1102_vm1, %v6206_v8, 0.0 }
 0x388   : > { %v1133_v21 = vsub.f32 %v6159_v13, %v1123_v22  ;;  %1158 = vadd.xlane.f32.xlu0 %v1157_v9  ;;  %v1145_v60 = vmul.f32 1.442695, %v1132_v12 }
 0x38a   : > { %v6212_v6 = vpop.eup %5210  ;;  %v1147_v26 = vmul.f32 1.442695, %v1133_v21 }
 0x38b   : > { %v1151_v41 = vsel %vm1102_vm1, %v6212_v6, 0.0 }
 0x38c   : > { %5218 = vpow2.f32 %v1147_v26  ;;  %1152 = vadd.xlane.f32.xlu0 %v1151_v41 }
 0x38d   : > { %5220 = vpow2.f32 %v1143_v45 }
 0x38e   : > { %v6216_v28 = vpop.eup %5212  ;;  %5222 = vpow2.f32 %v1145_v60 }
 0x38f   : > { %v1160_v42 = vsel %vm1102_vm1, %v6216_v28, 0.0  ;;  %v6220_v13 = vpop.eup %5214 }
 0x390   : > { %1161 = vadd.xlane.f32.xlu1 %v1160_v42  ;;  %v1154_v55 = vsel %vm1102_vm1, %v6220_v13, 0.0  ;;  %v6224_v20 = vpop.eup %5216 }
 0x391   : > { %v1172_v63 = vsel %vm1102_vm1, %v6224_v20, 0.0 }
 0x394   : > { %1155 = vadd.xlane.f32.xlu1 %v1154_v55 }
 0x396   : > { %v6226_v59 = vpop.eup %5218 }
 0x397   : > { %v6228_v61 = vpop.eup %5220  ;;  %v1169_v62 = vsel %vm1102_vm1, %v6226_v59, 0.0 }
 0x398   : > { %v6234_v44 = vpop.eup %5222  ;;  %1170 = vadd.xlane.f32.xlu0 %v1169_v62  ;;  %1173 = vadd.xlane.f32.xlu1 %v1172_v63  ;;  %v1163_v3 = vsel %vm1102_vm1, %v6228_v61, 0.0 }
 0x399   : > { %v1166_v7 = vsel %vm1102_vm1, %v6234_v44, 0.0 }
 0x39c   : > { %1164 = vadd.xlane.f32.xlu0 %v1163_v3  ;;  %1167 = vadd.xlane.f32.xlu1 %v1166_v7 }
 0x3ad   : > { %1491 = vrot.lane.b32.xlu1 %v6064_v54, %s5632_s18 }
 0x3b1   : > { %1493 = vrot.lane.b32.xlu1 %v6094_v19, %s5632_s18 }
 0x3eb   : > { %v1395_v15 = vpop.xlane.xlu0 %1394 }
 0x3ec   : > { %v1404_v23 = vpop.xlane.xlu1 %1403  ;;  %v1417_v27 = vsub.f32 %v6175_v30, %v1395_v15 }
 0x3ed   : > { %v1420_v24 = vsub.f32 %v6177_v31, %v1404_v23 }
 0x3ee   : > { %v1425_v36 = vmul.f32 1.442695, %v1417_v27 }
 0x3ef   : > { %v1431_v33 = vmul.f32 1.442695, %v1420_v24  ;;  %v1401_v34 = vpop.xlane.xlu0 %1400 }
 0x3f0   : > { %v1419_v37 = vsub.f32 %v6173_v50, %v1401_v34  ;;  %v1398_v49 = vpop.xlane.xlu1 %1397 }
 0x3f1   : > { %5224 = vpow2.f32 %v1431_v33  ;;  %v1418_v51 = vsub.f32 %v6181_v52, %v1398_v49 }
 0x3f2   : > { %v1429_v12 = vmul.f32 1.442695, %v1419_v37 }
 0x3f3   : > { %v1427_v22 = vmul.f32 1.442695, %v1418_v51  ;;  %v1407_v9 = vpop.xlane.xlu0 %1406 }
 0x3f4   : > { %5226 = vpow2.f32 %v1429_v12  ;;  %v1421_v21 = vsub.f32 %v6191_v46, %v1407_v9  ;;  %v1416_v62 = vpop.xlane.xlu1 %1415 }
 0x3f5   : > { %5228 = vpow2.f32 %v1427_v22  ;;  %v1424_v9 = vsub.f32 %v6193_v39, %v1416_v62 }
 0x3f6   : > { %5230 = vpow2.f32 %v1425_v36  ;;  %v1433_v31 = vmul.f32 1.442695, %v1421_v21 }
 0x3f7   : > { %v1413_v63 = vpop.xlane.xlu0 %1412 }
 0x3f8   : > { %5232 = vpow2.f32 %v1433_v31  ;;  %v1410_v7 = vpop.xlane.xlu1 %1409  ;;  %v1423_v24 = vsub.f32 %v6189_v0, %v1413_v63 }
 0x3f9   : > { %v1422_v49 = vsub.f32 %v6197_v47, %v1410_v7 }
 0x3fa   : > { %v1437_v33 = vmul.f32 1.442695, %v1423_v24 }
 0x3fb   : > { %v6249_v30 = vpop.eup %5224  ;;  %v1435_v21 = vmul.f32 1.442695, %v1422_v49 }
 0x3fc   : > { %v1450_v50 = vsel %vm1102_vm1, %v6249_v30, 0.0 }
 0x3fd   : > { %1451 = vadd.xlane.f32.xlu1 %v1450_v50 }
 0x3fe   : > { %v6253_v45 = vpop.eup %5226 }
 0x3ff   : > { %v6255_v52 = vpop.eup %5228  ;;  %v1447_v60 = vsel %vm1102_vm1, %v6253_v45, 0.0 }
 0x400   : > { %v6259_v26 = vpop.eup %5230  ;;  %1448 = vadd.xlane.f32.xlu0 %v1447_v60  ;;  %v1444_v46 = vsel %vm1102_vm1, %v6255_v52, 0.0 }
 0x401   : > { %1445 = vadd.xlane.f32.xlu1 %v1444_v46  ;;  %v1441_v42 = vsel %vm1102_vm1, %v6259_v26, 0.0 }
 0x402   : > { %v6263_v41 = vpop.eup %5232 }
 0x403   : > { %v1453_v55 = vsel %vm1102_vm1, %v6263_v41, 0.0 }
 0x404   : > { %1442 = vadd.xlane.f32.xlu0 %v1441_v42  ;;  %v1439_v42 = vmul.f32 1.442695, %v1424_v9 }
 0x405   : > { %1454 = vadd.xlane.f32.xlu1 %v1453_v55 }
 0x415   : > { %v1159_v3 = vpop.xlane.xlu0 %1158 }
 0x416   : > { %1495 = vrot.lane.b32.xlu1 %v6090_v14, %s5632_s18 }
 0x419   : > { %v1153_v15 = vpop.xlane.xlu0 %1152 }
 0x41a   : > { %1489 = vrot.lane.b32.xlu0 %v6068_v57, %s5632_s18  ;;  %1774 = vrot.lane.b32.xlu1 %v6066_v56, %s5633_s19 }
 0x41d   : > { %v1162_v23 = vpop.xlane.xlu1 %1161 }
 0x41e   : > { %1776 = vrot.lane.b32.xlu1 %v6078_v43, %s5633_s19  ;;  %5234 = vrcp.f32 %v1162_v23 }
 0x41f   : > { %5236 = vrcp.f32 %v1153_v15 }
 0x420   : > { %5238 = vrcp.f32 %v1159_v3 }
 0x421   : > { %v1156_v27 = vpop.xlane.xlu1 %1155 }
 0x422   : > { %5240 = vrcp.f32 %v1156_v27  ;;  %1778 = vrot.lane.b32.xlu1 %v6092_v17, %s5633_s19  ;;  %v5163_v27 = vld [vmem:[#allocation8 + $0x8] sm:$0xff]  }
 0x425   : > { %v1171_v34 = vpop.xlane.xlu0 %1170  ;;  %v1174_v37 = vpop.xlane.xlu1 %1173 }
 0x426   : > { %1766 = vrot.lane.b32.xlu1 %v6062_v53, %s5633_s19  ;;  %5242 = vrcp.f32 %v1171_v34 }
 0x427   : > { %5244 = vrcp.f32 %v1174_v37 }
 0x428   : > { %v5235_v51 = vpop.eup %5234  ;;  %5246 = vpow2.f32 %v1437_v33 }
 0x429   : > { %v1165_v36 = vpop.xlane.xlu0 %1164  ;;  %v1168_v0 = vpop.xlane.xlu1 %1167  ;;  %v1186_v50 = vmul.f32 %v5235_v51, %v6216_v28 }
 0x42a   : > { %v5237_v12 = vpop.eup %5236  ;;  %5248 = vrcp.f32 %v1165_v36  ;;  %1770 = vrot.lane.b32.xlu1 %v6088_v10, %s5633_s19 }
 0x42b   : > { %v5239_v22 = vpop.eup %5238  ;;  %5250 = vrcp.f32 %v1168_v0  ;;  %v1183_v47 = vmul.f32 %v5237_v12, %v6212_v6 }
 0x42c   : > { %v5241_v31 = vpop.eup %5240  ;;  %v1185_v46 = vmul.f32 %v5239_v22, %v6206_v8  ;;  %5252 = vpow2.f32 %v1435_v21 }
 0x42d   : > { %v1184_v60 = vmul.f32 %v5241_v31, %v6220_v13  ;;  %5254 = vpow2.f32 %v1439_v42  ;;  %v5160_v31 = vld [vmem:[#allocation8 + $0x10] sm:$0xff]  }
 0x42e   : > { %2165 = vrot.lane.b32.xlu1 %v6066_v56, %s5634_s15  ;;  %v1192_v63 = vpack.c.bf16 %v1186_v50, %v1185_v46 }
 0x42f   : > { %v1191_v55 = vpack.c.bf16 %v1184_v60, %v1183_v47  ;;  %v5161_v60 = vld [vmem:[#allocation8 + $0x18] sm:$0xff]  }
 0x430   : > { %v5243_v39 = vpop.eup %5242 }
 0x431   : > { %4641 = vmatprep.mubr.msk.bf16.mxu1 %vm1102_vm1, %v1191_v55  ;;  %v5245_v62 = vpop.eup %5244  ;;  %v1189_v13 = vmul.f32 %v5243_v39, %v6226_v59 }
 0x432   : > { %2169 = vrot.lane.b32.xlu1 %v6092_v17, %s5634_s15  ;;  %4642 = vmatmul.mubr.msk.bf16.vlgmr.msra.gmra.mrb[24].mxu1 %vm1102_vm1, %v1192_v63  ;;  %v6296_v6 = vpop.eup %5246  ;;  %v1190_v3 = vmul.f32 %v5245_v62, %v6224_v20 }
 0x433   : > { %v1459_v17 = vsel %vm1102_vm1, %v6296_v6, 0.0 }
 0x434   : > { %v5249_v8 = vpop.eup %5248  ;;  %v1194_v24 = vpack.c.bf16 %v1190_v3, %v1189_v13 }
 0x435   : > { %v5251_v28 = vpop.eup %5250  ;;  %v1187_v56 = vmul.f32 %v5249_v8, %v6228_v61  ;;  %v1492_v61 = vpop.permute.xlu1 %1491 }
 0x436   : > { %2157 = vrot.lane.b32.xlu1 %v6062_v53, %s5634_s15  ;;  %v1188_v7 = vmul.f32 %v5251_v28, %v6234_v44  ;;  %v6306_v23 = vpop.eup %5252 }
 0x437   : > { %v1456_v53 = vsel %vm1102_vm1, %v6306_v23, 0.0  ;;  %v6314_v20 = vpop.eup %5254 }
 0x438   : > { %v1193_v15 = vpack.c.bf16 %v1188_v7, %v1187_v56  ;;  %v1462_v59 = vsel %vm1102_vm1, %v6314_v20, 0.0 }
 0x439   : > { %1460 = vadd.xlane.f32.xlu0 %v1459_v17  ;;  %v1494_v44 = vpop.permute.xlu1 %1493 }
 0x43a   : > { %4645 = vmatprep.mubr.msk.bf16.mxu1 %vm1102_vm1, %v1193_v15  ;;  %2161 = vrot.lane.b32.xlu1 %v6088_v10, %s5634_s15  ;;  %v5162_v10 = vld [vmem:[#allocation8] sm:$0xff]  }
 0x43b   : > { %4646 = vmatmul.mubr.msk.bf16.gmra.mrb[28].mxu1 %vm1102_vm1, %v1194_v24  ;;  %4693 = vmatprep.subr.bf16.mxu0 %v5162_v10 }
 0x43c   : > { %4694 = vmatpush3.bf16.msra.mxu0 %v5162_v10 }
 0x43d   : > { %1457 = vadd.xlane.f32.xlu0 %v1456_v53  ;;  %4695 = vmatprep.subr.bf16.mxu0 %v5163_v27 }
 0x440   : > { %4696 = vmatpush3.bf16.msra.mxu0 %v5163_v27 }
 0x441   : > { %1463 = vadd.xlane.f32.xlu0 %v1462_v59 }
 0x457   : > { %1772 = vrot.lane.b32.xlu0 %v6050_v11, %s5633_s19 }
 0x45b   : > { %1764 = vrot.lane.b32.xlu0 %v6048_v40, %s5633_s19 }
 0x45f   : > { %1768 = vrot.lane.b32.xlu0 %v6076_v1, %s5633_s19 }
 0x463   : > { %2163 = vrot.lane.b32.xlu0 %v6050_v11, %s5634_s15 }
 0x467   : > { %2167 = vrot.lane.b32.xlu0 %v6078_v43, %s5634_s15 }
 0x46b   : > { %2155 = vrot.lane.b32.xlu0 %v6048_v40, %s5634_s15 }
 0x46f   : > { %2159 = vrot.lane.b32.xlu0 %v6076_v1, %s5634_s15 }
 0x48a   : > { %v1452_v33 = vpop.xlane.xlu1 %1451 }
 0x48d   : > { %v1449_v34 = vpop.xlane.xlu0 %1448 }
 0x48e   : > { %v1446_v11 = vpop.xlane.xlu1 %1445 }
 0x48f   : > { %5256 = vrcp.f32 %v1446_v11 }
 0x491   : > { %v1443_v37 = vpop.xlane.xlu0 %1442 }
 0x492   : > { %5258 = vrcp.f32 %v1443_v37  ;;  %v1455_v40 = vpop.xlane.xlu1 %1454 }
 0x493   : > { %5260 = vrcp.f32 %v1449_v34 }
 0x494   : > { %5262 = vrcp.f32 %v1452_v33 }
 0x495   : > { %v1490_v43 = vpop.permute.xlu0 %1489  ;;  %5264 = vrcp.f32 %v1455_v40 }
 0x496   : > { %4665 = vmatprep.subr.bf16.mxu1 %v1490_v43  ;;  %v1496_v22 = vpop.permute.xlu1 %1495 }
 0x497   : > { %4666 = vmatpush3.bf16.msra.mxu1 %v1490_v43 }
 0x498   : > { %4667 = vmatprep.subr.bf16.mxu1 %v1492_v61 }
 0x499   : > { %v5257_v49 = vpop.eup %5256 }
 0x49a   : > { %v1474_v0 = vmul.f32 %v5257_v49, %v6255_v52  ;;  %v1775_v43 = vpop.permute.xlu1 %1774 }
 0x49b   : > { %4668 = vmatpush3.bf16.msra.mxu1 %v1492_v61  ;;  %v1796_v40 = vsel %vm1012_vm0, %v1775_v43, 0 }
 0x49c   : > { %v5259_v1 = vpop.eup %5258  ;;  %4669 = vmatprep.subr.bf16.mxu1 %v1494_v44 }
 0x49d   : > { %v5261_v51 = vpop.eup %5260  ;;  %v1473_v36 = vmul.f32 %v5259_v1, %v6259_v26 }
 0x49e   : > { %v5263_v12 = vpop.eup %5262  ;;  %v1475_v21 = vmul.f32 %v5261_v51, %v6253_v45  ;;  %v1777_v49 = vpop.permute.xlu1 %1776 }
 0x49f   : > { %4670 = vmatpush3.bf16.msra.mxu1 %v1494_v44  ;;  %v1481_v9 = vpack.c.bf16 %v1474_v0, %v1473_v36  ;;  %v1476_v50 = vmul.f32 %v5263_v12, %v6249_v30  ;;  %v5265_v42 = vpop.eup %5264  ;;  %v1799_v51 = vsel %vm1012_vm0, %v1777_v49, 0 }
 0x4a0   : > { %4671 = vmatprep.subr.bf16.mxu1 %v1496_v22  ;;  %v1477_v55 = vmul.f32 %v5265_v42, %v6263_v41 }
 0x4a1   : > { %4673 = vmatprep.mubr.msk.bf16.mxu1 %vm1102_vm1, %v1481_v9  ;;  %v1482_v47 = vpack.c.bf16 %v1476_v50, %v1475_v21 }
 0x4a2   : > { %v1779_v36 = vpop.permute.xlu1 %1778 }
 0x4a3   : > { %4672 = vmatpush3.bf16.msra.mxu1 %v1496_v22  ;;  %v1802_v12 = vsel %vm1012_vm0, %v1779_v36, 0 }
 0x4a4   : > { %4681 = vmatprep.subr.bf16.mxu1 %v5160_v31 }
 0x4a6   : > { %4674 = vmatmul.mubr.msk.bf16.vlgmr.msra.gmra.mrb[32].mxu1 %vm1102_vm1, %v1482_v47 }
 0x4a7   : > { %4682 = vmatpush3.bf16.msra.mxu1 %v5160_v31 }
 0x4a8   : > { %4683 = vmatprep.subr.bf16.mxu1 %v5161_v60 }
 0x4ab   : > { %4684 = vmatpush3.bf16.msra.mxu1 %v5161_v60  ;;  %v1767_v60 = vpop.permute.xlu1 %1766 }
 0x4c6   : > { %v1461_v52 = vpop.xlane.xlu0 %1460 }
 0x4ca   : > { %v1458_v26 = vpop.xlane.xlu0 %1457 }
 0x4cb   : > { %5266 = vrcp.f32 %v1458_v26  ;;  %v1771_v26 = vpop.permute.xlu1 %1770 }
 0x4cc   : > { %5268 = vrcp.f32 %v1461_v52 }
 0x4ce   : > { %v1464_v45 = vpop.xlane.xlu0 %1463 }
 0x4cf   : > { %5270 = vrcp.f32 %v1464_v45 }
 0x4d2   : > { %v1773_v46 = vpop.permute.xlu0 %1772 }
 0x4d3   : > { %5025 = vmatprep.subr.msk.bf16.mxu1 %vm1012_vm0, %v1773_v46  ;;  %v1793_v37 = vsel %vm1012_vm0, %v1773_v46, 0  ;;  %v2166_v46 = vpop.permute.xlu1 %2165 }
 0x4d5   : > { %v5267_v30 = vpop.eup %5266 }
 0x4d6   : > { %v1478_v63 = vmul.f32 %v5267_v30, %v6306_v23  ;;  %v5269_v39 = vpop.eup %5268  ;;  %v1765_v1 = vpop.permute.xlu0 %1764 }
 0x4d7   : > { %v1479_v28 = vmul.f32 %v5269_v39, %v6296_v6  ;;  %v2170_v39 = vpop.permute.xlu1 %2169 }
 0x4d8   : > { %v1483_v62 = vpack.c.bf16 %v1478_v63, %v1477_v55  ;;  %v2187_v55 = vsel %vm1012_vm0, %v2166_v46, 0 }
 0x4d9   : > { %v5271_v8 = vpop.eup %5270 }
 0x4da   : > { %4677 = vmatprep.mubr.msk.bf16.mxu1 %vm1102_vm1, %v1483_v62  ;;  %v1480_v56 = vmul.f32 %v5271_v8, %v6314_v20  ;;  %v1769_v0 = vpop.permute.xlu0 %1768  ;;  %v2193_v62 = vsel %vm1012_vm0, %v2170_v39, 0 }
 0x4db   : > { %v2158_v8 = vpop.permute.xlu1 %2157 }
 0x4dc   : > { %v1484_v13 = vpack.c.bf16 %v1480_v56, %v1479_v28  ;;  %v2593_v56 = vsel %vm1012_vm0, %v6137_v29, 0 }
 0x4de   : > { %4678 = vmatmul.mubr.msk.bf16.gmra.mrb[36].mxu1 %vm1102_vm1, %v1484_v13  ;;  %v2164_v22 = vpop.permute.xlu0 %2163 }
 0x4df   : > { %v2184_v45 = vsel %vm1012_vm0, %v2164_v22, 0  ;;  %v2162_v13 = vpop.permute.xlu1 %2161 }
 0x4e2   : > { %v2168_v42 = vpop.permute.xlu0 %2167 }
 0x4e3   : > { %v2190_v63 = vsel %vm1012_vm0, %v2168_v42, 0 }
 0x4e6   : > { %v2156_v30 = vpop.permute.xlu0 %2155 }
 0x4ea   : > { %v2160_v28 = vpop.permute.xlu0 %2159 }
 0x505   : > { %v4643_v3 = vpop.f32.mrb[24].mxu1 }
 0x506   : > { %v1241_v7 = vpop.f32.mrb[25].mxu1 }
 0x507   : > { %v4644_v17 = vpop.f32.mrb[26].mxu1 }
 0x508   : > { %v1273_v15 = vpack.c.bf16 %v4644_v17, %v4643_v3  ;;  %v1244_v24 = vpop.f32.mrb[27].mxu1  ;;  %v2596_v3 = vsel %vm1012_vm0, %v6143_v48, 0  ;;  %v2602_v17 = vsel %vm1012_vm0, %v6153_v4, 0 }
 0x509   : > { %v1272_v41 = vpack.c.bf16 %v1244_v24, %v1241_v7  ;;  %v2599_v7 = vsel %vm1012_vm0, %v6147_v58, 0 }
 0x50b   : > { %4697 = vmatprep.mubr.msk.bf16.mxu0 %vm1012_vm0, %v1272_v41 }
 0x50c   : > { %4698 = vmatmul.mubr.msk.bf16.vlgmr.msra.gmra.mrb[40].mxu0 %vm1012_vm0, %v1273_v15 }
 0x50e   : > { %v4647_v23 = vpop.f32.mrb[28].mxu1 }
 0x50f   : > { %v1257_v53 = vpop.f32.mrb[29].mxu1 }
 0x510   : > { %v4648_v59 = vpop.f32.mrb[30].mxu1 }
 0x511   : > { %v1275_v10 = vpack.c.bf16 %v4648_v59, %v4647_v23  ;;  %v1260_v6 = vpop.f32.mrb[31].mxu1 }
 0x512   : > { %v1274_v61 = vpack.c.bf16 %v1260_v6, %v1257_v53 }
 0x514   : > { %4701 = vmatprep.mubr.msk.bf16.mxu0 %vm1012_vm0, %v1274_v61 }
 0x515   : > { %4702 = vmatmul.mubr.msk.bf16.gmra.mrb[44].mxu0 %vm1012_vm0, %v1275_v10 }
 0x579   : > { %v4675_v20 = vpop.f32.mrb[32].mxu1 }
 0x57a   : > { %v1547_v44 = vpop.f32.mrb[33].mxu1 }
 0x57b   : > { %v4676_v27 = vpop.f32.mrb[34].mxu1 }
 0x57c   : > { %v1579_v33 = vpack.c.bf16 %v4676_v27, %v4675_v20  ;;  %v1550_v34 = vpop.f32.mrb[35].mxu1 }
 0x57d   : > { %v1578_v11 = vpack.c.bf16 %v1550_v34, %v1547_v44 }
 0x57f   : > { %4685 = vmatprep.mubr.msk.bf16.mxu1 %vm1012_vm0, %v1578_v11 }
 0x580   : > { %4686 = vmatmul.mubr.msk.bf16.vlgmr.msra.gmra.mrb[40].mxu1 %vm1012_vm0, %v1579_v33 }
 0x581   : > { %4706 = vmatpush3.bf16.xpose.msra.mxu1 %v1793_v37 }
 0x582   : > { %5026 = vmatprep.subr.msk.bf16.mxu1 %vm1012_vm0, %v1775_v43 }
 0x589   : > { %4708 = vmatpush3.bf16.xpose.msra.mxu1 %v1796_v40 }
 0x58a   : > { %5027 = vmatprep.subr.msk.bf16.mxu1 %vm1012_vm0, %v1777_v49 }
 0x591   : > { %4710 = vmatpush3.bf16.xpose.msra.mxu1 %v1799_v51 }
 0x592   : > { %5028 = vmatprep.subr.msk.bf16.mxu1 %vm1012_vm0, %v1779_v36 }
 0x599   : > { %4712 = vmatpush3.bf16.xpose.msra.mxu1 %v1802_v12 }
 0x59a   : > { %5029 = vmatprep.subr.msk.bf16.mxu1 %vm1012_vm0, %v2164_v22 }
 0x5b1   : > { %v4679_v9 = vpop.f32.mrb[36].mxu1 }
 0x5b2   : > { %v1563_v21 = vpop.f32.mrb[37].mxu1 }
 0x5b3   : > { %v4680_v31 = vpop.f32.mrb[38].mxu1 }
 0x5b4   : > { %v1581_v50 = vpack.c.bf16 %v4680_v31, %v4679_v9  ;;  %v1566_v47 = vpop.f32.mrb[39].mxu1 }
 0x5b5   : > { %v1580_v52 = vpack.c.bf16 %v1566_v47, %v1563_v21 }
 0x5b7   : > { %4689 = vmatprep.mubr.msk.bf16.mxu1 %vm1012_vm0, %v1580_v52 }
 0x5b8   : > { %4690 = vmatmul.mubr.msk.bf16.gmra.mrb[44].mxu1 %vm1012_vm0, %v1581_v50 }
 0x5b9   : > { %4713 = vmatprep.mubr.msk.bf16.mxu1 %vm1012_vm0, %v1765_v1 }
 0x5c0   : > { %4714 = vmatmul.mubr.msk.bf16.vlgmr.msra.gmra.mrb[48].mxu1 %vm1012_vm0, %v1767_v60 }
 0x5c1   : > { %4750 = vmatpush3.bf16.xpose.msra.mxu1 %v2184_v45  ;;  %4717 = vmatprep.mubr.msk.bf16.mxu1 %vm1012_vm0, %v1769_v0 }
 0x5c2   : > { %5030 = vmatprep.subr.msk.bf16.mxu1 %vm1012_vm0, %v2166_v46 }
 0x5c8   : > { %4718 = vmatmul.mubr.msk.bf16.gmra.mrb[52].mxu1 %vm1012_vm0, %v1771_v26 }
 0x5c9   : > { %4752 = vmatpush3.bf16.xpose.msra.mxu1 %v2187_v55  ;;  %4757 = vmatprep.mubr.msk.bf16.mxu1 %vm1012_vm0, %v2156_v30 }
 0x5ca   : > { %5031 = vmatprep.subr.msk.bf16.mxu1 %vm1012_vm0, %v2168_v42 }
 0x5d1   : > { %4754 = vmatpush3.bf16.xpose.msra.mxu1 %v2190_v63 }
 0x5d2   : > { %5032 = vmatprep.subr.msk.bf16.mxu1 %vm1012_vm0, %v2170_v39 }
 0x5d9   : > { %4756 = vmatpush3.bf16.xpose.msra.mxu1 %v2193_v62 }
 0x5da   : > { %5033 = vmatprep.subr.msk.bf16.mxu1 %vm1012_vm0, %v6137_v29 }
 0x5e0   : > { %4758 = vmatmul.mubr.msk.bf16.vlgmr.msra.gmra.mrb[56].mxu1 %vm1012_vm0, %v2158_v8 }
 0x5e1   : > { %4761 = vmatprep.mubr.msk.bf16.mxu1 %vm1012_vm0, %v2160_v28  ;;  %4794 = vmatpush3.bf16.xpose.msra.mxu1 %v2593_v56 }
 0x5e2   : > { %5034 = vmatprep.subr.msk.bf16.mxu1 %vm1012_vm0, %v6143_v48 }
 0x5e8   : > { %4762 = vmatmul.mubr.msk.bf16.gmra.mrb[60].mxu1 %vm1012_vm0, %v2162_v13 }
 0x5e9   : > { %4796 = vmatpush3.bf16.xpose.msra.mxu1 %v2596_v3  ;;  %4801 = vmatprep.mubr.msk.bf16.mxu1 %vm1012_vm0, %v6135_v38 }
 0x5ea   : > { %5035 = vmatprep.subr.msk.bf16.mxu1 %vm1012_vm0, %v6147_v58 }
 0x5f1   : > { %4798 = vmatpush3.bf16.xpose.msra.mxu1 %v2599_v7 }
 0x5f2   : > { %5036 = vmatprep.subr.msk.bf16.mxu1 %vm1012_vm0, %v6153_v4 }
 0x5f9   : > { %4800 = vmatpush3.bf16.xpose.msra.mxu1 %v2602_v17 }
 0x600   : > { %4802 = vmatmul.mubr.msk.bf16.vlgmr.msra.gmra.mrb[64].mxu1 %vm1012_vm0, %v6141_v35 }
 0x601   : > { %4805 = vmatprep.mubr.msk.bf16.mxu1 %vm1012_vm0, %v6145_v16 }
 0x608   : > { %4806 = vmatmul.mubr.msk.bf16.gmra.mrb[68].mxu1 %vm1012_vm0, %v6151_v2 }
 0x653   : > { %v6400_v15 = vpop.f32.mrb[40].mxu1 }
 0x654   : > { %v6402_v24 = vpop.f32.mrb[41].mxu1 }
 0x655   : > { %v6404_v41 = vpop.f32.mrb[42].mxu1 }
 0x656   : > { %v6406_v23 = vpop.f32.mrb[43].mxu1 }
 0x68b   : > { %v6408_v53 = vpop.f32.mrb[44].mxu1 }
 0x68c   : > { %v6410_v59 = vpop.f32.mrb[45].mxu1 }
 0x68d   : > { %v6412_v10 = vpop.f32.mrb[46].mxu1 }
 0x68e   : > { %v6414_v6 = vpop.f32.mrb[47].mxu1 }
 0x68f   : > { %7193 = vst [vmem:[#allocation13_spill] sm:$0xff] %v6414_v6 }
 0x693   : > { %v4715_v61 = vpop.f32.mrb[48].mxu1 }
 0x694   : > { %v1838_v20 = vpop.f32.mrb[49].mxu1  ;;  %v1875_v11 = vsel %vm1102_vm1, %v4715_v61, -inf }
 0x695   : > { %v4716_v44 = vpop.f32.mrb[50].mxu1  ;;  %v1869_v27 = vsel %vm1102_vm1, %v1838_v20, -inf }
 0x696   : > { %1870 = vmax.xlane.f32.xlu0 %v1869_v27  ;;  %v1841_v33 = vpop.f32.mrb[51].mxu1  ;;  %v1878_v49 = vsel %vm1102_vm1, %v4716_v44, -inf }
 0x697   : > { %v1872_v34 = vsel %vm1102_vm1, %v1841_v33, -inf }
 0x698   : > { %1873 = vmax.xlane.f32.xlu1 %v1872_v34 }
 0x69a   : > { %1876 = vmax.xlane.f32.xlu0 %v1875_v11 }
 0x69b   : > { %v4719_v37 = vpop.f32.mrb[52].mxu1 }
 0x69c   : > { %v1854_v43 = vpop.f32.mrb[53].mxu1  ;;  %v1887_v12 = vsel %vm1102_vm1, %v4719_v37, -inf }
 0x69d   : > { %v6419_v40 = vpop.f32.mrb[54].mxu1  ;;  %v1881_v36 = vsel %vm1102_vm1, %v1854_v43, -inf }
 0x69e   : > { %1879 = vmax.xlane.f32.xlu0 %v1878_v49  ;;  %v6422_v1 = vpop.f32.mrb[55].mxu1  ;;  %v1890_v0 = vsel %vm1102_vm1, %v6419_v40, -inf }
 0x69f   : > { %v1884_v51 = vsel %vm1102_vm1, %v6422_v1, -inf }
 0x6a0   : > { %1885 = vmax.xlane.f32.xlu1 %v1884_v51 }
 0x6a2   : > { %1882 = vmax.xlane.f32.xlu0 %v1881_v36 }
 0x6a4   : > { %1891 = vmax.xlane.f32.xlu1 %v1890_v0 }
 0x6a6   : > { %1888 = vmax.xlane.f32.xlu0 %v1887_v12 }
 0x6b3   : > { %v6430_v22 = vpop.f32.mrb[56].mxu1 }
 0x6b4   : > { %v6432_v9 = vpop.f32.mrb[57].mxu1 }
 0x6b5   : > { %v6434_v21 = vpop.f32.mrb[58].mxu1 }
 0x6b6   : > { %v6436_v31 = vpop.f32.mrb[59].mxu1 }
 0x6bb   : > { %v6438_v50 = vpop.f32.mrb[60].mxu1 }
 0x6bc   : > { %v6440_v47 = vpop.f32.mrb[61].mxu1 }
 0x6bd   : > { %v6442_v60 = vpop.f32.mrb[62].mxu1 }
 0x6be   : > { %v6444_v52 = vpop.f32.mrb[63].mxu1 }
 0x6d3   : > { %v6446_v26 = vpop.f32.mrb[64].mxu1 }
 0x6d4   : > { %v6448_v45 = vpop.f32.mrb[65].mxu1 }
 0x6d5   : > { %v6450_v46 = vpop.f32.mrb[66].mxu1 }
 0x6d6   : > { %v6452_v42 = vpop.f32.mrb[67].mxu1 }
 0x6db   : > { %v6454_v30 = vpop.f32.mrb[68].mxu1 }
 0x6dc   : > { %v6456_v55 = vpop.f32.mrb[69].mxu1 }
 0x6dd   : > { %v6458_v63 = vpop.f32.mrb[70].mxu1 }
 0x6de   : > { %v6460_v39 = vpop.f32.mrb[71].mxu1 }
 0x723   : > { %v1871_v62 = vpop.xlane.xlu0 %1870 }
 0x724   : > { %v1893_v8 = vsub.f32 %v1838_v20, %v1871_v62 }
 0x725   : > { %v1874_v28 = vpop.xlane.xlu1 %1873 }
 0x726   : > { %v1901_v3 = vmul.f32 1.442695, %v1893_v8  ;;  %v1894_v7 = vsub.f32 %v1841_v33, %v1874_v28 }
 0x727   : > { %v1877_v56 = vpop.xlane.xlu0 %1876 }
 0x728   : > { %v1895_v13 = vsub.f32 %v4715_v61, %v1877_v56  ;;  %v1903_v11 = vmul.f32 1.442695, %v1894_v7 }
 0x72a   : > { %v1905_v17 = vmul.f32 1.442695, %v1895_v13 }
 0x72b   : > { %v1880_v27 = vpop.xlane.xlu0 %1879 }
 0x72c   : > { %5272 = vpow2.f32 %v1905_v17  ;;  %v1896_v34 = vsub.f32 %v4716_v44, %v1880_v27 }
 0x72d   : > { %5274 = vpow2.f32 %v1901_v3  ;;  %v1886_v17 = vpop.xlane.xlu1 %1885 }
 0x72e   : > { %v1907_v49 = vmul.f32 1.442695, %v1896_v34 }
 0x72f   : > { %v1883_v51 = vpop.xlane.xlu0 %1882 }
 0x730   : > { %5276 = vpow2.f32 %v1907_v49  ;;  %v1897_v36 = vsub.f32 %v1854_v43, %v1883_v51 }
 0x731   : > { %5278 = vpow2.f32 %v1903_v11  ;;  %v1892_v27 = vpop.xlane.xlu1 %1891  ;;  %v1898_v11 = vsub.f32 %v6422_v1, %v1886_v17 }
 0x732   : > { %v1909_v20 = vmul.f32 1.442695, %v1897_v36  ;;  %v1900_v34 = vsub.f32 %v6419_v40, %v1892_v27  ;;  %v2281_v27 = vsel %vm1102_vm1, %v6442_v60, -inf }
 0x733   : > { %v1889_v0 = vpop.xlane.xlu0 %1888  ;;  %v1911_v51 = vmul.f32 1.442695, %v1898_v11 }
 0x734   : > { %v1899_v12 = vsub.f32 %v4719_v37, %v1889_v0  ;;  %v1915_v49 = vmul.f32 1.442695, %v1900_v34 }
 0x736   : > { %v6462_v6 = vpop.eup %5272  ;;  %v1913_v62 = vmul.f32 1.442695, %v1899_v12  ;;  %v2260_v12 = vsel %vm1102_vm1, %v6432_v9, -inf }
 0x737   : > { %v1923_v61 = vsel %vm1102_vm1, %v6462_v6, 0.0  ;;  %v6466_v33 = vpop.eup %5274 }
 0x738   : > { %5280 = vpow2.f32 %v1913_v62  ;;  %1924 = vadd.xlane.f32.xlu0 %v1923_v61  ;;  %v1917_v8 = vsel %vm1102_vm1, %v6466_v33, 0.0  ;;  %v2269_v62 = vsel %vm1102_vm1, %v6434_v21, -inf  ;;  %v2272_v61 = vsel %vm1102_vm1, %v6440_v47, -inf }
 0x739   : > { %5282 = vpow2.f32 %v1909_v20  ;;  %v2266_v20 = vsel %vm1102_vm1, %v6430_v22, -inf }
 0x73a   : > { %v6468_v44 = vpop.eup %5276  ;;  %5284 = vpow2.f32 %v1915_v49 }
 0x73b   : > { %v1926_v37 = vsel %vm1102_vm1, %v6468_v44, 0.0  ;;  %v6474_v43 = vpop.eup %5278  ;;  %5286 = vpow2.f32 %v1911_v51 }
 0x73c   : > { %1918 = vadd.xlane.f32.xlu0 %v1917_v8  ;;  %1927 = vadd.xlane.f32.xlu1 %v1926_v37  ;;  %v1920_v28 = vsel %vm1102_vm1, %v6474_v43, 0.0  ;;  %v2278_v8 = vsel %vm1102_vm1, %v6438_v50, -inf  ;;  %v2263_v37 = vsel %vm1102_vm1, %v6436_v31, -inf }
 0x740   : > { %1921 = vadd.xlane.f32.xlu1 %v1920_v28 }
 0x742   : > { %v6478_v56 = vpop.eup %5280 }
 0x743   : > { %v1935_v13 = vsel %vm1102_vm1, %v6478_v56, 0.0  ;;  %v6482_v3 = vpop.eup %5282 }
 0x744   : > { %1936 = vadd.xlane.f32.xlu0 %v1935_v13  ;;  %v1929_v7 = vsel %vm1102_vm1, %v6482_v3, 0.0  ;;  %v6502_v36 = vpop.eup %5284  ;;  %v2275_v13 = vsel %vm1102_vm1, %v6444_v52, -inf }
 0x745   : > { %v1938_v40 = vsel %vm1102_vm1, %v6502_v36, 0.0  ;;  %v6506_v0 = vpop.eup %5286 }
 0x746   : > { %v1932_v1 = vsel %vm1102_vm1, %v6506_v0, 0.0 }
 0x748   : > { %1930 = vadd.xlane.f32.xlu0 %v1929_v7 }
 0x751   : > { %1963 = vrot.lane.b32.xlu1 %v6064_v54, %s5633_s19 }
 0x755   : > { %1965 = vrot.lane.b32.xlu1 %v6094_v19, %s5633_s19 }
 0x75e   : > { %1961 = vrot.lane.b32.xlu0 %v6068_v57, %s5633_s19 }
 0x762   : > { %2862 = vrot.lane.b32.xlu0 %v6137_v29, %s5632_s18 }
 0x766   : > { %2866 = vrot.lane.b32.xlu0 %v6147_v58, %s5632_s18 }
 0x76a   : > { %2850 = vrot.lane.b32.xlu0 %v6135_v38, %s5632_s18 }
 0x76e   : > { %2854 = vrot.lane.b32.xlu0 %v6145_v16, %s5632_s18 }
 0x779   : > { %1939 = vadd.xlane.f32.xlu1 %v1938_v40 }
 0x77d   : > { %1933 = vadd.xlane.f32.xlu1 %v1932_v1 }
 0x78d   : > { %2261 = vmax.xlane.f32.xlu0 %v2260_v12 }
 0x78e   : > { %1967 = vrot.lane.b32.xlu1 %v6090_v14, %s5633_s19 }
 0x791   : > { %2267 = vmax.xlane.f32.xlu0 %v2266_v20 }
 0x792   : > { %2864 = vrot.lane.b32.xlu1 %v6143_v48, %s5632_s18 }
 0x795   : > { %2270 = vmax.xlane.f32.xlu0 %v2269_v62 }
 0x796   : > { %2868 = vrot.lane.b32.xlu1 %v6153_v4, %s5632_s18 }
 0x799   : > { %2273 = vmax.xlane.f32.xlu0 %v2272_v61 }
 0x79a   : > { %2852 = vrot.lane.b32.xlu1 %v6141_v35, %s5632_s18 }
 0x79d   : > { %2279 = vmax.xlane.f32.xlu0 %v2278_v8 }
 0x79e   : > { %2856 = vrot.lane.b32.xlu1 %v6151_v2, %s5632_s18 }
 0x7c2   : > { %2264 = vmax.xlane.f32.xlu1 %v2263_v37 }
 0x7c5   : > { %v1925_v28 = vpop.xlane.xlu0 %1924 }
 0x7c6   : > { %2276 = vmax.xlane.f32.xlu1 %v2275_v13 }
 0x7c9   : > { %v1919_v7 = vpop.xlane.xlu0 %1918  ;;  %v1928_v17 = vpop.xlane.xlu1 %1927 }
 0x7ca   : > { %2282 = vmax.xlane.f32.xlu1 %v2281_v27  ;;  %5288 = vrcp.f32 %v1919_v7 }
 0x7cd   : > { %v1922_v34 = vpop.xlane.xlu1 %1921 }
 0x7ce   : > { %5290 = vrcp.f32 %v1922_v34 }
 0x7cf   : > { %5292 = vrcp.f32 %v1928_v17 }
 0x7d0   : > { %5294 = vrcp.f32 %v1925_v28 }
 0x7d1   : > { %v1937_v11 = vpop.xlane.xlu0 %1936  ;;  %v1964_v1 = vpop.permute.xlu1 %1963 }
 0x7d4   : > { %v5289_v51 = vpop.eup %5288 }
 0x7d5   : > { %v1931_v49 = vpop.xlane.xlu0 %1930  ;;  %v1949_v20 = vmul.f32 %v5289_v51, %v6466_v33  ;;  %v1966_v13 = vpop.permute.xlu1 %1965 }
 0x7d8   : > { %v5291_v40 = vpop.eup %5290 }
 0x7d9   : > { %v1962_v12 = vpop.permute.xlu0 %1961  ;;  %v1950_v62 = vmul.f32 %v5291_v40, %v6474_v43  ;;  %v5293_v27 = vpop.eup %5292 }
 0x7da   : > { %4721 = vmatprep.subr.bf16.mxu0 %v1962_v12  ;;  %v5295_v51 = vpop.eup %5294  ;;  %v1952_v40 = vmul.f32 %v5293_v27, %v6468_v44 }
 0x7db   : > { %4722 = vmatpush3.bf16.msra.mxu0 %v1962_v12  ;;  %v1957_v61 = vpack.c.bf16 %v1950_v62, %v1949_v20  ;;  %v1951_v12 = vmul.f32 %v5295_v51, %v6462_v6 }
 0x7dc   : > { %4723 = vmatprep.subr.bf16.mxu0 %v1964_v1 }
 0x7dd   : > { %v2863_v8 = vpop.permute.xlu0 %2862  ;;  %4729 = vmatprep.mubr.msk.bf16.mxu0 %vm1102_vm1, %v1957_v61  ;;  %v1958_v20 = vpack.c.bf16 %v1952_v40, %v1951_v12 }
 0x7de   : > { %5037 = vmatprep.subr.msk.bf16.mxu1 %vm1012_vm0, %v2863_v8  ;;  %v2883_v37 = vsel %vm1012_vm0, %v2863_v8, 0 }
 0x7df   : > { %4724 = vmatpush3.bf16.msra.mxu0 %v1964_v1  ;;  %4826 = vmatpush3.bf16.xpose.msra.mxu1 %v2883_v37 }
 0x7e0   : > { %4725 = vmatprep.subr.bf16.mxu0 %v1966_v13 }
 0x7e1   : > { %v2867_v7 = vpop.permute.xlu0 %2866 }
 0x7e3   : > { %4726 = vmatpush3.bf16.msra.mxu0 %v1966_v13 }
 0x7e5   : > { %v2851_v33 = vpop.permute.xlu0 %2850 }
 0x7e6   : > { %4833 = vmatprep.mubr.msk.bf16.mxu1 %vm1012_vm0, %v2851_v33 }
 0x7e9   : > { %v2855_v6 = vpop.permute.xlu0 %2854 }
 0x806   : > { %v1940_v43 = vpop.xlane.xlu1 %1939 }
 0x807   : > { %5296 = vrcp.f32 %v1940_v43 }
 0x808   : > { %5298 = vrcp.f32 %v1931_v49 }
 0x809   : > { %5300 = vrcp.f32 %v1937_v11 }
 0x80a   : > { %v1934_v34 = vpop.xlane.xlu1 %1933 }
 0x80b   : > { %5302 = vrcp.f32 %v1934_v34  ;;  %v2889_v34 = vsel %vm1012_vm0, %v2867_v7, 0 }
 0x80e   : > { %v1968_v1 = vpop.permute.xlu1 %1967 }
 0x80f   : > { %4727 = vmatprep.subr.bf16.mxu0 %v1968_v1 }
 0x810   : > { %4728 = vmatpush3.bf16.msra.mxu0 %v1968_v1 }
 0x811   : > { %v5297_v62 = vpop.eup %5296 }
 0x812   : > { %v2865_v61 = vpop.permute.xlu1 %2864  ;;  %v5299_v17 = vpop.eup %5298  ;;  %v1956_v44 = vmul.f32 %v5297_v62, %v6502_v36 }
 0x813   : > { %4730 = vmatmul.mubr.msk.bf16.vlgmr.msra.gmra.mrb[48].mxu0 %vm1102_vm1, %v1958_v20  ;;  %5038 = vmatprep.subr.msk.bf16.mxu1 %vm1012_vm0, %v2865_v61  ;;  %v2886_v28 = vsel %vm1012_vm0, %v2865_v61, 0  ;;  %v5301_v11 = vpop.eup %5300  ;;  %v1953_v8 = vmul.f32 %v5299_v17, %v6482_v3 }
 0x814   : > { %4828 = vmatpush3.bf16.xpose.msra.mxu1 %v2886_v28  ;;  %v1955_v13 = vmul.f32 %v5301_v11, %v6478_v56 }
 0x815   : > { %v5303_v49 = vpop.eup %5302  ;;  %5039 = vmatprep.subr.msk.bf16.mxu1 %vm1012_vm0, %v2867_v7 }
 0x816   : > { %v1954_v37 = vmul.f32 %v5303_v49, %v6506_v0  ;;  %v1960_v43 = vpack.c.bf16 %v1956_v44, %v1955_v13  ;;  %v2869_v51 = vpop.permute.xlu1 %2868 }
 0x817   : > { %v2892_v20 = vsel %vm1012_vm0, %v2869_v51, 0 }
 0x818   : > { %v1959_v33 = vpack.c.bf16 %v1954_v37, %v1953_v8 }
 0x81a   : > { %v2262_v27 = vpop.xlane.xlu0 %2261  ;;  %4733 = vmatprep.mubr.msk.bf16.mxu0 %vm1102_vm1, %v1959_v33  ;;  %v2853_v61 = vpop.permute.xlu1 %2852 }
 0x81b   : > { %4734 = vmatmul.mubr.msk.bf16.gmra.mrb[52].mxu0 %vm1102_vm1, %v1960_v43  ;;  %v2284_v36 = vsub.f32 %v6432_v9, %v2262_v27  ;;  %v5164_v27 = vld [vmem:[#allocation8 + $0x20] sm:$0xff]  }
 0x81c   : > { %4830 = vmatpush3.bf16.xpose.msra.mxu1 %v2889_v34  ;;  %4737 = vmatprep.subr.bf16.mxu0 %v5164_v27  ;;  %v5165_v34 = vld [vmem:[#allocation8 + $0x28] sm:$0xff]  }
 0x81d   : > { %5040 = vmatprep.subr.msk.bf16.mxu1 %vm1012_vm0, %v2869_v51  ;;  %v2292_v40 = vmul.f32 1.442695, %v2284_v36  ;;  %4738 = vmatpush3.bf16.msra.mxu0 %v5164_v27 }
 0x81e   : > { %v2268_v3 = vpop.xlane.xlu0 %2267  ;;  %v2857_v8 = vpop.permute.xlu1 %2856  ;;  %4739 = vmatprep.subr.bf16.mxu0 %v5165_v34 }
 0x81f   : > { %v2286_v0 = vsub.f32 %v6430_v22, %v2268_v3 }
 0x821   : > { %v2296_v56 = vmul.f32 1.442695, %v2286_v0  ;;  %4740 = vmatpush3.bf16.msra.mxu0 %v5165_v34 }
 0x822   : > { %v2271_v1 = vpop.xlane.xlu0 %2270 }
 0x823   : > { %5304 = vpow2.f32 %v2296_v56  ;;  %v2287_v12 = vsub.f32 %v6434_v21, %v2271_v1  ;;  %v2672_v1 = vsel %vm1102_vm1, %v6452_v42, -inf }
 0x824   : > { %4832 = vmatpush3.bf16.xpose.msra.mxu1 %v2892_v20  ;;  %5306 = vpow2.f32 %v2292_v40 }
 0x825   : > { %v2298_v7 = vmul.f32 1.442695, %v2287_v12 }
 0x826   : > { %v2274_v62 = vpop.xlane.xlu0 %2273 }
 0x827   : > { %5308 = vpow2.f32 %v2298_v7  ;;  %v2288_v9 = vsub.f32 %v6440_v47, %v2274_v62 }
 0x829   : > { %v2300_v21 = vmul.f32 1.442695, %v2288_v9 }
 0x82a   : > { %v2280_v17 = vpop.xlane.xlu0 %2279 }
 0x82b   : > { %v2290_v28 = vsub.f32 %v6438_v50, %v2280_v17  ;;  %4834 = vmatmul.mubr.msk.bf16.vlgmr.msra.gmra.mrb[72].mxu1 %vm1012_vm0, %v2853_v61 }
 0x82c   : > { %4837 = vmatprep.mubr.msk.bf16.mxu1 %vm1012_vm0, %v2855_v6 }
 0x82d   : > { %v6564_v22 = vpop.eup %5304  ;;  %v2304_v11 = vmul.f32 1.442695, %v2290_v28 }
 0x82e   : > { %v2314_v49 = vsel %vm1102_vm1, %v6564_v22, 0.0  ;;  %v6568_v44 = vpop.eup %5306 }
 0x82f   : > { %5310 = vpow2.f32 %v2304_v11  ;;  %2315 = vadd.xlane.f32.xlu0 %v2314_v49  ;;  %v2308_v50 = vsel %vm1102_vm1, %v6568_v44, 0.0 }
 0x830   : > { %5312 = vpow2.f32 %v2300_v21 }
 0x831   : > { %v6570_v47 = vpop.eup %5308 }
 0x832   : > { %v2317_v6 = vsel %vm1102_vm1, %v6570_v47, 0.0 }
 0x833   : > { %2309 = vadd.xlane.f32.xlu0 %v2308_v50  ;;  %2318 = vadd.xlane.f32.xlu1 %v2317_v6  ;;  %v2669_v6 = vsel %vm1102_vm1, %v6448_v45, -inf }
 0x834   : > { %4838 = vmatmul.mubr.msk.bf16.gmra.mrb[76].mxu1 %vm1012_vm0, %v2857_v8  ;;  %v2675_v8 = vsel %vm1102_vm1, %v6446_v26, -inf }
 0x839   : > { %v6577_v37 = vpop.eup %5310 }
 0x83a   : > { %v2326_v13 = vsel %vm1102_vm1, %v6577_v37, 0.0  ;;  %v6581_v33 = vpop.eup %5312 }
 0x83b   : > { %2327 = vadd.xlane.f32.xlu0 %v2326_v13  ;;  %v2320_v43 = vsel %vm1102_vm1, %v6581_v33, 0.0  ;;  %v2678_v13 = vsel %vm1102_vm1, %v6450_v46, -inf }
 0x83f   : > { %2321 = vadd.xlane.f32.xlu0 %v2320_v43 }
 0x84f   : > { %v2265_v51 = vpop.xlane.xlu1 %2264 }
 0x850   : > { %v2285_v36 = vsub.f32 %v6436_v31, %v2265_v51 }
 0x852   : > { %v2294_v3 = vmul.f32 1.442695, %v2285_v36 }
 0x854   : > { %5314 = vpow2.f32 %v2294_v3 }
 0x855   : > { %2352 = vrot.lane.b32.xlu0 %v6068_v57, %s5634_s15  ;;  %v2277_v57 = vpop.xlane.xlu1 %2276 }
 0x856   : > { %v2289_v12 = vsub.f32 %v6444_v52, %v2277_v57  ;;  %v2690_v52 = vsel %vm1102_vm1, %v6458_v63, -inf }
 0x858   : > { %v2302_v7 = vmul.f32 1.442695, %v2289_v12 }
 0x859   : > { %3338 = vrot.lane.b32.xlu0 %v6137_v29, %s5633_s19  ;;  %v2283_v31 = vpop.xlane.xlu1 %2282 }
 0x85a   : > { %v2291_v56 = vsub.f32 %v6442_v60, %v2283_v31 }
 0x85c   : > { %v2306_v20 = vmul.f32 1.442695, %v2291_v56  ;;  %v2684_v56 = vsel %vm1102_vm1, %v6460_v39, -inf }
 0x85d   : > { %3342 = vrot.lane.b32.xlu0 %v6147_v58, %s5633_s19 }
 0x85e   : > { %v6592_v0 = vpop.eup %5314  ;;  %5316 = vpow2.f32 %v2306_v20 }
 0x85f   : > { %v2311_v40 = vsel %vm1102_vm1, %v6592_v0, 0.0  ;;  %5318 = vpow2.f32 %v2302_v7 }
 0x860   : > { %2312 = vadd.xlane.f32.xlu1 %v2311_v40  ;;  %v2681_v40 = vsel %vm1102_vm1, %v6456_v55, -inf }
 0x861   : > { %3330 = vrot.lane.b32.xlu0 %v6135_v38, %s5633_s19 }
 0x865   : > { %3334 = vrot.lane.b32.xlu0 %v6145_v16, %s5633_s19 }
 0x868   : > { %v6608_v62 = vpop.eup %5316 }
 0x871   : > { %2354 = vrot.lane.b32.xlu1 %v6064_v54, %s5634_s15  ;;  %v2329_v54 = vsel %vm1102_vm1, %v6608_v62, 0.0 }
 0x875   : > { %2356 = vrot.lane.b32.xlu1 %v6094_v19, %s5634_s15  ;;  %v6612_v19 = vpop.eup %5318 }
 0x876   : > { %v2323_v60 = vsel %vm1102_vm1, %v6612_v19, 0.0 }
 0x884   : > { %2673 = vmax.xlane.f32.xlu0 %v2672_v1 }
 0x899   : > { %2330 = vadd.xlane.f32.xlu1 %v2329_v54 }
 0x89a   : > { %3336 = vrot.lane.b32.xlu0 %v6151_v2, %s5633_s19 }
 0x89d   : > { %2324 = vadd.xlane.f32.xlu1 %v2323_v60 }
 0x8ae   : > { %2358 = vrot.lane.b32.xlu1 %v6090_v14, %s5634_s15 }
 0x8b2   : > { %3340 = vrot.lane.b32.xlu1 %v6143_v48, %s5633_s19 }
 0x8b6   : > { %3344 = vrot.lane.b32.xlu1 %v6153_v4, %s5633_s19 }
 0x8b9   : > { %2691 = vmax.xlane.f32.xlu0 %v2690_v52  ;;  %v2687_v52 = vsel %vm1102_vm1, %v6454_v30, -inf }
 0x8ba   : > { %3332 = vrot.lane.b32.xlu1 %v6141_v35, %s5633_s19 }
 0x8bc   : > { %v6628_v9 = vpop.xlane.xlu0 %2315 }
 0x8c0   : > { %v2310_v61 = vpop.xlane.xlu0 %2309  ;;  %v2319_v51 = vpop.xlane.xlu1 %2318 }
 0x8c1   : > { %5320 = vrcp.f32 %v2310_v61 }
 0x8c8   : > { %v6630_v17 = vpop.xlane.xlu0 %2327 }
 0x8cc   : > { %v6632_v28 = vpop.xlane.xlu0 %2321 }
 0x8cf   : > { %3055 = vrot.lane.b32.xlu0 %v6122_v25, %s5632_s18 }
 0x8d0   : > { %v2353_v14 = vpop.permute.xlu0 %2352 }
 0x8d1   : > { %4765 = vmatprep.subr.bf16.mxu0 %v2353_v14 }
 0x8d4   : > { %v3339_v21 = vpop.permute.xlu0 %3338 }
 0x8d5   : > { %v3359_v11 = vsel %vm1012_vm0, %v3339_v21, 0  ;;  %5041 = vmatprep.subr.msk.bf16.mxu1 %vm1012_vm0, %v3339_v21  ;;  %v5321_v21 = vpop.eup %5320 }
 0x8d6   : > { %4882 = vmatpush3.bf16.xpose.msra.mxu1 %v3359_v11 }
 0x8d8   : > { %v6638_v49 = vpop.permute.xlu0 %3342 }
 0x8dc   : > { %v3331_v50 = vpop.permute.xlu0 %3330 }
 0x8dd   : > { %4889 = vmatprep.mubr.msk.bf16.mxu1 %vm1012_vm0, %v3331_v50  ;;  %v2340_v50 = vmul.f32 %v5321_v21, %v6568_v44  ;;  %v5166_v21 = vld [vmem:[#allocation8 + $0x30] sm:$0xff]  }
 0x8de   : > { %2670 = vmax.xlane.f32.xlu1 %v2669_v6 }
 0x8e2   : > { %2676 = vmax.xlane.f32.xlu1 %v2675_v8 }
 0x8e6   : > { %v4731_v43 = vpop.f32.mrb[48].mxu0  ;;  %2679 = vmax.xlane.f32.xlu1 %v2678_v13 }
 0x8e7   : > { %v2019_v27 = vpop.f32.mrb[49].mxu0 }
 0x8e8   : > { %v4732_v34 = vpop.f32.mrb[50].mxu0 }
 0x8e9   : > { %v2051_v36 = vpack.c.bf16 %v4732_v34, %v4731_v43  ;;  %v2022_v3 = vpop.f32.mrb[51].mxu0 }
 0x8ea   : > { %v2050_v57 = vpack.c.bf16 %v2022_v3, %v2019_v27  ;;  %2682 = vmax.xlane.f32.xlu1 %v2681_v40 }
 0x8ec   : > { %4741 = vmatprep.mubr.msk.bf16.mxu0 %vm1012_vm0, %v2050_v57 }
 0x8ed   : > { %4742 = vmatmul.mubr.msk.bf16.vlgmr.msra.gmra.mrb[40].mxu0 %vm1012_vm0, %v2051_v36  ;;  %v2313_v31 = vpop.xlane.xlu1 %2312 }
 0x8ee   : > { %4766 = vmatpush3.bf16.msra.mxu0 %v2353_v14  ;;  %5322 = vrcp.f32 %v2313_v31  ;;  %v4735_v1 = vpop.f32.mrb[52].mxu0  ;;  %2685 = vmax.xlane.f32.xlu1 %v2684_v56 }
 0x8ef   : > { %v2035_v12 = vpop.f32.mrb[53].mxu0  ;;  %5324 = vrcp.f32 %v2319_v51 }
 0x8f0   : > { %v4736_v20 = vpop.f32.mrb[54].mxu0  ;;  %5326 = vrcp.f32 %v6628_v9 }
 0x8f1   : > { %v2053_v7 = vpack.c.bf16 %v4736_v20, %v4735_v1  ;;  %v2038_v54 = vpop.f32.mrb[55].mxu0  ;;  %v2355_v60 = vpop.permute.xlu1 %2354 }
 0x8f2   : > { %v2052_v61 = vpack.c.bf16 %v2038_v54, %v2035_v12  ;;  %2688 = vmax.xlane.f32.xlu1 %v2687_v52  ;;  %4767 = vmatprep.subr.bf16.mxu0 %v2355_v60 }
 0x8f3   : > { %4768 = vmatpush3.bf16.msra.mxu0 %v2355_v60 }
 0x8f4   : > { %4745 = vmatprep.mubr.msk.bf16.mxu0 %vm1012_vm0, %v2052_v61 }
 0x8f5   : > { %4746 = vmatmul.mubr.msk.bf16.gmra.mrb[44].mxu0 %vm1012_vm0, %v2053_v7  ;;  %v2357_v14 = vpop.permute.xlu1 %2356 }
 0x8f6   : > { %4769 = vmatprep.subr.bf16.mxu0 %v2357_v14 }
 0x8f7   : > { %4770 = vmatpush3.bf16.msra.mxu0 %v2357_v14 }
 0x8f8   : > { %v5323_v11 = vpop.eup %5322 }
 0x8f9   : > { %v2341_v6 = vmul.f32 %v5323_v11, %v6592_v0  ;;  %v5325_v60 = vpop.eup %5324 }
 0x8fa   : > { %v5327_v61 = vpop.eup %5326  ;;  %v2343_v14 = vmul.f32 %v5325_v60, %v6570_v47 }
 0x8fb   : > { %v2348_v8 = vpack.c.bf16 %v2341_v6, %v2340_v50  ;;  %v2342_v51 = vmul.f32 %v5327_v61, %v6564_v22 }
 0x8fd   : > { %4773 = vmatprep.mubr.msk.bf16.mxu0 %vm1102_vm1, %v2348_v8  ;;  %v2349_v9 = vpack.c.bf16 %v2343_v14, %v2342_v51 }
 0x8fe   : > { %v6660_v13 = vpop.f32.mrb[72].mxu1 }
 0x8ff   : > { %v6662_v43 = vpop.f32.mrb[73].mxu1  ;;  %v2965_v40 = vsel %vm1102_vm1, %v6660_v13, -inf }
 0x900   : > { %v6664_v27 = vpop.f32.mrb[74].mxu1  ;;  %v2959_v34 = vsel %vm1102_vm1, %v6662_v43, -inf }
 0x901   : > { %v6668_v36 = vpop.f32.mrb[75].mxu1  ;;  %2960 = vmax.xlane.f32.xlu1 %v2959_v34  ;;  %v2968_v56 = vsel %vm1102_vm1, %v6664_v27, -inf }
 0x902   : > { %v2962_v44 = vsel %vm1102_vm1, %v6668_v36, -inf }
 0x905   : > { %2963 = vmax.xlane.f32.xlu1 %v2962_v44 }
 0x907   : > { %v6672_v0 = vpop.f32.mrb[76].mxu1 }
 0x908   : > { %v6674_v3 = vpop.f32.mrb[77].mxu1  ;;  %v2977_v20 = vsel %vm1102_vm1, %v6672_v0, -inf }
 0x909   : > { %v6678_v57 = vpop.f32.mrb[78].mxu1  ;;  %2966 = vmax.xlane.f32.xlu1 %v2965_v40  ;;  %v2971_v1 = vsel %vm1102_vm1, %v6674_v3, -inf }
 0x90a   : > { %v6680_v31 = vpop.f32.mrb[79].mxu1  ;;  %v2980_v7 = vsel %vm1102_vm1, %v6678_v57, -inf }
 0x90b   : > { %v2974_v12 = vsel %vm1102_vm1, %v6680_v31, -inf }
 0x90d   : > { %2969 = vmax.xlane.f32.xlu1 %v2968_v56 }
 0x911   : > { %2972 = vmax.xlane.f32.xlu1 %v2971_v1 }
 0x915   : > { %2975 = vmax.xlane.f32.xlu1 %v2974_v12 }
 0x919   : > { %2978 = vmax.xlane.f32.xlu1 %v2977_v20  ;;  %v3365_v20 = vsel %vm1012_vm0, %v6638_v49, 0 }
 0x91d   : > { %2981 = vmax.xlane.f32.xlu1 %v2980_v7 }
 0x926   : > { %v2331_v54 = vpop.xlane.xlu1 %2330 }
 0x927   : > { %5328 = vrcp.f32 %v2331_v54 }
 0x928   : > { %5330 = vrcp.f32 %v6632_v28  ;;  %v5167_v28 = vld [vmem:[#allocation8 + $0x38] sm:$0xff]  }
 0x929   : > { %5332 = vrcp.f32 %v6630_v17 }
 0x92a   : > { %v2325_v52 = vpop.xlane.xlu1 %2324 }
 0x92b   : > { %5334 = vrcp.f32 %v2325_v52 }
 0x92e   : > { %3057 = vrot.lane.b32.xlu1 %v6120_v5, %s5632_s18  ;;  %v2359_v11 = vpop.permute.xlu1 %2358 }
 0x92f   : > { %4771 = vmatprep.subr.bf16.mxu0 %v2359_v11 }
 0x930   : > { %4772 = vmatpush3.bf16.msra.mxu0 %v2359_v11 }
 0x931   : > { %4781 = vmatprep.subr.bf16.mxu0 %v5166_v21  ;;  %v5329_v50 = vpop.eup %5328 }
 0x932   : > { %v3341_v6 = vpop.permute.xlu1 %3340  ;;  %v5331_v17 = vpop.eup %5330  ;;  %v2347_v22 = vmul.f32 %v5329_v50, %v6608_v62 }
 0x933   : > { %4774 = vmatmul.mubr.msk.bf16.vlgmr.msra.gmra.mrb[56].mxu0 %vm1102_vm1, %v2349_v9  ;;  %5042 = vmatprep.subr.msk.bf16.mxu1 %vm1012_vm0, %v3341_v6  ;;  %v3362_v47 = vsel %vm1012_vm0, %v3341_v6, 0  ;;  %v5333_v8 = vpop.eup %5332  ;;  %v2344_v44 = vmul.f32 %v5331_v17, %v6581_v33 }
 0x934   : > { %4782 = vmatpush3.bf16.msra.mxu0 %v5166_v21  ;;  %4884 = vmatpush3.bf16.xpose.msra.mxu1 %v3362_v47  ;;  %v2346_v56 = vmul.f32 %v5333_v8, %v6577_v37  ;;  %v3335_v37 = vpop.permute.xlu0 %3334 }
 0x935   : > { %v5335_v34 = vpop.eup %5334  ;;  %5043 = vmatprep.subr.msk.bf16.mxu1 %vm1012_vm0, %v6638_v49  ;;  %4783 = vmatprep.subr.bf16.mxu0 %v5167_v28 }
 0x936   : > { %v2345_v40 = vmul.f32 %v5335_v34, %v6612_v19  ;;  %v2351_v12 = vpack.c.bf16 %v2347_v22, %v2346_v56  ;;  %v3345_v7 = vpop.permute.xlu1 %3344 }
 0x937   : > { %v3368_v33 = vsel %vm1012_vm0, %v3345_v7, 0 }
 0x938   : > { %4784 = vmatpush3.bf16.msra.mxu0 %v5167_v28  ;;  %v2350_v1 = vpack.c.bf16 %v2345_v40, %v2344_v44  ;;  %v2674_v19 = vpop.xlane.xlu0 %2673 }
 0x939   : > { %4809 = vmatprep.subr.bf16.mxu0 %v6122_v25  ;;  %v2694_v14 = vsub.f32 %v6452_v42, %v2674_v19 }
 0x93a   : > { %4777 = vmatprep.mubr.msk.bf16.mxu0 %vm1102_vm1, %v2350_v1  ;;  %v3333_v62 = vpop.permute.xlu1 %3332 }
 0x93b   : > { %4778 = vmatmul.mubr.msk.bf16.gmra.mrb[60].mxu0 %vm1102_vm1, %v2351_v12  ;;  %v2703_v50 = vmul.f32 1.442695, %v2694_v14 }
 0x93c   : > { %4886 = vmatpush3.bf16.xpose.msra.mxu1 %v3365_v20  ;;  %v3337_v54 = vpop.permute.xlu0 %3336 }
 0x93d   : > { %5044 = vmatprep.subr.msk.bf16.mxu1 %vm1012_vm0, %v3345_v7 }
 0x944   : > { %4888 = vmatpush3.bf16.xpose.msra.mxu1 %v3368_v33 }
 0x946   : > { %v2692_v51 = vpop.xlane.xlu0 %2691 }
 0x947   : > { %v2700_v6 = vsub.f32 %v6458_v63, %v2692_v51 }
 0x94b   : > { %4890 = vmatmul.mubr.msk.bf16.vlgmr.msra.gmra.mrb[80].mxu1 %vm1012_vm0, %v3333_v62 }
 0x94c   : > { %4893 = vmatprep.mubr.msk.bf16.mxu1 %vm1012_vm0, %v3335_v37 }
 0x953   : > { %4894 = vmatmul.mubr.msk.bf16.gmra.mrb[84].mxu1 %vm1012_vm0, %v3337_v54 }
 0x96b   : > { %v2671_v49 = vpop.xlane.xlu1 %2670 }
 0x96c   : > { %v2693_v60 = vsub.f32 %v6448_v45, %v2671_v49  ;;  %v2715_v45 = vmul.f32 1.442695, %v2700_v6 }
 0x96e   : > { %v2701_v21 = vmul.f32 1.442695, %v2693_v60 }
 0x96f   : > { %v2677_v52 = vpop.xlane.xlu1 %2676 }
 0x970   : > { %v2695_v61 = vsub.f32 %v6446_v26, %v2677_v52 }
 0x972   : > { %v2705_v11 = vmul.f32 1.442695, %v2695_v61 }
 0x973   : > { %v2680_v9 = vpop.xlane.xlu1 %2679 }
 0x974   : > { %5336 = vpow2.f32 %v2705_v11  ;;  %v2696_v28 = vsub.f32 %v6450_v46, %v2680_v9 }
 0x975   : > { %5338 = vpow2.f32 %v2701_v21 }
 0x976   : > { %v2707_v17 = vmul.f32 1.442695, %v2696_v28 }
 0x977   : > { %v2683_v47 = vpop.xlane.xlu1 %2682 }
 0x978   : > { %5340 = vpow2.f32 %v2707_v17  ;;  %v2697_v34 = vsub.f32 %v6456_v55, %v2683_v47 }
 0x979   : > { %5342 = vpow2.f32 %v2703_v50 }
 0x97a   : > { %5344 = vpow2.f32 %v2715_v45  ;;  %v2709_v1 = vmul.f32 1.442695, %v2697_v34 }
 0x97b   : > { %v2686_v8 = vpop.xlane.xlu1 %2685 }
 0x97c   : > { %v2698_v26 = vsub.f32 %v6460_v39, %v2686_v8 }
 0x97e   : > { %v6724_v42 = vpop.eup %5336  ;;  %v2711_v22 = vmul.f32 1.442695, %v2698_v26 }
 0x97f   : > { %v2689_v44 = vpop.xlane.xlu1 %2688  ;;  %v2723_v46 = vsel %vm1102_vm1, %v6724_v42, 0.0  ;;  %v6729_v63 = vpop.eup %5338 }
 0x980   : > { %v2699_v40 = vsub.f32 %v6454_v30, %v2689_v44  ;;  %2724 = vadd.xlane.f32.xlu0 %v2723_v46  ;;  %5346 = vpow2.f32 %v2711_v22  ;;  %v2717_v12 = vsel %vm1102_vm1, %v6729_v63, 0.0 }
 0x982   : > { %v6732_v56 = vpop.eup %5340  ;;  %v2713_v39 = vmul.f32 1.442695, %v2699_v40 }
 0x983   : > { %v2726_v55 = vsel %vm1102_vm1, %v6732_v56, 0.0  ;;  %v6738_v20 = vpop.eup %5342 }
 0x984   : > { %5348 = vpow2.f32 %v2713_v39  ;;  %2718 = vadd.xlane.f32.xlu0 %v2717_v12  ;;  %2727 = vadd.xlane.f32.xlu1 %v2726_v55  ;;  %v2720_v30 = vsel %vm1102_vm1, %v6738_v20, 0.0  ;;  %v6742_v7 = vpop.eup %5344 }
 0x985   : > { %5350 = vpow2.f32 %v2709_v1  ;;  %v2738_v33 = vsel %vm1102_vm1, %v6742_v7, 0.0 }
 0x988   : > { %2721 = vadd.xlane.f32.xlu1 %v2720_v30 }
 0x98a   : > { %v6746_v37 = vpop.eup %5346 }
 0x98b   : > { %v2732_v54 = vsel %vm1102_vm1, %v6746_v37, 0.0 }
 0x98c   : > { %2739 = vadd.xlane.f32.xlu1 %v2738_v33 }
 0x98e   : > { %v6748_v62 = vpop.eup %5348  ;;  %v2961_v19 = vpop.xlane.xlu1 %2960 }
 0x98f   : > { %v2735_v49 = vsel %vm1102_vm1, %v6748_v62, 0.0  ;;  %v6754_v60 = vpop.eup %5350  ;;  %v2983_v14 = vsub.f32 %v6662_v43, %v2961_v19 }
 0x990   : > { %2733 = vadd.xlane.f32.xlu1 %v2732_v54  ;;  %2736 = vadd.xlane.f32.xlu0 %v2735_v49  ;;  %v2729_v61 = vsel %vm1102_vm1, %v6754_v60, 0.0 }
 0x991   : > { %v2991_v51 = vmul.f32 1.442695, %v2983_v14 }
 0x992   : > { %v2964_v52 = vpop.xlane.xlu1 %2963 }
 0x993   : > { %v2984_v9 = vsub.f32 %v6668_v36, %v2964_v52 }
 0x994   : > { %2730 = vadd.xlane.f32.xlu0 %v2729_v61 }
 0x995   : > { %v2993_v17 = vmul.f32 1.442695, %v2984_v9 }
 0x996   : > { %v2967_v21 = vpop.xlane.xlu1 %2966 }
 0x997   : > { %v2985_v11 = vsub.f32 %v6660_v13, %v2967_v21 }
 0x999   : > { %v2995_v28 = vmul.f32 1.442695, %v2985_v11  ;;  %v6818_v11 = vpop.permute.xlu0 %3055 }
 0x99a   : > { %v2970_v50 = vpop.xlane.xlu1 %2969 }
 0x99b   : > { %5352 = vpow2.f32 %v2995_v28  ;;  %v2986_v6 = vsub.f32 %v6664_v27, %v2970_v50 }
 0x99c   : > { %5354 = vpow2.f32 %v2991_v51 }
 0x99d   : > { %v2997_v47 = vmul.f32 1.442695, %v2986_v6 }
 0x99e   : > { %v2973_v45 = vpop.xlane.xlu1 %2972 }
 0x99f   : > { %5356 = vpow2.f32 %v2997_v47  ;;  %v2987_v43 = vsub.f32 %v6674_v3, %v2973_v45 }
 0x9a0   : > { %5358 = vpow2.f32 %v2993_v17 }
 0x9a1   : > { %v2999_v44 = vmul.f32 1.442695, %v2987_v43 }
 0x9a2   : > { %v2976_v8 = vpop.xlane.xlu1 %2975 }
 0x9a3   : > { %v2988_v46 = vsub.f32 %v6680_v31, %v2976_v8 }
 0x9a5   : > { %v6762_v26 = vpop.eup %5352 }
 0x9a6   : > { %v2979_v13 = vpop.xlane.xlu1 %2978  ;;  %v3013_v36 = vsel %vm1102_vm1, %v6762_v26, 0.0  ;;  %v6767_v34 = vpop.eup %5354 }
 0x9a7   : > { %v2989_v22 = vsub.f32 %v6672_v0, %v2979_v13  ;;  %3014 = vadd.xlane.f32.xlu0 %v3013_v36  ;;  %v3007_v39 = vsel %vm1102_vm1, %v6767_v34, 0.0  ;;  %v3001_v0 = vmul.f32 1.442695, %v2988_v46 }
 0x9a9   : > { %v6770_v27 = vpop.eup %5356  ;;  %v3003_v40 = vmul.f32 1.442695, %v2989_v22 }
 0x9aa   : > { %v2982_v1 = vpop.xlane.xlu1 %2981  ;;  %v3016_v3 = vsel %vm1102_vm1, %v6770_v27, 0.0  ;;  %v6777_v12 = vpop.eup %5358 }
 0x9ab   : > { %5360 = vpow2.f32 %v3003_v40  ;;  %v2990_v55 = vsub.f32 %v6678_v57, %v2982_v1  ;;  %3008 = vadd.xlane.f32.xlu0 %v3007_v39  ;;  %3017 = vadd.xlane.f32.xlu1 %v3016_v3  ;;  %v3010_v31 = vsel %vm1102_vm1, %v6777_v12, 0.0 }
 0x9ac   : > { %5362 = vpow2.f32 %v2999_v44 }
 0x9ad   : > { %v3005_v30 = vmul.f32 1.442695, %v2990_v55 }
 0x9af   : > { %5364 = vpow2.f32 %v3005_v30  ;;  %3011 = vadd.xlane.f32.xlu1 %v3010_v31 }
 0x9b0   : > { %5366 = vpow2.f32 %v3001_v0 }
 0x9b5   : > { %v6782_v33 = vpop.eup %5360 }
 0x9b6   : > { %v3025_v19 = vsel %vm1102_vm1, %v6782_v33, 0.0  ;;  %v6786_v54 = vpop.eup %5362 }
 0x9b7   : > { %3026 = vadd.xlane.f32.xlu0 %v3025_v19  ;;  %v3019_v49 = vsel %vm1102_vm1, %v6786_v54, 0.0 }
 0x9b9   : > { %v6788_v57 = vpop.eup %5364 }
 0x9ba   : > { %v3028_v52 = vsel %vm1102_vm1, %v6788_v57, 0.0  ;;  %v6794_v61 = vpop.eup %5366 }
 0x9bb   : > { %3020 = vadd.xlane.f32.xlu0 %v3019_v49  ;;  %3029 = vadd.xlane.f32.xlu1 %v3028_v52  ;;  %v3022_v14 = vsel %vm1102_vm1, %v6794_v61, 0.0 }
 0x9bf   : > { %3023 = vadd.xlane.f32.xlu1 %v3022_v14 }
 0x9d0   : > { %3059 = vrot.lane.b32.xlu1 %v6126_v32, %s5632_s18 }
 0x9d1   : > { %3061 = vrot.lane.b32.xlu0 %v6124_v18, %s5632_s18  ;;  %s5556_s18 = scalar_lea.vmem %s5555_s17, 4096 }
 0x9d2   : > { %p5558_p9 = scmp.lt.s32.totalorder %s5556_s18, %s5550_s29 }
 0x9d4   : > { %3729 = vrot.lane.b32.xlu1 %v6137_v29, %s5634_s15  ;;  %p5559_p12 = por %p5558_p9, %p5557_p5 }
 0x9d5   : > { %3731 = vrot.lane.b32.xlu0 %v6143_v48, %s5634_s15 }
 0x9d6   : > { %p5560_p2 = pnand %p5559_p12, %p5553_p3 }
 0x9d8   : > { %3733 = vrot.lane.b32.xlu1 %v6147_v58, %s5634_s15 }
 0x9d9   : > { %3735 = vrot.lane.b32.xlu0 %v6153_v4, %s5634_s15 }
 0x9dc   : > { %3721 = vrot.lane.b32.xlu1 %v6135_v38, %s5634_s15 }
 0x9dd   : > { %3723 = vrot.lane.b32.xlu0 %v6141_v35, %s5634_s15  ;;  %v6822_v35 = vpop.permute.xlu1 %3057 }
 0x9e0   : > { %3725 = vrot.lane.b32.xlu1 %v6145_v16, %s5634_s15 }
 0x9e1   : > { %3727 = vrot.lane.b32.xlu0 %v6151_v2, %s5634_s15 }
 0xa06   : > { %v4775_v29 = vpop.f32.mrb[56].mxu0 }
 0xa07   : > { %v2410_v48 = vpop.f32.mrb[57].mxu0 }
 0xa08   : > { %v4776_v21 = vpop.f32.mrb[58].mxu0 }
 0xa09   : > { %v2442_v58 = vpack.c.bf16 %v4776_v21, %v4775_v29  ;;  %v2413_v51 = vpop.f32.mrb[59].mxu0 }
 0xa0a   : > { %v2441_v4 = vpack.c.bf16 %v2413_v51, %v2410_v48 }
 0xa0c   : > { %4785 = vmatprep.mubr.msk.bf16.mxu0 %vm1012_vm0, %v2441_v4 }
 0xa0d   : > { %4786 = vmatmul.mubr.msk.bf16.vlgmr.msra.gmra.mrb[40].mxu0 %vm1012_vm0, %v2442_v58  ;;  %v2725_v38 = vpop.xlane.xlu0 %2724 }
 0xa0e   : > { %4810 = vmatpush3.bf16.msra.mxu0 %v6122_v25  ;;  %v4779_v16 = vpop.f32.mrb[60].mxu0 }
 0xa0f   : > { %4811 = vmatprep.subr.bf16.mxu0 %v6120_v5  ;;  %v2426_v2 = vpop.f32.mrb[61].mxu0 }
 0xa10   : > { %v4780_v9 = vpop.f32.mrb[62].mxu0 }
 0xa11   : > { %v2444_v28 = vpack.c.bf16 %v4780_v9, %v4779_v16  ;;  %v2429_v50 = vpop.f32.mrb[63].mxu0  ;;  %v2719_v17 = vpop.xlane.xlu0 %2718 }
 0xa12   : > { %v2443_v6 = vpack.c.bf16 %v2429_v50, %v2426_v2  ;;  %4812 = vmatpush3.bf16.msra.mxu0 %v6120_v5  ;;  %v2728_v47 = vpop.xlane.xlu1 %2727 }
 0xa13   : > { %4813 = vmatprep.subr.bf16.mxu0 %v6126_v32  ;;  %5368 = vrcp.f32 %v2728_v47 }
 0xa14   : > { %4789 = vmatprep.mubr.msk.bf16.mxu0 %vm1012_vm0, %v2443_v6  ;;  %5370 = vrcp.f32 %v2719_v17 }
 0xa15   : > { %4790 = vmatmul.mubr.msk.bf16.gmra.mrb[44].mxu0 %vm1012_vm0, %v2444_v28  ;;  %5372 = vrcp.f32 %v2725_v38 }
 0xa16   : > { %4814 = vmatpush3.bf16.msra.mxu0 %v6126_v32  ;;  %v2722_v45 = vpop.xlane.xlu1 %2721 }
 0xa17   : > { %5374 = vrcp.f32 %v2722_v45  ;;  %4815 = vmatprep.subr.bf16.mxu0 %v6124_v18 }
 0xa1a   : > { %4816 = vmatpush3.bf16.msra.mxu0 %v6124_v18  ;;  %v2740_v8 = vpop.xlane.xlu1 %2739 }
 0xa1b   : > { %4841 = vmatprep.subr.bf16.mxu0 %v6818_v11 }
 0xa1d   : > { %v2737_v43 = vpop.xlane.xlu0 %2736  ;;  %v5369_v13 = vpop.eup %5368 }
 0xa1e   : > { %v2734_v36 = vpop.xlane.xlu1 %2733  ;;  %v6834_v22 = vpop.f32.mrb[80].mxu1  ;;  %5376 = vrcp.f32 %v2737_v43  ;;  %v2752_v55 = vmul.f32 %v5369_v13, %v6732_v56 }
 0xa1f   : > { %v5371_v44 = vpop.eup %5370  ;;  %v6836_v46 = vpop.f32.mrb[81].mxu1  ;;  %5378 = vrcp.f32 %v2734_v36  ;;  %v3441_v21 = vsel %vm1102_vm1, %v6834_v22, -inf }
 0xa20   : > { %v5373_v40 = vpop.eup %5372  ;;  %v6838_v1 = vpop.f32.mrb[82].mxu1  ;;  %v3435_v39 = vsel %vm1102_vm1, %v6836_v46, -inf  ;;  %5380 = vrcp.f32 %v2740_v8  ;;  %v2749_v19 = vmul.f32 %v5371_v44, %v6729_v63 }
 0xa21   : > { %v5375_v3 = vpop.eup %5374  ;;  %v6843_v0 = vpop.f32.mrb[83].mxu1  ;;  %3436 = vmax.xlane.f32.xlu1 %v3435_v39  ;;  %v2751_v52 = vmul.f32 %v5373_v40, %v6724_v42  ;;  %v3444_v14 = vsel %vm1102_vm1, %v6838_v1, -inf }
 0xa22   : > { %v2731_v30 = vpop.xlane.xlu0 %2730  ;;  %v3438_v31 = vsel %vm1102_vm1, %v6843_v0, -inf  ;;  %v2750_v49 = vmul.f32 %v5375_v3, %v6738_v20 }
 0xa23   : > { %5382 = vrcp.f32 %v2731_v30  ;;  %3439 = vmax.xlane.f32.xlu0 %v3438_v31  ;;  %v2758_v29 = vpack.c.bf16 %v2752_v55, %v2751_v52 }
 0xa24   : > { %v2757_v56 = vpack.c.bf16 %v2750_v49, %v2749_v19 }
 0xa25   : > { %3445 = vmax.xlane.f32.xlu1 %v3444_v14 }
 0xa26   : > { %4817 = vmatprep.mubr.msk.bf16.mxu0 %vm1102_vm1, %v2757_v56  ;;  %v6853_v48 = vpop.f32.mrb[84].mxu1 }
 0xa27   : > { %4818 = vmatmul.mubr.msk.bf16.vlgmr.msra.gmra.mrb[64].mxu0 %vm1102_vm1, %v2758_v29  ;;  %v6858_v63 = vpop.f32.mrb[85].mxu1  ;;  %3442 = vmax.xlane.f32.xlu0 %v3441_v21  ;;  %v3453_v50 = vsel %vm1102_vm1, %v6853_v48, -inf }
 0xa28   : > { %4842 = vmatpush3.bf16.msra.mxu0 %v6818_v11  ;;  %v6861_v42 = vpop.f32.mrb[86].mxu1  ;;  %v5377_v20 = vpop.eup %5376  ;;  %v3447_v4 = vsel %vm1102_vm1, %v6858_v63, -inf }
 0xa29   : > { %4843 = vmatprep.subr.bf16.mxu0 %v6822_v35  ;;  %v6864_v58 = vpop.f32.mrb[87].mxu1  ;;  %v5379_v51 = vpop.eup %5378  ;;  %v2755_v11 = vmul.f32 %v5377_v20, %v6748_v62  ;;  %v3456_v6 = vsel %vm1102_vm1, %v6861_v42, -inf }
 0xa2a   : > { %v3450_v38 = vsel %vm1102_vm1, %v6864_v58, -inf  ;;  %v5381_v16 = vpop.eup %5380  ;;  %v2754_v28 = vmul.f32 %v5379_v51, %v6746_v37 }
 0xa2b   : > { %3448 = vmax.xlane.f32.xlu0 %v3447_v4  ;;  %3451 = vmax.xlane.f32.xlu1 %v3450_v38  ;;  %v2756_v17 = vmul.f32 %v5381_v16, %v6742_v7 }
 0xa2c   : > { %4844 = vmatpush3.bf16.msra.mxu0 %v6822_v35 }
 0xa2d   : > { %v5383_v2 = vpop.eup %5382  ;;  %v2760_v45 = vpack.c.bf16 %v2756_v17, %v2755_v11  ;;  %v5168_v17 = vld [vmem:[#allocation8 + $0x10] sm:$0xff]  }
 0xa2e   : > { %v2753_v9 = vmul.f32 %v5383_v2, %v6754_v60 }
 0xa2f   : > { %3454 = vmax.xlane.f32.xlu0 %v3453_v50  ;;  %3457 = vmax.xlane.f32.xlu1 %v3456_v6 }
 0xa30   : > { %v2759_v47 = vpack.c.bf16 %v2754_v28, %v2753_v9 }
 0xa32   : > { %4821 = vmatprep.mubr.msk.bf16.mxu0 %vm1102_vm1, %v2759_v47 }
 0xa33   : > { %4822 = vmatmul.mubr.msk.bf16.gmra.mrb[68].mxu0 %vm1102_vm1, %v2760_v45  ;;  %v5169_v45 = vld [vmem:[#allocation8 + $0x18] sm:$0xff]  }
 0xa34   : > { %v3015_v62 = vpop.xlane.xlu0 %3014 }
 0xa38   : > { %v3009_v60 = vpop.xlane.xlu0 %3008  ;;  %v3018_v35 = vpop.xlane.xlu1 %3017 }
 0xa39   : > { %5384 = vrcp.f32 %v3009_v60 }
 0xa3c   : > { %v3012_v37 = vpop.xlane.xlu1 %3011 }
 0xa3d   : > { %5386 = vrcp.f32 %v3012_v37  ;;  %v6910_v37 = vld [vmem:[#allocation8] sm:$0xff]  }
 0xa3e   : > { %5388 = vrcp.f32 %v3018_v35 }
 0xa3f   : > { %5390 = vrcp.f32 %v3015_v62 }
 0xa40   : > { %3529 = vrot.lane.b32.xlu1 %v6120_v5, %s5633_s19 }
 0xa43   : > { %v5385_v43 = vpop.eup %5384 }
 0xa44   : > { %v3027_v8 = vpop.xlane.xlu0 %3026  ;;  %v3039_v44 = vmul.f32 %v5385_v43, %v6767_v34 }
 0xa45   : > { %3527 = vrot.lane.b32.xlu0 %v6122_v25, %s5633_s19 }
 0xa47   : > { %v5387_v7 = vpop.eup %5386 }
 0xa48   : > { %v3021_v13 = vpop.xlane.xlu0 %3020  ;;  %v3030_v36 = vpop.xlane.xlu1 %3029  ;;  %v3040_v40 = vmul.f32 %v5387_v7, %v6777_v12 }
 0xa49   : > { %5392 = vrcp.f32 %v3021_v13  ;;  %v5389_v55 = vpop.eup %5388 }
 0xa4a   : > { %v3047_v39 = vpack.c.bf16 %v3040_v40, %v3039_v44  ;;  %v5391_v19 = vpop.eup %5390  ;;  %v3042_v49 = vmul.f32 %v5389_v55, %v6770_v27 }
 0xa4b   : > { %v3041_v12 = vmul.f32 %v5391_v19, %v6762_v26 }
 0xa4c   : > { %4849 = vmatprep.mubr.msk.bf16.mxu0 %vm1102_vm1, %v3047_v39  ;;  %v3024_v3 = vpop.xlane.xlu1 %3023  ;;  %v3062_v30 = vpop.permute.xlu0 %3061 }
 0xa4d   : > { %5394 = vrcp.f32 %v3024_v3  ;;  %v3048_v21 = vpack.c.bf16 %v3042_v49, %v3041_v12 }
 0xa4e   : > { %5396 = vrcp.f32 %v3030_v36 }
 0xa4f   : > { %5398 = vrcp.f32 %v3027_v8 }
 0xa50   : > { %v3060_v31 = vpop.permute.xlu1 %3059  ;;  %v3732_v56 = vpop.permute.xlu0 %3731 }
 0xa51   : > { %4845 = vmatprep.subr.bf16.mxu0 %v3060_v31  ;;  %v3753_v11 = vsel %vm1012_vm0, %v3732_v56, 0 }
 0xa52   : > { %4846 = vmatpush3.bf16.msra.mxu0 %v3060_v31 }
 0xa53   : > { %4847 = vmatprep.subr.bf16.mxu0 %v3062_v30  ;;  %v5393_v52 = vpop.eup %5392 }
 0xa54   : > { %v3730_v34 = vpop.permute.xlu1 %3729  ;;  %v3043_v27 = vmul.f32 %v5393_v52, %v6786_v54  ;;  %v3736_v28 = vpop.permute.xlu0 %3735 }
 0xa55   : > { %v3750_v14 = vsel %vm1012_vm0, %v3730_v34, 0  ;;  %5045 = vmatprep.subr.msk.bf16.mxu1 %vm1012_vm0, %v3730_v34 }
 0xa56   : > { %4848 = vmatpush3.bf16.msra.mxu0 %v3062_v30  ;;  %4926 = vmatpush3.bf16.xpose.msra.mxu1 %v3750_v14 }
 0xa57   : > { %v5395_v29 = vpop.eup %5394  ;;  %5046 = vmatprep.subr.msk.bf16.mxu1 %vm1012_vm0, %v3732_v56  ;;  %4857 = vmatprep.subr.bf16.mxu0 %v5168_v17 }
 0xa58   : > { %v5397_v20 = vpop.eup %5396  ;;  %v3734_v51 = vpop.permute.xlu1 %3733  ;;  %v3044_v4 = vmul.f32 %v5395_v29, %v6794_v61 }
 0xa59   : > { %4850 = vmatmul.mubr.msk.bf16.vlgmr.msra.gmra.mrb[72].mxu0 %vm1102_vm1, %v3048_v21  ;;  %v5399_v26 = vpop.eup %5398  ;;  %v3046_v16 = vmul.f32 %v5397_v20, %v6788_v57  ;;  %v3756_v61 = vsel %vm1012_vm0, %v3734_v51, 0  ;;  %v3759_v57 = vsel %vm1012_vm0, %v3736_v28, 0  ;;  %v3724_v50 = vpop.permute.xlu0 %3723 }
 0xa5a   : > { %v3049_v38 = vpack.c.bf16 %v3044_v4, %v3043_v27  ;;  %v3045_v9 = vmul.f32 %v5399_v26, %v6782_v33  ;;  %4858 = vmatpush3.bf16.msra.mxu0 %v5168_v17 }
 0xa5b   : > { %4859 = vmatprep.subr.bf16.mxu0 %v5169_v45 }
 0xa5c   : > { %4853 = vmatprep.mubr.msk.bf16.mxu0 %vm1102_vm1, %v3049_v38  ;;  %v3722_v2 = vpop.permute.xlu1 %3721  ;;  %v3050_v54 = vpack.c.bf16 %v3046_v16, %v3045_v9 }
 0xa5d   : > { %4933 = vmatprep.mubr.msk.bf16.mxu1 %vm1012_vm0, %v3722_v2  ;;  %v3728_v33 = vpop.permute.xlu0 %3727  ;;  %v6955_v2 = vld [vmem:[%s7178_s5] ss:$0 sm:$0xff] }
 0xa5e   : > { %4928 = vmatpush3.bf16.xpose.msra.mxu1 %v3753_v11  ;;  %4860 = vmatpush3.bf16.msra.mxu0 %v5169_v45 }
 0xa5f   : > { %5047 = vmatprep.subr.msk.bf16.mxu1 %vm1012_vm0, %v3734_v51  ;;  %4869 = vmatprep.subr.bf16.mxu0 %v6910_v37 }
 0xa60   : > { %v3726_v6 = vpop.permute.xlu1 %3725 }
 0xa61   : > { %4854 = vmatmul.mubr.msk.bf16.gmra.mrb[76].mxu0 %vm1102_vm1, %v3050_v54 }
 0xa66   : > { %4930 = vmatpush3.bf16.xpose.msra.mxu1 %v3756_v61 }
 0xa67   : > { %5048 = vmatprep.subr.msk.bf16.mxu1 %vm1012_vm0, %v3736_v28 }
 0xa6e   : > { %4932 = vmatpush3.bf16.xpose.msra.mxu1 %v3759_v57 }
 0xa75   : > { %4934 = vmatmul.mubr.msk.bf16.vlgmr.msra.gmra.mrb[88].mxu1 %vm1012_vm0, %v3724_v50 }
 0xa76   : > { %4937 = vmatprep.mubr.msk.bf16.mxu1 %vm1012_vm0, %v3726_v6 }
 0xa7d   : > { %4938 = vmatmul.mubr.msk.bf16.gmra.mrb[92].mxu1 %vm1012_vm0, %v3728_v33 }
 0xaae   : > { %v3437_v47 = vpop.xlane.xlu1 %3436 }
 0xaaf   : > { %v3459_v8 = vsub.f32 %v6836_v46, %v3437_v47 }
 0xab0   : > { %v3440_v62 = vpop.xlane.xlu0 %3439 }
 0xab1   : > { %v3460_v60 = vsub.f32 %v6843_v0, %v3440_v62  ;;  %v3467_v40 = vmul.f32 1.442695, %v3459_v8 }
 0xab2   : > { %v3446_v35 = vpop.xlane.xlu1 %3445 }
 0xab3   : > { %v3462_v43 = vsub.f32 %v6838_v1, %v3446_v35  ;;  %v3469_v7 = vmul.f32 1.442695, %v3460_v60 }
 0xab4   : > { %v3443_v13 = vpop.xlane.xlu0 %3442 }
 0xab5   : > { %v3473_v36 = vmul.f32 1.442695, %v3462_v43  ;;  %v3461_v44 = vsub.f32 %v6834_v22, %v3443_v13 }
 0xab7   : > { %5400 = vpow2.f32 %v3473_v36  ;;  %v3471_v39 = vmul.f32 1.442695, %v3461_v44 }
 0xab8   : > { %5402 = vpow2.f32 %v3469_v7  ;;  %v3449_v0 = vpop.xlane.xlu0 %3448  ;;  %v3452_v3 = vpop.xlane.xlu1 %3451  ;;  %v7194_v7 = vld [vmem:[#allocation13_spill] sm:$0xff] }
 0xab9   : > { %5404 = vpow2.f32 %v3471_v39  ;;  %v3463_v55 = vsub.f32 %v6858_v63, %v3449_v0  ;;  %v3464_v46 = vsub.f32 %v6864_v58, %v3452_v3 }
 0xaba   : > { %5406 = vpow2.f32 %v3467_v40 }
 0xabb   : > { %v3475_v49 = vmul.f32 1.442695, %v3463_v55  ;;  %v3477_v52 = vmul.f32 1.442695, %v3464_v46 }
 0xabc   : > { %v3455_v1 = vpop.xlane.xlu0 %3454  ;;  %v3458_v30 = vpop.xlane.xlu1 %3457 }
 0xabd   : > { %v3465_v31 = vsub.f32 %v6853_v48, %v3455_v1  ;;  %v3466_v19 = vsub.f32 %v6861_v42, %v3458_v30 }
 0xabf   : > { %v3479_v22 = vmul.f32 1.442695, %v3465_v31  ;;  %v3481_v34 = vmul.f32 1.442695, %v3466_v19 }
 0xac1   : > { %v6920_v12 = vpop.eup %5400  ;;  %5408 = vpow2.f32 %v3479_v22 }
 0xac2   : > { %v6922_v14 = vpop.eup %5402  ;;  %5410 = vpow2.f32 %v3481_v34  ;;  %v3492_v63 = vsel %vm1102_vm1, %v6920_v12, 0.0 }
 0xac3   : > { %v6926_v58 = vpop.eup %5404  ;;  %5412 = vpow2.f32 %v3475_v49  ;;  %3493 = vadd.xlane.f32.xlu1 %v3492_v63  ;;  %v3486_v56 = vsel %vm1102_vm1, %v6922_v14, 0.0 }
 0xac4   : > { %5414 = vpow2.f32 %v3477_v52  ;;  %v3489_v48 = vsel %vm1102_vm1, %v6926_v58, 0.0  ;;  %v6930_v42 = vpop.eup %5406 }
 0xac5   : > { %3490 = vadd.xlane.f32.xlu0 %v3489_v48  ;;  %v3483_v29 = vsel %vm1102_vm1, %v6930_v42, 0.0  ;;  %v5171_v48 = vld [vmem:[#allocation8 + $0x8] sm:$0xff]  }
 0xac7   : > { %3487 = vadd.xlane.f32.xlu1 %v3486_v56 }
 0xac9   : > { %3484 = vadd.xlane.f32.xlu0 %v3483_v29 }
 0xacb   : > { %v6936_v21 = vpop.eup %5408 }
 0xacc   : > { %v6938_v20 = vpop.eup %5410  ;;  %v3501_v51 = vsel %vm1102_vm1, %v6936_v21, 0.0 }
 0xacd   : > { %v6942_v27 = vpop.eup %5412  ;;  %3502 = vadd.xlane.f32.xlu0 %v3501_v51  ;;  %v3504_v4 = vsel %vm1102_vm1, %v6938_v20, 0.0 }
 0xace   : > { %v6946_v26 = vpop.eup %5414  ;;  %3505 = vadd.xlane.f32.xlu1 %v3504_v4  ;;  %v3495_v38 = vsel %vm1102_vm1, %v6942_v27, 0.0 }
 0xacf   : > { %v3498_v16 = vsel %vm1102_vm1, %v6946_v26, 0.0 }
 0xad1   : > { %3496 = vadd.xlane.f32.xlu0 %v3495_v38 }
 0xad2   : > { %3499 = vadd.xlane.f32.xlu1 %v3498_v16  ;;  %v3528_v16 = vpop.permute.xlu0 %3527 }
 0xae0   : > { %v4787_v11 = vpop.f32.mrb[40].mxu0 }
 0xae1   : > { %v4969_v9 = vadd.f32 %v4787_v11, %v6400_v15  ;;  %v2507_v54 = vpop.f32.mrb[41].mxu0 }
 0xae2   : > { %v4970_v61 = vadd.f32 %v2507_v54, %v6402_v24  ;;  %v4788_v28 = vpop.f32.mrb[42].mxu0 }
 0xae3   : > { %v2554_v57 = vadd.f32 %v4969_v9, %v6955_v2  ;;  %v4971_v50 = vadd.f32 %v4788_v28, %v6404_v41  ;;  %3531 = vrot.lane.b32.xlu1 %v6126_v32, %s5633_s19  ;;  %v2510_v6 = vpop.f32.mrb[43].mxu0  ;;  %v3530_v9 = vpop.permute.xlu1 %3529 }
 0xae4   : > { %v2552_v33 = vadd.f32 %v4970_v61, %v6955_v2  ;;  %v4972_v17 = vadd.f32 %v2510_v6, %v6406_v23 }
 0xae5   : > { %2562 = vst [vmem:[%s6967_s20 + $0x10] sm:$0xff] %v2554_v57  ;;  %v2555_v15 = vadd.f32 %v4971_v50, %v6955_v2 }
 0xae6   : > { %2560 = vst [vmem:[%s6967_s20] sm:$0xff] %v2552_v33  ;;  %v2553_v24 = vadd.f32 %v4972_v17, %v6955_v2 }
 0xae7   : > { %2563 = vst [vmem:[%s6967_s20 + $0x18] sm:$0xff] %v2555_v15  ;;  %3533 = vrot.lane.b32.xlu0 %v6124_v18, %s5633_s19 }
 0xae8   : > { %2561 = vst [vmem:[%s6967_s20 + $0x8] sm:$0xff] %v2553_v24  ;;  %v4791_v41 = vpop.f32.mrb[44].mxu0 }
 0xae9   : > { %v4973_v23 = vadd.f32 %v4791_v41, %v6408_v53  ;;  %v2523_v47 = vpop.f32.mrb[45].mxu0 }
 0xaea   : > { %v4974_v45 = vadd.f32 %v2523_v47, %v6410_v59  ;;  %v4792_v62 = vpop.f32.mrb[46].mxu0 }
 0xaeb   : > { %v2558_v60 = vadd.f32 %v4973_v23, %v6955_v2  ;;  %v4975_v35 = vadd.f32 %v4792_v62, %v6412_v10  ;;  %v2526_v8 = vpop.f32.mrb[47].mxu0 }
 0xaec   : > { %v2556_v43 = vadd.f32 %v4974_v45, %v6955_v2  ;;  %v4976_v13 = vadd.f32 %v2526_v8, %v7194_v7 }
 0xaed   : > { %2566 = vst [vmem:[%s6967_s20 + $0x30] sm:$0xff] %v2558_v60  ;;  %v2559_v36 = vadd.f32 %v4975_v35, %v6955_v2 }
 0xaee   : > { %2564 = vst [vmem:[%s6967_s20 + $0x20] sm:$0xff] %v2556_v43  ;;  %v2557_v44 = vadd.f32 %v4976_v13, %v6955_v2 }
 0xaef   : > { %2567 = vst [vmem:[%s6967_s20 + $0x38] sm:$0xff] %v2559_v36 }
 0xaf0   : > { %2565 = vst [vmem:[%s6967_s20 + $0x28] sm:$0xff] %v2557_v44 }
 0xafa   : > { %v4819_v53 = vpop.f32.mrb[64].mxu0 }
 0xafb   : > { %v2807_v59 = vpop.f32.mrb[65].mxu0 }
 0xafc   : > { %v4820_v40 = vpop.f32.mrb[66].mxu0 }
 0xafd   : > { %v2839_v39 = vpack.c.bf16 %v4820_v40, %v4819_v53  ;;  %v2810_v0 = vpop.f32.mrb[67].mxu0 }
 0xafe   : > { %v2838_v3 = vpack.c.bf16 %v2810_v0, %v2807_v59 }
 0xb06   : > { %v4823_v10 = vpop.f32.mrb[68].mxu0 }
 0xb07   : > { %v2823_v55 = vpop.f32.mrb[69].mxu0 }
 0xb08   : > { %v4824_v46 = vpop.f32.mrb[70].mxu0 }
 0xb09   : > { %v2841_v1 = vpack.c.bf16 %v4824_v46, %v4823_v10  ;;  %v2826_v30 = vpop.f32.mrb[71].mxu0 }
 0xb0a   : > { %v2840_v31 = vpack.c.bf16 %v2826_v30, %v2823_v55  ;;  %v5172_v30 = vld [vmem:[#allocation8 + $0x20] sm:$0xff]  }
 0xb2c   : > { %v4851_v19 = vpop.f32.mrb[72].mxu0 }
 0xb2d   : > { %v3113_v49 = vpop.f32.mrb[73].mxu0 }
 0xb2e   : > { %v4852_v22 = vpop.f32.mrb[74].mxu0 }
 0xb2f   : > { %v3145_v34 = vpack.c.bf16 %v4852_v22, %v4851_v19  ;;  %v3116_v52 = vpop.f32.mrb[75].mxu0 }
 0xb30   : > { %v3144_v63 = vpack.c.bf16 %v3116_v52, %v3113_v49 }
 0xb32   : > { %4861 = vmatprep.mubr.msk.bf16.mxu0 %vm1012_vm0, %v3144_v63 }
 0xb33   : > { %4862 = vmatmul.mubr.msk.bf16.vlgmr.msra.gmra.mrb[80].mxu0 %vm1012_vm0, %v3145_v34  ;;  %v5173_v34 = vld [vmem:[#allocation8 + $0x28] sm:$0xff]  }
 0xb34   : > { %4870 = vmatpush3.bf16.msra.mxu0 %v6910_v37  ;;  %v4855_v56 = vpop.f32.mrb[76].mxu0 }
 0xb35   : > { %v3129_v29 = vpop.f32.mrb[77].mxu0  ;;  %4871 = vmatprep.subr.bf16.mxu0 %v5171_v48 }
 0xb36   : > { %v4856_v51 = vpop.f32.mrb[78].mxu0 }
 0xb37   : > { %v3147_v4 = vpack.c.bf16 %v4856_v51, %v4855_v56  ;;  %v3132_v38 = vpop.f32.mrb[79].mxu0 }
 0xb38   : > { %v3146_v11 = vpack.c.bf16 %v3132_v38, %v3129_v29  ;;  %4872 = vmatpush3.bf16.msra.mxu0 %v5171_v48 }
 0xb39   : > { %4897 = vmatprep.subr.bf16.mxu0 %v3528_v16 }
 0xb3a   : > { %4865 = vmatprep.mubr.msk.bf16.mxu0 %vm1012_vm0, %v3146_v11 }
 0xb3b   : > { %4866 = vmatmul.mubr.msk.bf16.gmra.mrb[84].mxu0 %vm1012_vm0, %v3147_v4 }
 0xb3c   : > { %4873 = vmatprep.mubr.msk.bf16.mxu0 %vm1012_vm0, %v2838_v3 }
 0xb43   : > { %4874 = vmatmul.mubr.msk.bf16.vlgmr.msra.gmra.mrb[80].mxu0 %vm1012_vm0, %v2839_v39 }
 0xb44   : > { %4898 = vmatpush3.bf16.msra.mxu0 %v3528_v16  ;;  %4877 = vmatprep.mubr.msk.bf16.mxu0 %vm1012_vm0, %v2840_v31 }
 0xb45   : > { %4899 = vmatprep.subr.bf16.mxu0 %v3530_v9 }
 0xb48   : > { %4900 = vmatpush3.bf16.msra.mxu0 %v3530_v9  ;;  %v6997_v37 = vpop.f32.mrb[88].mxu1 }
 0xb49   : > { %v6999_v54 = vpop.f32.mrb[89].mxu1  ;;  %v3832_v15 = vsel %vm1102_vm1, %v6997_v37, -inf }
 0xb4a   : > { %v7001_v61 = vpop.f32.mrb[90].mxu1  ;;  %v3826_v28 = vsel %vm1102_vm1, %v6999_v54, -inf }
 0xb4b   : > { %4878 = vmatmul.mubr.msk.bf16.gmra.mrb[84].mxu0 %vm1012_vm0, %v2841_v1  ;;  %v7006_v57 = vpop.f32.mrb[91].mxu1  ;;  %3827 = vmax.xlane.f32.xlu1 %v3826_v28  ;;  %v3835_v6 = vsel %vm1102_vm1, %v7001_v61, -inf }
 0xb4c   : > { %v3829_v50 = vsel %vm1102_vm1, %v7006_v57, -inf }
 0xb4d   : > { %3830 = vmax.xlane.f32.xlu0 %v3829_v50 }
 0xb4f   : > { %3836 = vmax.xlane.f32.xlu1 %v3835_v6 }
 0xb50   : > { %v7012_v33 = vpop.f32.mrb[92].mxu1  ;;  %v3494_v17 = vpop.xlane.xlu1 %3493 }
 0xb51   : > { %v7016_v24 = vpop.f32.mrb[93].mxu1  ;;  %3833 = vmax.xlane.f32.xlu0 %v3832_v15  ;;  %v3844_v8 = vsel %vm1102_vm1, %v7012_v33, -inf }
 0xb52   : > { %v3491_v41 = vpop.xlane.xlu0 %3490  ;;  %v7018_v23 = vpop.f32.mrb[94].mxu1  ;;  %v3838_v60 = vsel %vm1102_vm1, %v7016_v24, -inf }
 0xb53   : > { %v7020_v47 = vpop.f32.mrb[95].mxu1  ;;  %v3847_v43 = vsel %vm1102_vm1, %v7018_v23, -inf }
 0xb54   : > { %v3841_v45 = vsel %vm1102_vm1, %v7020_v47, -inf  ;;  %v3488_v62 = vpop.xlane.xlu1 %3487 }
 0xb55   : > { %5416 = vrcp.f32 %v3488_v62  ;;  %3839 = vmax.xlane.f32.xlu0 %v3838_v60  ;;  %3842 = vmax.xlane.f32.xlu1 %v3841_v45 }
 0xb56   : > { %v3485_v35 = vpop.xlane.xlu0 %3484 }
 0xb57   : > { %5418 = vrcp.f32 %v3485_v35 }
 0xb58   : > { %5420 = vrcp.f32 %v3491_v41 }
 0xb59   : > { %3845 = vmax.xlane.f32.xlu0 %v3844_v8  ;;  %3848 = vmax.xlane.f32.xlu1 %v3847_v43  ;;  %5422 = vrcp.f32 %v3494_v17 }
 0xb5a   : > { %v3503_v7 = vpop.xlane.xlu0 %3502 }
 0xb5b   : > { %v3506_v13 = vpop.xlane.xlu1 %3505  ;;  %5424 = vrcp.f32 %v3503_v7 }
 0xb5e   : > { %v3497_v36 = vpop.xlane.xlu0 %3496 }
 0xb5f   : > { %v5417_v44 = vpop.eup %5416  ;;  %5426 = vrcp.f32 %v3497_v36  ;;  %v3500_v53 = vpop.xlane.xlu1 %3499 }
 0xb60   : > { %5428 = vrcp.f32 %v3500_v53  ;;  %v3516_v39 = vmul.f32 %v5417_v44, %v6922_v14 }
 0xb61   : > { %v5419_v59 = vpop.eup %5418  ;;  %5430 = vrcp.f32 %v3506_v13 }
 0xb62   : > { %v3515_v40 = vmul.f32 %v5419_v59, %v6930_v42  ;;  %v5421_v0 = vpop.eup %5420  ;;  %v3534_v46 = vpop.permute.xlu0 %3533 }
 0xb63   : > { %v3532_v3 = vpop.permute.xlu1 %3531  ;;  %v5423_v55 = vpop.eup %5422  ;;  %v3517_v1 = vmul.f32 %v5421_v0, %v6926_v58 }
 0xb64   : > { %4901 = vmatprep.subr.bf16.mxu0 %v3532_v3  ;;  %v3523_v10 = vpack.c.bf16 %v3516_v39, %v3515_v40  ;;  %v3518_v19 = vmul.f32 %v5423_v55, %v6920_v12 }
 0xb65   : > { %4902 = vmatpush3.bf16.msra.mxu0 %v3532_v3  ;;  %v5425_v31 = vpop.eup %5424 }
 0xb66   : > { %4903 = vmatprep.subr.bf16.mxu0 %v3534_v46  ;;  %4905 = vmatprep.mubr.msk.bf16.mxu0 %vm1102_vm1, %v3523_v10  ;;  %v3524_v14 = vpack.c.bf16 %v3518_v19, %v3517_v1  ;;  %v3521_v12 = vmul.f32 %v5425_v31, %v6936_v21 }
 0xb69   : > { %v5427_v49 = vpop.eup %5426  ;;  %4904 = vmatpush3.bf16.msra.mxu0 %v3534_v46 }
 0xb6a   : > { %v5429_v42 = vpop.eup %5428  ;;  %3920 = vrot.lane.b32.xlu1 %v6120_v5, %s5634_s15  ;;  %v3519_v22 = vmul.f32 %v5427_v49, %v6942_v27  ;;  %4913 = vmatprep.subr.bf16.mxu0 %v5172_v30 }
 0xb6b   : > { %v5431_v52 = vpop.eup %5430  ;;  %v3520_v58 = vmul.f32 %v5429_v42, %v6946_v26 }
 0xb6c   : > { %4906 = vmatmul.mubr.msk.bf16.vlgmr.msra.gmra.mrb[88].mxu0 %vm1102_vm1, %v3524_v14  ;;  %v3522_v48 = vmul.f32 %v5431_v52, %v6938_v20 }
 0xb6d   : > { %v3525_v63 = vpack.c.bf16 %v3520_v58, %v3519_v22  ;;  %4914 = vmatpush3.bf16.msra.mxu0 %v5172_v30 }
 0xb6e   : > { %4915 = vmatprep.subr.bf16.mxu0 %v5173_v34  ;;  %v3526_v5 = vpack.c.bf16 %v3522_v48, %v3521_v12 }
 0xb6f   : > { %4909 = vmatprep.mubr.msk.bf16.mxu0 %vm1102_vm1, %v3525_v63  ;;  %3918 = vrot.lane.b32.xlu0 %v6122_v25, %s5634_s15 }
 0xb71   : > { %4916 = vmatpush3.bf16.msra.mxu0 %v5173_v34 }
 0xb74   : > { %4910 = vmatmul.mubr.msk.bf16.gmra.mrb[92].mxu0 %vm1102_vm1, %v3526_v5 }
 0xbd8   : > { %v3828_v27 = vpop.xlane.xlu1 %3827 }
 0xbd9   : > { %v3850_v51 = vsub.f32 %v6999_v54, %v3828_v27 }
 0xbda   : > { %v3831_v26 = vpop.xlane.xlu0 %3830 }
 0xbdb   : > { %v3851_v56 = vsub.f32 %v7006_v57, %v3831_v26  ;;  %v3858_v11 = vmul.f32 1.442695, %v3850_v51 }
 0xbdc   : > { %v3837_v29 = vpop.xlane.xlu1 %3836 }
 0xbdd   : > { %v3853_v21 = vsub.f32 %v7001_v61, %v3837_v29  ;;  %v3860_v20 = vmul.f32 1.442695, %v3851_v56 }
 0xbde   : > { %v3834_v4 = vpop.xlane.xlu0 %3833 }
 0xbdf   : > { %v3864_v38 = vmul.f32 1.442695, %v3853_v21  ;;  %v3852_v16 = vsub.f32 %v6997_v37, %v3834_v4 }
 0xbe1   : > { %5432 = vpow2.f32 %v3864_v38  ;;  %v3862_v25 = vmul.f32 1.442695, %v3852_v16  ;;  %v5174_v16 = vld [vmem:[#allocation8 + $0x30] sm:$0xff]  }
 0xbe2   : > { %5434 = vpow2.f32 %v3860_v20  ;;  %v3840_v9 = vpop.xlane.xlu0 %3839  ;;  %v3843_v28 = vpop.xlane.xlu1 %3842 }
 0xbe3   : > { %5436 = vpow2.f32 %v3862_v25  ;;  %v3854_v57 = vsub.f32 %v7016_v24, %v3840_v9  ;;  %v3855_v50 = vsub.f32 %v7020_v47, %v3843_v28 }
 0xbe4   : > { %5438 = vpow2.f32 %v3858_v11 }
 0xbe5   : > { %v3866_v15 = vmul.f32 1.442695, %v3854_v57  ;;  %v3868_v45 = vmul.f32 1.442695, %v3855_v50 }
 0xbe6   : > { %v3846_v54 = vpop.xlane.xlu0 %3845  ;;  %v3849_v6 = vpop.xlane.xlu1 %3848 }
 0xbe7   : > { %v3856_v61 = vsub.f32 %v7012_v33, %v3846_v54  ;;  %v3857_v17 = vsub.f32 %v7018_v23, %v3849_v6 }
 0xbe9   : > { %v3870_v37 = vmul.f32 1.442695, %v3856_v61  ;;  %v3872_v41 = vmul.f32 1.442695, %v3857_v17 }
 0xbea   : > { %v3919_v62 = vpop.permute.xlu0 %3918  ;;  %v3921_v30 = vpop.permute.xlu1 %3920 }
 0xbeb   : > { %v7054_v60 = vpop.eup %5432  ;;  %5440 = vpow2.f32 %v3870_v37  ;;  %4941 = vmatprep.subr.bf16.mxu0 %v3919_v62 }
 0xbec   : > { %v7056_v35 = vpop.eup %5434  ;;  %5442 = vpow2.f32 %v3872_v41  ;;  %v3883_v24 = vsel %vm1102_vm1, %v7054_v60, 0.0  ;;  %v5175_v41 = vld [vmem:[#allocation8 + $0x38] sm:$0xff]  }
 0xbed   : > { %v7060_v47 = vpop.eup %5436  ;;  %5444 = vpow2.f32 %v3866_v15  ;;  %3884 = vadd.xlane.f32.xlu1 %v3883_v24  ;;  %v3877_v8 = vsel %vm1102_vm1, %v7056_v35, 0.0 }
 0xbee   : > { %5446 = vpow2.f32 %v3868_v45  ;;  %v3880_v33 = vsel %vm1102_vm1, %v7060_v47, 0.0  ;;  %v5439_v23 = vpop.eup %5438 }
 0xbef   : > { %3881 = vadd.xlane.f32.xlu0 %v3880_v33  ;;  %v3874_v43 = vsel %vm1102_vm1, %v5439_v23, 0.0 }
 0xbf1   : > { %3878 = vadd.xlane.f32.xlu1 %v3877_v8 }
 0xbf3   : > { %3875 = vadd.xlane.f32.xlu0 %v3874_v43 }
 0xbf5   : > { %v7067_v7 = vpop.eup %5440 }
 0xbf6   : > { %v7069_v13 = vpop.eup %5442  ;;  %v3892_v36 = vsel %vm1102_vm1, %v7067_v7, 0.0 }
 0xbf7   : > { %v7073_v44 = vpop.eup %5444  ;;  %3893 = vadd.xlane.f32.xlu0 %v3892_v36  ;;  %v3895_v53 = vsel %vm1102_vm1, %v7069_v13, 0.0 }
 0xbf8   : > { %v7077_v59 = vpop.eup %5446  ;;  %3896 = vadd.xlane.f32.xlu1 %v3895_v53  ;;  %v3886_v40 = vsel %vm1102_vm1, %v7073_v44, 0.0 }
 0xbf9   : > { %v3889_v39 = vsel %vm1102_vm1, %v7077_v59, 0.0 }
 0xbfb   : > { %3887 = vadd.xlane.f32.xlu0 %v3886_v40 }
 0xbfc   : > { %3890 = vadd.xlane.f32.xlu1 %v3889_v39 }
 0xc0d   : > { %3922 = vrot.lane.b32.xlu1 %v6126_v32, %s5634_s15 }
 0xc11   : > { %3924 = vrot.lane.b32.xlu0 %v6124_v18, %s5634_s15 }
 0xc3f   : > { %v4907_v0 = vpop.f32.mrb[88].mxu0 }
 0xc40   : > { %v3585_v3 = vpop.f32.mrb[89].mxu0 }
 0xc41   : > { %v4908_v10 = vpop.f32.mrb[90].mxu0 }
 0xc42   : > { %v3617_v55 = vpack.c.bf16 %v4908_v10, %v4907_v0  ;;  %v3588_v46 = vpop.f32.mrb[91].mxu0 }
 0xc43   : > { %v3616_v1 = vpack.c.bf16 %v3588_v46, %v3585_v3 }
 0xc45   : > { %4917 = vmatprep.mubr.msk.bf16.mxu0 %vm1012_vm0, %v3616_v1 }
 0xc46   : > { %4918 = vmatmul.mubr.msk.bf16.vlgmr.msra.gmra.mrb[80].mxu0 %vm1012_vm0, %v3617_v55 }
 0xc47   : > { %4942 = vmatpush3.bf16.msra.mxu0 %v3919_v62  ;;  %v4911_v31 = vpop.f32.mrb[92].mxu0 }
 0xc48   : > { %4943 = vmatprep.subr.bf16.mxu0 %v3921_v30  ;;  %v3601_v19 = vpop.f32.mrb[93].mxu0 }
 0xc49   : > { %v4912_v49 = vpop.f32.mrb[94].mxu0 }
 0xc4a   : > { %v3619_v32 = vpack.c.bf16 %v4912_v49, %v4911_v31  ;;  %v3604_v42 = vpop.f32.mrb[95].mxu0 }
 0xc4b   : > { %v3618_v14 = vpack.c.bf16 %v3604_v42, %v3601_v19  ;;  %4944 = vmatpush3.bf16.msra.mxu0 %v3921_v30 }
 0xc4d   : > { %4921 = vmatprep.mubr.msk.bf16.mxu0 %vm1012_vm0, %v3618_v14 }
 0xc4e   : > { %4922 = vmatmul.mubr.msk.bf16.gmra.mrb[84].mxu0 %vm1012_vm0, %v3619_v32 }
 0xc7a   : > { %v3885_v18 = vpop.xlane.xlu1 %3884 }
 0xc7c   : > { %v3882_v22 = vpop.xlane.xlu0 %3881 }
 0xc7e   : > { %v3879_v34 = vpop.xlane.xlu1 %3878 }
 0xc7f   : > { %5448 = vrcp.f32 %v3879_v34 }
 0xc80   : > { %v3876_v52 = vpop.xlane.xlu0 %3875 }
 0xc81   : > { %5450 = vrcp.f32 %v3876_v52 }
 0xc82   : > { %5452 = vrcp.f32 %v3882_v22 }
 0xc83   : > { %5454 = vrcp.f32 %v3885_v18 }
 0xc84   : > { %v3894_v58 = vpop.xlane.xlu0 %3893 }
 0xc85   : > { %v3897_v63 = vpop.xlane.xlu1 %3896  ;;  %5456 = vrcp.f32 %v3894_v58 }
 0xc88   : > { %v3888_v12 = vpop.xlane.xlu0 %3887 }
 0xc89   : > { %v5449_v48 = vpop.eup %5448  ;;  %5458 = vrcp.f32 %v3888_v12  ;;  %v3891_v5 = vpop.xlane.xlu1 %3890 }
 0xc8a   : > { %5460 = vrcp.f32 %v3891_v5  ;;  %v3907_v56 = vmul.f32 %v5449_v48, %v7056_v35 }
 0xc8b   : > { %v5451_v27 = vpop.eup %5450  ;;  %5462 = vrcp.f32 %v3897_v63 }
 0xc8c   : > { %v3906_v26 = vmul.f32 %v5451_v27, %v5439_v23  ;;  %v5453_v29 = vpop.eup %5452  ;;  %v3925_v4 = vpop.permute.xlu0 %3924 }
 0xc8d   : > { %v3923_v51 = vpop.permute.xlu1 %3922  ;;  %v5455_v20 = vpop.eup %5454  ;;  %v3908_v38 = vmul.f32 %v5453_v29, %v7060_v47 }
 0xc8e   : > { %4945 = vmatprep.subr.bf16.mxu0 %v3923_v51  ;;  %v3914_v21 = vpack.c.bf16 %v3907_v56, %v3906_v26  ;;  %v3909_v25 = vmul.f32 %v5455_v20, %v7054_v60 }
 0xc8f   : > { %4946 = vmatpush3.bf16.msra.mxu0 %v3923_v51  ;;  %v5457_v11 = vpop.eup %5456 }
 0xc90   : > { %4947 = vmatprep.subr.bf16.mxu0 %v3925_v4  ;;  %4949 = vmatprep.mubr.msk.bf16.mxu0 %vm1102_vm1, %v3914_v21  ;;  %v3915_v57 = vpack.c.bf16 %v3909_v25, %v3908_v38  ;;  %v3912_v17 = vmul.f32 %v5457_v11, %v7067_v7 }
 0xc93   : > { %v5459_v9 = vpop.eup %5458  ;;  %4948 = vmatpush3.bf16.msra.mxu0 %v3925_v4 }
 0xc94   : > { %v5461_v28 = vpop.eup %5460  ;;  %v3910_v50 = vmul.f32 %v5459_v9, %v7073_v44  ;;  %4957 = vmatprep.subr.bf16.mxu0 %v5174_v16 }
 0xc95   : > { %v5463_v54 = vpop.eup %5462  ;;  %v3911_v6 = vmul.f32 %v5461_v28, %v7077_v59 }
 0xc96   : > { %4950 = vmatmul.mubr.msk.bf16.vlgmr.msra.gmra.mrb[96].mxu0 %vm1102_vm1, %v3915_v57  ;;  %v3913_v15 = vmul.f32 %v5463_v54, %v7069_v13 }
 0xc97   : > { %v3916_v61 = vpack.c.bf16 %v3911_v6, %v3910_v50  ;;  %4958 = vmatpush3.bf16.msra.mxu0 %v5174_v16 }
 0xc98   : > { %v3917_v37 = vpack.c.bf16 %v3913_v15, %v3912_v17  ;;  %4959 = vmatprep.subr.bf16.mxu0 %v5175_v41 }
 0xc99   : > { %4953 = vmatprep.mubr.msk.bf16.mxu0 %vm1102_vm1, %v3916_v61 }
 0xc9b   : > { %4960 = vmatpush3.bf16.msra.mxu0 %v5175_v41 }
 0xc9e   : > { %4954 = vmatmul.mubr.msk.bf16.gmra.mrb[100].mxu0 %vm1102_vm1, %v3917_v37 }
 0xd69   : > { %v4951_v45 = vpop.f32.mrb[96].mxu0 }
 0xd6a   : > { %v3976_v62 = vpop.f32.mrb[97].mxu0 }
 0xd6b   : > { %v4952_v60 = vpop.f32.mrb[98].mxu0 }
 0xd6c   : > { %v4008_v35 = vpack.c.bf16 %v4952_v60, %v4951_v45  ;;  %v3979_v24 = vpop.f32.mrb[99].mxu0 }
 0xd6d   : > { %v4007_v47 = vpack.c.bf16 %v3979_v24, %v3976_v62 }
 0xd6f   : > { %4961 = vmatprep.mubr.msk.bf16.mxu0 %vm1012_vm0, %v4007_v47 }
 0xd70   : > { %4962 = vmatmul.mubr.msk.bf16.vlgmr.msra.gmra.mrb[80].mxu0 %vm1012_vm0, %v4008_v35 }
 0xd71   : > { %v4955_v33 = vpop.f32.mrb[100].mxu0 }
 0xd72   : > { %v3992_v23 = vpop.f32.mrb[101].mxu0 }
 0xd73   : > { %v4956_v8 = vpop.f32.mrb[102].mxu0 }
 0xd74   : > { %v4010_v43 = vpack.c.bf16 %v4956_v8, %v4955_v33  ;;  %v3995_v7 = vpop.f32.mrb[103].mxu0 }
 0xd75   : > { %v4009_v13 = vpack.c.bf16 %v3995_v7, %v3992_v23 }
 0xd77   : > { %4965 = vmatprep.mubr.msk.bf16.mxu0 %vm1012_vm0, %v4009_v13 }
 0xd78   : > { %4966 = vmatmul.mubr.msk.bf16.gmra.mrb[84].mxu0 %vm1012_vm0, %v4010_v43 }
 0xe43   : > { %v4963_v36 = vpop.f32.mrb[80].mxu0 }
 0xe44   : > { %v4114_v44 = vadd.f32 %v4963_v36, %v6955_v2  ;;  %v4073_v53 = vpop.f32.mrb[81].mxu0 }
 0xe45   : > { %v4112_v59 = vadd.f32 %v6955_v2, %v4073_v53  ;;  %v4964_v40 = vpop.f32.mrb[82].mxu0 }
 0xe46   : > { %4122 = vst [vmem:[%s6967_s20 + $0x50] sm:$0xff] %v4114_v44  ;;  %v4115_v39 = vadd.f32 %v4964_v40, %v6955_v2  ;;  %v4076_v0 = vpop.f32.mrb[83].mxu0 }
 0xe47   : > { %4120 = vst [vmem:[%s6967_s20 + $0x40] sm:$0xff] %v4112_v59  ;;  %v4113_v3 = vadd.f32 %v6955_v2, %v4076_v0 }
 0xe48   : > { %4123 = vst [vmem:[%s6967_s20 + $0x58] sm:$0xff] %v4115_v39 }
 0xe49   : > { %4121 = vst [vmem:[%s6967_s20 + $0x48] sm:$0xff] %v4113_v3 }
 0xe4b   : > { %v4967_v10 = vpop.f32.mrb[84].mxu0 }
 0xe4c   : > { %v4118_v55 = vadd.f32 %v4967_v10, %v6955_v2  ;;  %v4089_v46 = vpop.f32.mrb[85].mxu0 }
 0xe4d   : > { %v4116_v1 = vadd.f32 %v6955_v2, %v4089_v46  ;;  %v4968_v30 = vpop.f32.mrb[86].mxu0 }
 0xe4e   : > { %4126 = vst [vmem:[%s6967_s20 + $0x70] sm:$0xff] %v4118_v55  ;;  %v4119_v31 = vadd.f32 %v4968_v30, %v6955_v2  ;;  %v4092_v19 = vpop.f32.mrb[87].mxu0 }
 0xe4f   : > { %4124 = vst [vmem:[%s6967_s20 + $0x60] sm:$0xff] %v4116_v1  ;;  %v4117_v49 = vadd.f32 %v6955_v2, %v4092_v19 }
 0xe50   : > { %4127 = vst [vmem:[%s6967_s20 + $0x78] sm:$0xff] %v4119_v31 }
 0xe51   : > { %4125 = vst [vmem:[%s6967_s20 + $0x68] sm:$0xff] %v4117_v49 }
 0xe52   : > { %5563 = shalt.err (!%p5560_p2)
}
 0xe53   : > { %s5564_s19 = scalar_lea.hbm %s7123_s27, 2048  ;;  %s5568_s30 = scalar_lea.hbm %s7179_s6, 4096 }
 0xe54   : > { %p5565_p13 = scmp.ne.s32.totalorder %s7123_s27, %s5564_s19  ;;  %p5569_p4 = scmp.lt.u32.totalorder %s7123_s27, %s7179_s6 }
 0xe55   : > { %p5570_p7 = scmp.lt.u32.totalorder %s5568_s30, %s5564_s19  ;;  %p5572_p11 = scmp.lt.u32.totalorder %s5564_s19, %s7123_s27 }
 0xe56   : > { %p5566_p6 = pnand %p5565_p13, %p7195_p0 }
 0xe57   : > { %p5571_p8 = por %p5570_p7, %p5569_p4 }
 0xe58   : > { %p5567_p10 = pneg %p5566_p6 }
 0xe59   : > { %p5573_p1 = por %p5572_p11, %p5571_p8 }
 0xe5b   : > { %p5574_p3 = pnand %p5573_p1, %p5567_p10 }
 0xe5d   : > { %5577 = shalt.err (!%p5574_p3)
}
 0xe5e   : > { %s5636_s14 = smov 128   ;;  %s5637_s8 = smov 8  }
 0xe5f   : > { %5059 = dma.vmem_to_hbm [thread:$0]  (%p7195_p0), %s7125_s10, 2048, %s7123_s27, %s4129_s25, %s5636_s14, %s5636_s14, %s5637_s8  }
 0xe60 PF: > { %s4157_s29 = sand.u32 1, %s5608_s21   ;;  %p7196_p5 = scmp.ne.s32.totalorder %s7184_s28, 0 }
 0xe61   : > { %p7197_p9 = scmp.ge.s32.totalorder %s5620_s24, 2  ;;  %s4158_s16 = scalar_lea.sflag [#allocation5], %s4157_s29 }
 0xe63   : > { %p5073_p12 = pnand %p7197_p9, %p7196_p5 }
 0xe65   : > { %5603 = dma.done.wait (!%p5073_p12), %s4158_s16, 2048  }
 0xe66   : > { %5605 = vsyncadd (!%p5073_p12), %s4158_s16, 4294965248  ;;  %p20_p2 = scmp.ge.s32.totalorder %s5783_s26, 4   ;;  %s7198_s21 = smov %s5612_s22 }
 0xe67   : > { %s7199_s22 = smov %s5616_s23  ;;  %s7200_s23 = smov %s5792_s11 }
 0xe68   : > { %s7201_s24 = smov %s5783_s26  ;;  %22 = sbr.rel (!%p20_p2) target bundleno = 6 (0x6), region = 97 }
 0xe6f   :  { %4163 = vsyncpa [#allocation4], 1 }
 0xe70   :  { %4165 = vsyncpa [#allocation4 + $0x1], 1 }
 0xe71   :  { %4166 = vsyncpa [#allocation7], 1 }
 0xe72   :  { %4167 = vsyncpa [#allocation5], 1 }
 0xe73   :  { %4169 = vsyncpa [#allocation5 + $0x1], 1 }

</bundles_post_ra>
